<compile_context>
chip_gen: v5e
topology: v5e:2x2
jax: 0.10.0
libtpu: 0.0.40
codegen_flags: <defaults>
</compile_context>

<pallas_src>
import functools

import jax
import jax.numpy as jnp
import numpy as np
from jax import lax
from jax.experimental import pallas as pl
from jax.experimental.pallas import tpu as pltpu

EPS = 1e-5


def _round_up(x, n):
    return ((x + n - 1) // n) * n


def _vmem_limit_bytes():
    # v5e/v6e: 128 MiB physical VMEM; v7x: 64 MiB per TensorCore.  Use ~70% of
    # physical (capped at 100 MiB) so double-buffering always has headroom.
    try:
        cap = int(pltpu.get_tpu_info().vmem_capacity_bytes)
    except Exception:
        cap = 64 * 1024 * 1024
    return int(min(cap * 0.7, 100 * 1024 * 1024))


def _pick_batch_tile(n, per_img_bytes, fixed_bytes, vmem_budget, rows_per_img,
                     target_rows=2048):
    """Largest divisor of n (images per grid step) that fits the VMEM budget."""
    cap = max(1, (vmem_budget - fixed_bytes) // max(per_img_bytes, 1))
    goal = int(max(1, min(cap, max(1, target_rows // max(rows_per_img, 1)), n)))
    for d in range(goal, 0, -1):
        if n % d == 0:
            return d
    return 1


# ----------------------------------------------------------------------------
# Wrapper-side space-to-depth: turns a stride-s KxK conv into a stride-1
# ceil(K/s) x ceil(K/s) conv over s*s*Cin channels (one pass over the input).
# ----------------------------------------------------------------------------
def _space_to_depth_x(x_pad, stride, hq_need, wq_need):
    n, hp, wp, c = x_pad.shape
    hq = max(-(-hp // stride), hq_need)
    wq = max(-(-wp // stride), wq_need)
    x_pad = jnp.pad(x_pad, ((0, 0), (0, hq * stride - hp),
                            (0, wq * stride - wp), (0, 0)))
    x_q = x_pad.reshape(n, hq, stride, wq, stride, c)
    x_q = x_q.transpose(0, 1, 3, 2, 4, 5).reshape(n, hq, wq, stride * stride * c)
    return x_q


def _space_to_depth_w(w, stride):
    k, _, cin, cout = w.shape
    kq = -(-k // stride)
    w_p = jnp.pad(w, ((0, kq * stride - k), (0, kq * stride - k), (0, 0), (0, 0)))
    w_p = w_p.reshape(kq, stride, kq, stride, cin, cout)
    w_p = w_p.transpose(0, 2, 1, 3, 4, 5).reshape(kq, kq, stride * stride * cin, cout)
    return w_p


# ----------------------------------------------------------------------------
# Pass 1: stride-1 KxK conv on a block of whole padded images (in-kernel
# im2col via static window slices -> K*K accumulated MXU matmuls) + per-tile
# partial BN sum / sumsq (enables "parallel" grid semantics / megacore).
# ----------------------------------------------------------------------------
def _conv_stats_kernel(x_ref, w_ref, conv_ref, stats_ref, *, k, hout, wout):
    nb = conv_ref.shape[0]
    cin = x_ref.shape[-1]
    cout_p = conv_ref.shape[-1]
    m = nb * hout * wout

    acc = jnp.zeros((m, cout_p), jnp.float32)
    for kh in range(k):
        for kw in range(k):
            taps = x_ref[:, kh:kh + hout, kw:kw + wout, :].reshape(m, cin)
            acc = acc + jnp.dot(taps, w_ref[kh * k + kw],
                                preferred_element_type=jnp.float32)

    # bf16 intermediate halves the pass-1 writeback / pass-2 read HBM traffic;
    # BN statistics are taken from the f32 accumulator *before* the downcast.
    conv_ref[...] = acc.reshape(nb, hout, wout, cout_p).astype(conv_ref.dtype)
    stats_ref[0, 0:1, :] = jnp.sum(acc, axis=0, keepdims=True)
    stats_ref[0, 1:2, :] = jnp.sum(acc * acc, axis=0, keepdims=True)


# ----------------------------------------------------------------------------
# Pass 2: BN affine (+ residual) (+ relu), lane-dense bf16/f32 stores.
# ----------------------------------------------------------------------------
def _bn_act_kernel(conv_ref, scale_ref, shift_ref, *rest, apply_relu,
                   has_residual):
    if has_residual:
        res_ref, o_ref = rest
    else:
        (o_ref,) = rest

    out = conv_ref[...].astype(jnp.float32) * scale_ref[...] + shift_ref[...]
    if has_residual:
        out = out + res_ref[...].astype(jnp.float32)
    if apply_relu:
        out = jnp.maximum(out, 0.0)
    o_ref[...] = out.astype(o_ref.dtype)


# ----------------------------------------------------------------------------
# One (masked conv -> batchnorm -> [+residual] -> [relu]) stage.
# ----------------------------------------------------------------------------
def masked_conv_bn(x, weight, mask, gamma, beta, *, stride, apply_relu,
                   residual=None, out_dtype=jnp.bfloat16):
    """x: (N, H, W, Cx) NHWC; Cx >= weight Cin (extra channels are zero pad).
    weight/mask: (K, K, Cin, Cout) HWIO.  Returns (N, Hout, Wout, Cout_p) in
    out_dtype, Cout_p = round_up(Cout, 128); channels >= Cout are exactly 0."""
    n, h, wsp, cx = x.shape
    k, _, cin_w, cout = weight.shape
    pad = k // 2                       # padding=1 for conv3x3, 0 for 1x1
    hout = (h + 2 * pad - k) // stride + 1
    wout = (wsp + 2 * pad - k) // stride + 1
    cout_p = _round_up(cout, 128)

    # MaskedConv2d: weight * mask; zero-pad Cin up to the (channel-padded)
    # input width -- the padded input channels are zero, conv is unchanged.
    w_eff = weight * mask
    if cx > cin_w:
        w_eff = jnp.pad(w_eff, ((0, 0), (0, 0), (0, cx - cin_w), (0, 0)))

    x_b = x.astype(jnp.bfloat16)

    if k == 1 and stride > 1:
        # 1x1 strided conv (projection shortcut): subsample in the wrapper.
        x_b = x_b[:, ::stride, ::stride, :]
        stride = 1

    if pad > 0:
        x_b = jnp.pad(x_b, ((0, 0), (pad, pad), (pad, pad), (0, 0)))

    if stride > 1:
        # Space-to-depth so the kernel only ever does stride-1 window slices.
        k_eff = -(-k // stride)
        x_b = _space_to_depth_x(x_b, stride, hout + k_eff - 1, wout + k_eff - 1)
        w_eff = _space_to_depth_w(w_eff, stride)
    else:
        k_eff = k

    cin_eff = x_b.shape[-1]
    w_mat = jnp.pad(w_eff.reshape(k_eff * k_eff, cin_eff, cout),
                    ((0, 0), (0, 0), (0, cout_p - cout))).astype(jnp.bfloat16)

    # ---- batch-tile sizing from the per-chip VMEM budget -------------------
    vmem_limit = _vmem_limit_bytes()
    rows_img = hout * wout
    per_img = (2 * x_b.shape[1] * x_b.shape[2] * cin_eff * 2   # x block (2 bufs)
               + 2 * rows_img * cout_p * 2                     # conv out (2 bufs)
               + 2 * rows_img * cout_p * 4                     # f32 acc (+temp)
               + 2 * rows_img * cin_eff * 2)                   # tap slices
    fixed = 2 * k_eff * k_eff * cin_eff * cout_p * 2 + 4 * cout_p * 4
    nb = _pick_batch_tile(n, per_img, fixed, vmem_limit // 2, rows_img)
    num_tiles = n // nb

    # ---- pass 1: conv + per-tile partial BN stats ("parallel" grid) --------
    conv_out, stats = pl.pallas_call(
        functools.partial(_conv_stats_kernel, k=k_eff, hout=hout, wout=wout),
        out_shape=(jax.ShapeDtypeStruct((n, hout, wout, cout_p), jnp.bfloat16),
                   jax.ShapeDtypeStruct((num_tiles, 2, cout_p), jnp.float32)),
        grid=(num_tiles,),
        in_specs=[
            pl.BlockSpec((nb,) + x_b.shape[1:], lambda i: (i, 0, 0, 0)),
            # Constant index_map -> the pipeline does not re-DMA the resident
            # weight block after step 0 (effectively a single live copy).
            pl.BlockSpec(w_mat.shape, lambda i: (0, 0, 0)),
        ],
        out_specs=(
            pl.BlockSpec((nb, hout, wout, cout_p), lambda i: (i, 0, 0, 0)),
            pl.BlockSpec((1, 2, cout_p), lambda i: (i, 0, 0)),
        ),
        compiler_params=pltpu.CompilerParams(
            dimension_semantics=("parallel",),   # partial stats -> shardable
            vmem_limit_bytes=vmem_limit),
    )(x_b, w_mat)

    # Global BN batch stats (biased variance, training mode).
    # TODO(synk): E[x^2]-E[x]^2 in f32 can cancel when |mean| >> std; move to
    # mean-centred (Welford) partials if tighter accuracy is ever required.
    m_total = n * hout * wout
    sums = jnp.sum(stats, axis=0)                       # (2, Cout_p)
    mean = sums[0] / m_total
    var = jnp.maximum(sums[1] / m_total - mean * mean, 0.0)
    scale = gamma * lax.rsqrt(var[:cout] + EPS)
    shift = beta - mean[:cout] * scale
    scale = jnp.pad(scale, (0, cout_p - cout)).reshape(1, 1, 1, cout_p)
    shift = jnp.pad(shift, (0, cout_p - cout)).reshape(1, 1, 1, cout_p)

    # ---- pass 2: BN affine (+ residual) (+ relu) ----------------------------
    inputs = [conv_out, scale, shift]
    in_specs = [pl.BlockSpec((nb, hout, wout, cout_p), lambda i: (i, 0, 0, 0)),
                pl.BlockSpec((1, 1, 1, cout_p), lambda i: (0, 0, 0, 0)),
                pl.BlockSpec((1, 1, 1, cout_p), lambda i: (0, 0, 0, 0))]
    if residual is not None:
        res = residual.astype(jnp.bfloat16)
        if res.shape[-1] < cout_p:
            res = jnp.pad(res, ((0, 0),) * 3 + ((0, cout_p - res.shape[-1]),))
        inputs.append(res)
        in_specs.append(
            pl.BlockSpec((nb, hout, wout, cout_p), lambda i: (i, 0, 0, 0)))

    # Reuse the conv_out HBM buffer for the output when dtypes match.
    aliases = {0: 0} if jnp.dtype(out_dtype) == conv_out.dtype else {}

    out = pl.pallas_call(
        functools.partial(_bn_act_kernel, apply_relu=apply_relu,
                          has_residual=residual is not None),
        out_shape=jax.ShapeDtypeStruct((n, hout, wout, cout_p), out_dtype),
        grid=(num_tiles,),
        in_specs=in_specs,
        out_specs=pl.BlockSpec((nb, hout, wout, cout_p), lambda i: (i, 0, 0, 0)),
        input_output_aliases=aliases,
        compiler_params=pltpu.CompilerParams(
            dimension_semantics=("parallel",),
            vmem_limit_bytes=vmem_limit),
    )(*inputs)
    return out


# ----------------------------------------------------------------------------
# BasicBlock: parameters + forward
# ----------------------------------------------------------------------------
def init_basic_block(key, in_planes, planes, stride):
    ks = jax.random.split(key, 8)
    p = {
        "w1": 0.1 * jax.random.normal(ks[0], (3, 3, in_planes, planes), jnp.float32),
        "m1": jnp.ones((3, 3, in_planes, planes), jnp.float32),   # mask_weight = ones
        "g1": 1.0 + 0.1 * jax.random.normal(ks[1], (planes,), jnp.float32),
        "b1": 0.1 * jax.random.normal(ks[2], (planes,), jnp.float32),
        "w2": 0.1 * jax.random.normal(ks[3], (3, 3, planes, planes), jnp.float32),
        "m2": jnp.ones((3, 3, planes, planes), jnp.float32),
        "g2": 1.0 + 0.1 * jax.random.normal(ks[4], (planes,), jnp.float32),
        "b2": 0.1 * jax.random.normal(ks[5], (planes,), jnp.float32),
    }
    if stride != 1 or in_planes != planes:   # expansion == 1
        p["ws"] = 0.1 * jax.random.normal(ks[6], (1, 1, in_planes, planes), jnp.float32)
        p["ms"] = jnp.ones((1, 1, in_planes, planes), jnp.float32)
        p["gs"] = 1.0 + 0.1 * jax.random.normal(ks[7], (planes,), jnp.float32)
        p["bs"] = jnp.zeros((planes,), jnp.float32)
    return p


def basic_block_forward(params, x_nchw, stride):
    x = jnp.transpose(x_nchw, (0, 2, 3, 1))                       # NCHW -> NHWC
    planes = params["w1"].shape[-1]

    if "ws" in params:
        shortcut = masked_conv_bn(x, params["ws"], params["ms"],
                                  params["gs"], params["bs"],
                                  stride=stride, apply_relu=False,
                                  out_dtype=jnp.bfloat16)
    else:
        shortcut = x   # identity; channel-padded inside the pass-2 wrapper

    out1 = masked_conv_bn(x, params["w1"], params["m1"],
                          params["g1"], params["b1"],
                          stride=stride, apply_relu=True,
                          out_dtype=jnp.bfloat16)
    out = masked_conv_bn(out1, params["w2"], params["m2"],
                         params["g2"], params["b2"],
                         stride=1, apply_relu=True, residual=shortcut,
                         out_dtype=jnp.float32)

    out = out[..., :planes]                  # drop channel padding once, at the end
    return jnp.transpose(out, (0, 3, 1, 2))  # NHWC -> NCHW


# ----------------------------------------------------------------------------
# Pure-JAX reference (f32 HIGHEST) for correctness check only
# ----------------------------------------------------------------------------
def _ref_conv(x, w, stride, pad):
    return lax.conv_general_dilated(
        x, w, (stride, stride), [(pad, pad), (pad, pad)],
        dimension_numbers=("NHWC", "HWIO", "NHWC"),
        precision=lax.Precision.HIGHEST)


def _ref_bn(x, g, b):
    mean = jnp.mean(x, axis=(0, 1, 2), keepdims=True)
    var = jnp.mean((x - mean) ** 2, axis=(0, 1, 2), keepdims=True)
    return (x - mean) * lax.rsqrt(var + EPS) * g + b


def basic_block_ref(params, x_nchw, stride):
    x = jnp.transpose(x_nchw, (0, 2, 3, 1))
    if "ws" in params:
        s = _ref_bn(_ref_conv(x, params["ws"] * params["ms"], stride, 0),
                    params["gs"], params["bs"])
    else:
        s = x
    o = jax.nn.relu(_ref_bn(_ref_conv(x, params["w1"] * params["m1"], stride, 1),
                            params["g1"], params["b1"]))
    o = _ref_bn(_ref_conv(o, params["w2"] * params["m2"], 1, 1),
                params["g2"], params["b2"])
    o = jax.nn.relu(o + s)
    return jnp.transpose(o, (0, 3, 1, 2))


# ----------------------------------------------------------------------------
if __name__ == "__main__":
    key = jax.random.PRNGKey(0)
    kx, kp = jax.random.split(key)

    N, in_planes, planes, H, W, stride = 2, 4, 8, 16, 16, 2
    x = jax.random.normal(kx, (N, in_planes, H, W), jnp.float32)   # NCHW like torch
    params = init_basic_block(kp, in_planes, planes, stride)

    fwd = jax.jit(basic_block_forward, static_argnums=2)
    out = jax.block_until_ready(fwd(params, x, stride))

    ref = jax.block_until_ready(basic_block_ref(params, x, stride))
    assert out.shape == (N, planes, H // stride, W // stride)
    # Tolerance covers bf16 MXU operands and bf16 stage intermediates vs the
    # f32 HIGHEST reference.
    np.testing.assert_allclose(np.asarray(out), np.asarray(ref),
                               rtol=3e-2, atol=3e-2)
    print("KERNEL_OK")
</pallas_src>

<mosaic_0001>
module attributes {stable_mosaic.version = 11 : i64} {
  func.func @_conv_stats_kernel(%arg0: i32, %arg1: memref<2x9x9x16xbf16, #tpu.memory_space<vmem>>, %arg2: memref<4x16x128xbf16, #tpu.memory_space<vmem>>, %arg3: memref<2x8x8x128xbf16, #tpu.memory_space<vmem>>, %arg4: memref<1x2x128xf32, #tpu.memory_space<vmem>>) attributes {dimension_semantics = [#tpu.dimension_semantics<parallel>], iteration_bounds = array<i64: 1>, scalar_prefetch = 0 : i64, scratch_operands = 0 : i64, tpu.core_type = #tpu.core_type<tc>, window_params = [{transform_indices = @transform_0, window_bounds = array<i64: 2, 9, 9, 16>}, {pipeline_mode = #tpu.pipeline_mode<synchronous>, transform_indices = @transform_1, window_bounds = array<i64: 4, 16, 128>}, {transform_indices = @transform_2, window_bounds = array<i64: 2, 8, 8, 128>}, {transform_indices = @transform_3, window_bounds = array<i64: 1, 2, 128>}]} {
    %cst = arith.constant 0.000000e+00 : f32
    %0 = vector.broadcast %cst : f32 to vector<128x128xf32>
    %c0 = arith.constant 0 : index
    %c0_0 = arith.constant 0 : index
    %c0_1 = arith.constant 0 : index
    %c0_2 = arith.constant 0 : index
    %1 = vector.load %arg1[%c0, %c0_0, %c0_1, %c0_2] : memref<2x9x9x16xbf16, #tpu.memory_space<vmem>>, vector<2x8x8x16xbf16>
    %2 = vector.shape_cast %1 : vector<2x8x8x16xbf16> to vector<128x16xbf16>
    %c0_3 = arith.constant 0 : index
    %c0_4 = arith.constant 0 : index
    %c0_5 = arith.constant 0 : index
    %3 = vector.load %arg2[%c0_3, %c0_4, %c0_5] : memref<4x16x128xbf16, #tpu.memory_space<vmem>>, vector<1x16x128xbf16>
    %4 = vector.shape_cast %3 : vector<1x16x128xbf16> to vector<16x128xbf16>
    %cst_6 = arith.constant dense<0.000000e+00> : vector<128x128xf32>
    %5 = tpu.matmul %2, %4, %cst_6 {dimension_numbers = #tpu.dot_dimension_numbers<[1], [0], [0], [1], [0, 0, 1, 1], [], []>} : vector<128x16xbf16>, vector<16x128xbf16>, vector<128x128xf32> -> vector<128x128xf32>
    %6 = arith.addf %0, %5 : vector<128x128xf32>
    %c0_7 = arith.constant 0 : index
    %c0_8 = arith.constant 0 : index
    %c1 = arith.constant 1 : index
    %c0_9 = arith.constant 0 : index
    %7 = vector.load %arg1[%c0_7, %c0_8, %c1, %c0_9] : memref<2x9x9x16xbf16, #tpu.memory_space<vmem>>, vector<2x8x8x16xbf16>
    %8 = vector.shape_cast %7 : vector<2x8x8x16xbf16> to vector<128x16xbf16>
    %c1_10 = arith.constant 1 : index
    %c0_11 = arith.constant 0 : index
    %c0_12 = arith.constant 0 : index
    %9 = vector.load %arg2[%c1_10, %c0_11, %c0_12] : memref<4x16x128xbf16, #tpu.memory_space<vmem>>, vector<1x16x128xbf16>
    %10 = vector.shape_cast %9 : vector<1x16x128xbf16> to vector<16x128xbf16>
    %cst_13 = arith.constant dense<0.000000e+00> : vector<128x128xf32>
    %11 = tpu.matmul %8, %10, %cst_13 {dimension_numbers = #tpu.dot_dimension_numbers<[1], [0], [0], [1], [0, 0, 1, 1], [], []>} : vector<128x16xbf16>, vector<16x128xbf16>, vector<128x128xf32> -> vector<128x128xf32>
    %12 = arith.addf %6, %11 : vector<128x128xf32>
    %c0_14 = arith.constant 0 : index
    %c1_15 = arith.constant 1 : index
    %c0_16 = arith.constant 0 : index
    %c0_17 = arith.constant 0 : index
    %13 = vector.load %arg1[%c0_14, %c1_15, %c0_16, %c0_17] : memref<2x9x9x16xbf16, #tpu.memory_space<vmem>>, vector<2x8x8x16xbf16>
    %14 = vector.shape_cast %13 : vector<2x8x8x16xbf16> to vector<128x16xbf16>
    %c2 = arith.constant 2 : index
    %c0_18 = arith.constant 0 : index
    %c0_19 = arith.constant 0 : index
    %15 = vector.load %arg2[%c2, %c0_18, %c0_19] : memref<4x16x128xbf16, #tpu.memory_space<vmem>>, vector<1x16x128xbf16>
    %16 = vector.shape_cast %15 : vector<1x16x128xbf16> to vector<16x128xbf16>
    %cst_20 = arith.constant dense<0.000000e+00> : vector<128x128xf32>
    %17 = tpu.matmul %14, %16, %cst_20 {dimension_numbers = #tpu.dot_dimension_numbers<[1], [0], [0], [1], [0, 0, 1, 1], [], []>} : vector<128x16xbf16>, vector<16x128xbf16>, vector<128x128xf32> -> vector<128x128xf32>
    %18 = arith.addf %12, %17 : vector<128x128xf32>
    %c0_21 = arith.constant 0 : index
    %c1_22 = arith.constant 1 : index
    %c1_23 = arith.constant 1 : index
    %c0_24 = arith.constant 0 : index
    %19 = vector.load %arg1[%c0_21, %c1_22, %c1_23, %c0_24] : memref<2x9x9x16xbf16, #tpu.memory_space<vmem>>, vector<2x8x8x16xbf16>
    %20 = vector.shape_cast %19 : vector<2x8x8x16xbf16> to vector<128x16xbf16>
    %c3 = arith.constant 3 : index
    %c0_25 = arith.constant 0 : index
    %c0_26 = arith.constant 0 : index
    %21 = vector.load %arg2[%c3, %c0_25, %c0_26] : memref<4x16x128xbf16, #tpu.memory_space<vmem>>, vector<1x16x128xbf16>
    %22 = vector.shape_cast %21 : vector<1x16x128xbf16> to vector<16x128xbf16>
    %cst_27 = arith.constant dense<0.000000e+00> : vector<128x128xf32>
    %23 = tpu.matmul %20, %22, %cst_27 {dimension_numbers = #tpu.dot_dimension_numbers<[1], [0], [0], [1], [0, 0, 1, 1], [], []>} : vector<128x16xbf16>, vector<16x128xbf16>, vector<128x128xf32> -> vector<128x128xf32>
    %24 = arith.addf %18, %23 : vector<128x128xf32>
    %25 = vector.shape_cast %24 : vector<128x128xf32> to vector<2x8x8x128xf32>
    %26 = arith.truncf %25 : vector<2x8x8x128xf32> to vector<2x8x8x128xbf16>
    %c0_28 = arith.constant 0 : index
    %c0_29 = arith.constant 0 : index
    %c0_30 = arith.constant 0 : index
    %c0_31 = arith.constant 0 : index
    %27 = vector.load %arg3[%c0_28, %c0_29, %c0_30, %c0_31] : memref<2x8x8x128xbf16, #tpu.memory_space<vmem>>, vector<2x8x8x128xbf16>
    tpu.vector_store %arg3[%c0_28, %c0_29, %c0_30, %c0_31], %26 {strides = array<i32>} : memref<2x8x8x128xbf16, #tpu.memory_space<vmem>>, vector<2x8x8x128xbf16>,
    %cst_32 = arith.constant dense<0.000000e+00> : vector<128xf32>
    %28 = vector.multi_reduction <add>, %24, %cst_32 [0] : vector<128x128xf32> to vector<128xf32>
    %29 = vector.shape_cast %28 : vector<128xf32> to vector<1x128xf32>
    %c0_33 = arith.constant 0 : index
    %c0_34 = arith.constant 0 : index
    %c0_35 = arith.constant 0 : index
    %30 = vector.load %arg4[%c0_33, %c0_34, %c0_35] : memref<1x2x128xf32, #tpu.memory_space<vmem>>, vector<1x1x128xf32>
    %31 = vector.shape_cast %30 : vector<1x1x128xf32> to vector<1x128xf32>
    %32 = vector.shape_cast %29 : vector<1x128xf32> to vector<1x1x128xf32>
    tpu.vector_store %arg4[%c0_33, %c0_34, %c0_35], %32 {strides = array<i32>} : memref<1x2x128xf32, #tpu.memory_space<vmem>>, vector<1x1x128xf32>,
    %33 = arith.mulf %24, %24 : vector<128x128xf32>
    %cst_36 = arith.constant dense<0.000000e+00> : vector<128xf32>
    %34 = vector.multi_reduction <add>, %33, %cst_36 [0] : vector<128x128xf32> to vector<128xf32>
    %35 = vector.shape_cast %34 : vector<128xf32> to vector<1x128xf32>
    %c0_37 = arith.constant 0 : index
    %c1_38 = arith.constant 1 : index
    %c0_39 = arith.constant 0 : index
    %36 = vector.load %arg4[%c0_37, %c1_38, %c0_39] : memref<1x2x128xf32, #tpu.memory_space<vmem>>, vector<1x1x128xf32>
    %37 = vector.shape_cast %36 : vector<1x1x128xf32> to vector<1x128xf32>
    %38 = vector.shape_cast %35 : vector<1x128xf32> to vector<1x1x128xf32>
    tpu.vector_store %arg4[%c0_37, %c1_38, %c0_39], %38 {strides = array<i32>} : memref<1x2x128xf32, #tpu.memory_space<vmem>>, vector<1x1x128xf32>,
    return
  }
  func.func @transform_0(%arg0: i32) -> (i32, i32, i32, i32) {
    %c0_i32 = arith.constant 0 : i32
    %c0_i32_0 = arith.constant 0 : i32
    %c0_i32_1 = arith.constant 0 : i32
    %c0_i32_2 = arith.constant 0 : i32
    return %arg0, %c0_i32, %c0_i32_0, %c0_i32_1 : i32, i32, i32, i32
  }
  func.func @transform_1(%arg0: i32) -> (i32, i32, i32) {
    %c0_i32 = arith.constant 0 : i32
    %c0_i32_0 = arith.constant 0 : i32
    %c0_i32_1 = arith.constant 0 : i32
    %c0_i32_2 = arith.constant 0 : i32
    return %c0_i32, %c0_i32_0, %c0_i32_1 : i32, i32, i32
  }
  func.func @transform_2(%arg0: i32) -> (i32, i32, i32, i32) {
    %c0_i32 = arith.constant 0 : i32
    %c0_i32_0 = arith.constant 0 : i32
    %c0_i32_1 = arith.constant 0 : i32
    %c0_i32_2 = arith.constant 0 : i32
    return %arg0, %c0_i32, %c0_i32_0, %c0_i32_1 : i32, i32, i32, i32
  }
  func.func @transform_3(%arg0: i32) -> (i32, i32, i32) {
    %c0_i32 = arith.constant 0 : i32
    %c0_i32_0 = arith.constant 0 : i32
    %c0_i32_1 = arith.constant 0 : i32
    return %arg0, %c0_i32, %c0_i32_0 : i32, i32, i32
  }
}

module attributes {stable_mosaic.version = 11 : i64} {
  func.func @_bn_act_kernel(%arg0: i32, %arg1: memref<2x8x8x128xbf16, #tpu.memory_space<vmem>>, %arg2: memref<1x1x1x128xf32, #tpu.memory_space<vmem>>, %arg3: memref<1x1x1x128xf32, #tpu.memory_space<vmem>>, %arg4: memref<2x8x8x128xbf16, #tpu.memory_space<vmem>>) attributes {dimension_semantics = [#tpu.dimension_semantics<parallel>], iteration_bounds = array<i64: 1>, scalar_prefetch = 0 : i64, scratch_operands = 0 : i64, tpu.core_type = #tpu.core_type<tc>, window_params = [{transform_indices = @transform_0, window_bounds = array<i64: 2, 8, 8, 128>}, {pipeline_mode = #tpu.pipeline_mode<synchronous>, transform_indices = @transform_1, window_bounds = array<i64: 1, 1, 1, 128>}, {pipeline_mode = #tpu.pipeline_mode<synchronous>, transform_indices = @transform_2, window_bounds = array<i64: 1, 1, 1, 128>}, {transform_indices = @transform_3, window_bounds = array<i64: 2, 8, 8, 128>}]} {
    %c0 = arith.constant 0 : index
    %c0_0 = arith.constant 0 : index
    %c0_1 = arith.constant 0 : index
    %c0_2 = arith.constant 0 : index
    %0 = vector.load %arg1[%c0, %c0_0, %c0_1, %c0_2] : memref<2x8x8x128xbf16, #tpu.memory_space<vmem>>, vector<2x8x8x128xbf16>
    %1 = arith.extf %0 : vector<2x8x8x128xbf16> to vector<2x8x8x128xf32>
    %c0_3 = arith.constant 0 : index
    %c0_4 = arith.constant 0 : index
    %c0_5 = arith.constant 0 : index
    %c0_6 = arith.constant 0 : index
    %2 = vector.load %arg2[%c0_3, %c0_4, %c0_5, %c0_6] : memref<1x1x1x128xf32, #tpu.memory_space<vmem>>, vector<1x1x1x128xf32>
    %3 = vector.broadcast %2 : vector<1x1x1x128xf32> to vector<2x8x8x128xf32>
    %4 = arith.mulf %1, %3 : vector<2x8x8x128xf32>
    %c0_7 = arith.constant 0 : index
    %c0_8 = arith.constant 0 : index
    %c0_9 = arith.constant 0 : index
    %c0_10 = arith.constant 0 : index
    %5 = vector.load %arg3[%c0_7, %c0_8, %c0_9, %c0_10] : memref<1x1x1x128xf32, #tpu.memory_space<vmem>>, vector<1x1x1x128xf32>
    %6 = vector.broadcast %5 : vector<1x1x1x128xf32> to vector<2x8x8x128xf32>
    %7 = arith.addf %4, %6 : vector<2x8x8x128xf32>
    %cst = arith.constant 0.000000e+00 : f32
    %8 = vector.broadcast %cst : f32 to vector<2x8x8x128xf32>
    %9 = arith.maximumf %7, %8 : vector<2x8x8x128xf32>
    %10 = arith.truncf %9 : vector<2x8x8x128xf32> to vector<2x8x8x128xbf16>
    %c0_11 = arith.constant 0 : index
    %c0_12 = arith.constant 0 : index
    %c0_13 = arith.constant 0 : index
    %c0_14 = arith.constant 0 : index
    %11 = vector.load %arg4[%c0_11, %c0_12, %c0_13, %c0_14] : memref<2x8x8x128xbf16, #tpu.memory_space<vmem>>, vector<2x8x8x128xbf16>
    tpu.vector_store %arg4[%c0_11, %c0_12, %c0_13, %c0_14], %10 {strides = array<i32>} : memref<2x8x8x128xbf16, #tpu.memory_space<vmem>>, vector<2x8x8x128xbf16>,
    return
  }
  func.func @transform_0(%arg0: i32) -> (i32, i32, i32, i32) {
    %c0_i32 = arith.constant 0 : i32
    %c0_i32_0 = arith.constant 0 : i32
    %c0_i32_1 = arith.constant 0 : i32
    %c0_i32_2 = arith.constant 0 : i32
    return %arg0, %c0_i32, %c0_i32_0, %c0_i32_1 : i32, i32, i32, i32
  }
  func.func @transform_1(%arg0: i32) -> (i32, i32, i32, i32) {
    %c0_i32 = arith.constant 0 : i32
    %c0_i32_0 = arith.constant 0 : i32
    %c0_i32_1 = arith.constant 0 : i32
    %c0_i32_2 = arith.constant 0 : i32
    %c0_i32_3 = arith.constant 0 : i32
    return %c0_i32, %c0_i32_0, %c0_i32_1, %c0_i32_2 : i32, i32, i32, i32
  }
  func.func @transform_2(%arg0: i32) -> (i32, i32, i32, i32) {
    %c0_i32 = arith.constant 0 : i32
    %c0_i32_0 = arith.constant 0 : i32
    %c0_i32_1 = arith.constant 0 : i32
    %c0_i32_2 = arith.constant 0 : i32
    %c0_i32_3 = arith.constant 0 : i32
    return %c0_i32, %c0_i32_0, %c0_i32_1, %c0_i32_2 : i32, i32, i32, i32
  }
  func.func @transform_3(%arg0: i32) -> (i32, i32, i32, i32) {
    %c0_i32 = arith.constant 0 : i32
    %c0_i32_0 = arith.constant 0 : i32
    %c0_i32_1 = arith.constant 0 : i32
    %c0_i32_2 = arith.constant 0 : i32
    return %arg0, %c0_i32, %c0_i32_0, %c0_i32_1 : i32, i32, i32, i32
  }
}

module attributes {stable_mosaic.version = 11 : i64} {
  func.func @_conv_stats_kernel(%arg0: i32, %arg1: memref<2x10x10x128xbf16, #tpu.memory_space<vmem>>, %arg2: memref<9x128x128xbf16, #tpu.memory_space<vmem>>, %arg3: memref<2x8x8x128xbf16, #tpu.memory_space<vmem>>, %arg4: memref<1x2x128xf32, #tpu.memory_space<vmem>>) attributes {dimension_semantics = [#tpu.dimension_semantics<parallel>], iteration_bounds = array<i64: 1>, scalar_prefetch = 0 : i64, scratch_operands = 0 : i64, tpu.core_type = #tpu.core_type<tc>, window_params = [{transform_indices = @transform_0, window_bounds = array<i64: 2, 10, 10, 128>}, {pipeline_mode = #tpu.pipeline_mode<synchronous>, transform_indices = @transform_1, window_bounds = array<i64: 9, 128, 128>}, {transform_indices = @transform_2, window_bounds = array<i64: 2, 8, 8, 128>}, {transform_indices = @transform_3, window_bounds = array<i64: 1, 2, 128>}]} {
    %cst = arith.constant 0.000000e+00 : f32
    %0 = vector.broadcast %cst : f32 to vector<128x128xf32>
    %c0 = arith.constant 0 : index
    %c0_0 = arith.constant 0 : index
    %c0_1 = arith.constant 0 : index
    %c0_2 = arith.constant 0 : index
    %1 = vector.load %arg1[%c0, %c0_0, %c0_1, %c0_2] : memref<2x10x10x128xbf16, #tpu.memory_space<vmem>>, vector<2x8x8x128xbf16>
    %2 = vector.shape_cast %1 : vector<2x8x8x128xbf16> to vector<128x128xbf16>
    %c0_3 = arith.constant 0 : index
    %c0_4 = arith.constant 0 : index
    %c0_5 = arith.constant 0 : index
    %3 = vector.load %arg2[%c0_3, %c0_4, %c0_5] : memref<9x128x128xbf16, #tpu.memory_space<vmem>>, vector<1x128x128xbf16>
    %4 = vector.shape_cast %3 : vector<1x128x128xbf16> to vector<128x128xbf16>
    %cst_6 = arith.constant dense<0.000000e+00> : vector<128x128xf32>
    %5 = tpu.matmul %2, %4, %cst_6 {dimension_numbers = #tpu.dot_dimension_numbers<[1], [0], [0], [1], [0, 0, 1, 1], [], []>} : vector<128x128xbf16>, vector<128x128xbf16>, vector<128x128xf32> -> vector<128x128xf32>
    %6 = arith.addf %0, %5 : vector<128x128xf32>
    %c0_7 = arith.constant 0 : index
    %c0_8 = arith.constant 0 : index
    %c1 = arith.constant 1 : index
    %c0_9 = arith.constant 0 : index
    %7 = vector.load %arg1[%c0_7, %c0_8, %c1, %c0_9] : memref<2x10x10x128xbf16, #tpu.memory_space<vmem>>, vector<2x8x8x128xbf16>
    %8 = vector.shape_cast %7 : vector<2x8x8x128xbf16> to vector<128x128xbf16>
    %c1_10 = arith.constant 1 : index
    %c0_11 = arith.constant 0 : index
    %c0_12 = arith.constant 0 : index
    %9 = vector.load %arg2[%c1_10, %c0_11, %c0_12] : memref<9x128x128xbf16, #tpu.memory_space<vmem>>, vector<1x128x128xbf16>
    %10 = vector.shape_cast %9 : vector<1x128x128xbf16> to vector<128x128xbf16>
    %cst_13 = arith.constant dense<0.000000e+00> : vector<128x128xf32>
    %11 = tpu.matmul %8, %10, %cst_13 {dimension_numbers = #tpu.dot_dimension_numbers<[1], [0], [0], [1], [0, 0, 1, 1], [], []>} : vector<128x128xbf16>, vector<128x128xbf16>, vector<128x128xf32> -> vector<128x128xf32>
    %12 = arith.addf %6, %11 : vector<128x128xf32>
    %c0_14 = arith.constant 0 : index
    %c0_15 = arith.constant 0 : index
    %c2 = arith.constant 2 : index
    %c0_16 = arith.constant 0 : index
    %13 = vector.load %arg1[%c0_14, %c0_15, %c2, %c0_16] : memref<2x10x10x128xbf16, #tpu.memory_space<vmem>>, vector<2x8x8x128xbf16>
    %14 = vector.shape_cast %13 : vector<2x8x8x128xbf16> to vector<128x128xbf16>
    %c2_17 = arith.constant 2 : index
    %c0_18 = arith.constant 0 : index
    %c0_19 = arith.constant 0 : index
    %15 = vector.load %arg2[%c2_17, %c0_18, %c0_19] : memref<9x128x128xbf16, #tpu.memory_space<vmem>>, vector<1x128x128xbf16>
    %16 = vector.shape_cast %15 : vector<1x128x128xbf16> to vector<128x128xbf16>
    %cst_20 = arith.constant dense<0.000000e+00> : vector<128x128xf32>
    %17 = tpu.matmul %14, %16, %cst_20 {dimension_numbers = #tpu.dot_dimension_numbers<[1], [0], [0], [1], [0, 0, 1, 1], [], []>} : vector<128x128xbf16>, vector<128x128xbf16>, vector<128x128xf32> -> vector<128x128xf32>
    %18 = arith.addf %12, %17 : vector<128x128xf32>
    %c0_21 = arith.constant 0 : index
    %c1_22 = arith.constant 1 : index
    %c0_23 = arith.constant 0 : index
    %c0_24 = arith.constant 0 : index
    %19 = vector.load %arg1[%c0_21, %c1_22, %c0_23, %c0_24] : memref<2x10x10x128xbf16, #tpu.memory_space<vmem>>, vector<2x8x8x128xbf16>
    %20 = vector.shape_cast %19 : vector<2x8x8x128xbf16> to vector<128x128xbf16>
    %c3 = arith.constant 3 : index
    %c0_25 = arith.constant 0 : index
    %c0_26 = arith.constant 0 : index
    %21 = vector.load %arg2[%c3, %c0_25, %c0_26] : memref<9x128x128xbf16, #tpu.memory_space<vmem>>, vector<1x128x128xbf16>
    %22 = vector.shape_cast %21 : vector<1x128x128xbf16> to vector<128x128xbf16>
    %cst_27 = arith.constant dense<0.000000e+00> : vector<128x128xf32>
    %23 = tpu.matmul %20, %22, %cst_27 {dimension_numbers = #tpu.dot_dimension_numbers<[1], [0], [0], [1], [0, 0, 1, 1], [], []>} : vector<128x128xbf16>, vector<128x128xbf16>, vector<128x128xf32> -> vector<128x128xf32>
    %24 = arith.addf %18, %23 : vector<128x128xf32>
    %c0_28 = arith.constant 0 : index
    %c1_29 = arith.constant 1 : index
    %c1_30 = arith.constant 1 : index
    %c0_31 = arith.constant 0 : index
    %25 = vector.load %arg1[%c0_28, %c1_29, %c1_30, %c0_31] : memref<2x10x10x128xbf16, #tpu.memory_space<vmem>>, vector<2x8x8x128xbf16>
    %26 = vector.shape_cast %25 : vector<2x8x8x128xbf16> to vector<128x128xbf16>
    %c4 = arith.constant 4 : index
    %c0_32 = arith.constant 0 : index
    %c0_33 = arith.constant 0 : index
    %27 = vector.load %arg2[%c4, %c0_32, %c0_33] : memref<9x128x128xbf16, #tpu.memory_space<vmem>>, vector<1x128x128xbf16>
    %28 = vector.shape_cast %27 : vector<1x128x128xbf16> to vector<128x128xbf16>
    %cst_34 = arith.constant dense<0.000000e+00> : vector<128x128xf32>
    %29 = tpu.matmul %26, %28, %cst_34 {dimension_numbers = #tpu.dot_dimension_numbers<[1], [0], [0], [1], [0, 0, 1, 1], [], []>} : vector<128x128xbf16>, vector<128x128xbf16>, vector<128x128xf32> -> vector<128x128xf32>
    %30 = arith.addf %24, %29 : vector<128x128xf32>
    %c0_35 = arith.constant 0 : index
    %c1_36 = arith.constant 1 : index
    %c2_37 = arith.constant 2 : index
    %c0_38 = arith.constant 0 : index
    %31 = vector.load %arg1[%c0_35, %c1_36, %c2_37, %c0_38] : memref<2x10x10x128xbf16, #tpu.memory_space<vmem>>, vector<2x8x8x128xbf16>
    %32 = vector.shape_cast %31 : vector<2x8x8x128xbf16> to vector<128x128xbf16>
    %c5 = arith.constant 5 : index
    %c0_39 = arith.constant 0 : index
    %c0_40 = arith.constant 0 : index
    %33 = vector.load %arg2[%c5, %c0_39, %c0_40] : memref<9x128x128xbf16, #tpu.memory_space<vmem>>, vector<1x128x128xbf16>
    %34 = vector.shape_cast %33 : vector<1x128x128xbf16> to vector<128x128xbf16>
    %cst_41 = arith.constant dense<0.000000e+00> : vector<128x128xf32>
    %35 = tpu.matmul %32, %34, %cst_41 {dimension_numbers = #tpu.dot_dimension_numbers<[1], [0], [0], [1], [0, 0, 1, 1], [], []>} : vector<128x128xbf16>, vector<128x128xbf16>, vector<128x128xf32> -> vector<128x128xf32>
    %36 = arith.addf %30, %35 : vector<128x128xf32>
    %c0_42 = arith.constant 0 : index
    %c2_43 = arith.constant 2 : index
    %c0_44 = arith.constant 0 : index
    %c0_45 = arith.constant 0 : index
    %37 = vector.load %arg1[%c0_42, %c2_43, %c0_44, %c0_45] : memref<2x10x10x128xbf16, #tpu.memory_space<vmem>>, vector<2x8x8x128xbf16>
    %38 = vector.shape_cast %37 : vector<2x8x8x128xbf16> to vector<128x128xbf16>
    %c6 = arith.constant 6 : index
    %c0_46 = arith.constant 0 : index
    %c0_47 = arith.constant 0 : index
    %39 = vector.load %arg2[%c6, %c0_46, %c0_47] : memref<9x128x128xbf16, #tpu.memory_space<vmem>>, vector<1x128x128xbf16>
    %40 = vector.shape_cast %39 : vector<1x128x128xbf16> to vector<128x128xbf16>
    %cst_48 = arith.constant dense<0.000000e+00> : vector<128x128xf32>
    %41 = tpu.matmul %38, %40, %cst_48 {dimension_numbers = #tpu.dot_dimension_numbers<[1], [0], [0], [1], [0, 0, 1, 1], [], []>} : vector<128x128xbf16>, vector<128x128xbf16>, vector<128x128xf32> -> vector<128x128xf32>
    %42 = arith.addf %36, %41 : vector<128x128xf32>
    %c0_49 = arith.constant 0 : index
    %c2_50 = arith.constant 2 : index
    %c1_51 = arith.constant 1 : index
    %c0_52 = arith.constant 0 : index
    %43 = vector.load %arg1[%c0_49, %c2_50, %c1_51, %c0_52] : memref<2x10x10x128xbf16, #tpu.memory_space<vmem>>, vector<2x8x8x128xbf16>
    %44 = vector.shape_cast %43 : vector<2x8x8x128xbf16> to vector<128x128xbf16>
    %c7 = arith.constant 7 : index
    %c0_53 = arith.constant 0 : index
    %c0_54 = arith.constant 0 : index
    %45 = vector.load %arg2[%c7, %c0_53, %c0_54] : memref<9x128x128xbf16, #tpu.memory_space<vmem>>, vector<1x128x128xbf16>
    %46 = vector.shape_cast %45 : vector<1x128x128xbf16> to vector<128x128xbf16>
    %cst_55 = arith.constant dense<0.000000e+00> : vector<128x128xf32>
    %47 = tpu.matmul %44, %46, %cst_55 {dimension_numbers = #tpu.dot_dimension_numbers<[1], [0], [0], [1], [0, 0, 1, 1], [], []>} : vector<128x128xbf16>, vector<128x128xbf16>, vector<128x128xf32> -> vector<128x128xf32>
    %48 = arith.addf %42, %47 : vector<128x128xf32>
    %c0_56 = arith.constant 0 : index
    %c2_57 = arith.constant 2 : index
    %c2_58 = arith.constant 2 : index
    %c0_59 = arith.constant 0 : index
    %49 = vector.load %arg1[%c0_56, %c2_57, %c2_58, %c0_59] : memref<2x10x10x128xbf16, #tpu.memory_space<vmem>>, vector<2x8x8x128xbf16>
    %50 = vector.shape_cast %49 : vector<2x8x8x128xbf16> to vector<128x128xbf16>
    %c8 = arith.constant 8 : index
    %c0_60 = arith.constant 0 : index
    %c0_61 = arith.constant 0 : index
    %51 = vector.load %arg2[%c8, %c0_60, %c0_61] : memref<9x128x128xbf16, #tpu.memory_space<vmem>>, vector<1x128x128xbf16>
    %52 = vector.shape_cast %51 : vector<1x128x128xbf16> to vector<128x128xbf16>
    %cst_62 = arith.constant dense<0.000000e+00> : vector<128x128xf32>
    %53 = tpu.matmul %50, %52, %cst_62 {dimension_numbers = #tpu.dot_dimension_numbers<[1], [0], [0], [1], [0, 0, 1, 1], [], []>} : vector<128x128xbf16>, vector<128x128xbf16>, vector<128x128xf32> -> vector<128x128xf32>
    %54 = arith.addf %48, %53 : vector<128x128xf32>
    %55 = vector.shape_cast %54 : vector<128x128xf32> to vector<2x8x8x128xf32>
    %56 = arith.truncf %55 : vector<2x8x8x128xf32> to vector<2x8x8x128xbf16>
    %c0_63 = arith.constant 0 : index
    %c0_64 = arith.constant 0 : index
    %c0_65 = arith.constant 0 : index
    %c0_66 = arith.constant 0 : index
    %57 = vector.load %arg3[%c0_63, %c0_64, %c0_65, %c0_66] : memref<2x8x8x128xbf16, #tpu.memory_space<vmem>>, vector<2x8x8x128xbf16>
    tpu.vector_store %arg3[%c0_63, %c0_64, %c0_65, %c0_66], %56 {strides = array<i32>} : memref<2x8x8x128xbf16, #tpu.memory_space<vmem>>, vector<2x8x8x128xbf16>,
    %cst_67 = arith.constant dense<0.000000e+00> : vector<128xf32>
    %58 = vector.multi_reduction <add>, %54, %cst_67 [0] : vector<128x128xf32> to vector<128xf32>
    %59 = vector.shape_cast %58 : vector<128xf32> to vector<1x128xf32>
    %c0_68 = arith.constant 0 : index
    %c0_69 = arith.constant 0 : index
    %c0_70 = arith.constant 0 : index
    %60 = vector.load %arg4[%c0_68, %c0_69, %c0_70] : memref<1x2x128xf32, #tpu.memory_space<vmem>>, vector<1x1x128xf32>
    %61 = vector.shape_cast %60 : vector<1x1x128xf32> to vector<1x128xf32>
    %62 = vector.shape_cast %59 : vector<1x128xf32> to vector<1x1x128xf32>
    tpu.vector_store %arg4[%c0_68, %c0_69, %c0_70], %62 {strides = array<i32>} : memref<1x2x128xf32, #tpu.memory_space<vmem>>, vector<1x1x128xf32>,
    %63 = arith.mulf %54, %54 : vector<128x128xf32>
    %cst_71 = arith.constant dense<0.000000e+00> : vector<128xf32>
    %64 = vector.multi_reduction <add>, %63, %cst_71 [0] : vector<128x128xf32> to vector<128xf32>
    %65 = vector.shape_cast %64 : vector<128xf32> to vector<1x128xf32>
    %c0_72 = arith.constant 0 : index
    %c1_73 = arith.constant 1 : index
    %c0_74 = arith.constant 0 : index
    %66 = vector.load %arg4[%c0_72, %c1_73, %c0_74] : memref<1x2x128xf32, #tpu.memory_space<vmem>>, vector<1x1x128xf32>
    %67 = vector.shape_cast %66 : vector<1x1x128xf32> to vector<1x128xf32>
    %68 = vector.shape_cast %65 : vector<1x128xf32> to vector<1x1x128xf32>
    tpu.vector_store %arg4[%c0_72, %c1_73, %c0_74], %68 {strides = array<i32>} : memref<1x2x128xf32, #tpu.memory_space<vmem>>, vector<1x1x128xf32>,
    return
  }
  func.func @transform_0(%arg0: i32) -> (i32, i32, i32, i32) {
    %c0_i32 = arith.constant 0 : i32
    %c0_i32_0 = arith.constant 0 : i32
    %c0_i32_1 = arith.constant 0 : i32
    %c0_i32_2 = arith.constant 0 : i32
    return %arg0, %c0_i32, %c0_i32_0, %c0_i32_1 : i32, i32, i32, i32
  }
  func.func @transform_1(%arg0: i32) -> (i32, i32, i32) {
    %c0_i32 = arith.constant 0 : i32
    %c0_i32_0 = arith.constant 0 : i32
    %c0_i32_1 = arith.constant 0 : i32
    %c0_i32_2 = arith.constant 0 : i32
    return %c0_i32, %c0_i32_0, %c0_i32_1 : i32, i32, i32
  }
  func.func @transform_2(%arg0: i32) -> (i32, i32, i32, i32) {
    %c0_i32 = arith.constant 0 : i32
    %c0_i32_0 = arith.constant 0 : i32
    %c0_i32_1 = arith.constant 0 : i32
    %c0_i32_2 = arith.constant 0 : i32
    return %arg0, %c0_i32, %c0_i32_0, %c0_i32_1 : i32, i32, i32, i32
  }
  func.func @transform_3(%arg0: i32) -> (i32, i32, i32) {
    %c0_i32 = arith.constant 0 : i32
    %c0_i32_0 = arith.constant 0 : i32
    %c0_i32_1 = arith.constant 0 : i32
    return %arg0, %c0_i32, %c0_i32_0 : i32, i32, i32
  }
}

module attributes {stable_mosaic.version = 11 : i64} {
  func.func @_bn_act_kernel(%arg0: i32, %arg1: memref<2x8x8x128xbf16, #tpu.memory_space<vmem>>, %arg2: memref<1x1x1x128xf32, #tpu.memory_space<vmem>>, %arg3: memref<1x1x1x128xf32, #tpu.memory_space<vmem>>, %arg4: memref<2x8x8x128xbf16, #tpu.memory_space<vmem>>) attributes {dimension_semantics = [#tpu.dimension_semantics<parallel>], iteration_bounds = array<i64: 1>, scalar_prefetch = 0 : i64, scratch_operands = 0 : i64, tpu.core_type = #tpu.core_type<tc>, window_params = [{transform_indices = @transform_0, window_bounds = array<i64: 2, 8, 8, 128>}, {pipeline_mode = #tpu.pipeline_mode<synchronous>, transform_indices = @transform_1, window_bounds = array<i64: 1, 1, 1, 128>}, {pipeline_mode = #tpu.pipeline_mode<synchronous>, transform_indices = @transform_2, window_bounds = array<i64: 1, 1, 1, 128>}, {transform_indices = @transform_3, window_bounds = array<i64: 2, 8, 8, 128>}]} {
    %c0 = arith.constant 0 : index
    %c0_0 = arith.constant 0 : index
    %c0_1 = arith.constant 0 : index
    %c0_2 = arith.constant 0 : index
    %0 = vector.load %arg1[%c0, %c0_0, %c0_1, %c0_2] : memref<2x8x8x128xbf16, #tpu.memory_space<vmem>>, vector<2x8x8x128xbf16>
    %1 = arith.extf %0 : vector<2x8x8x128xbf16> to vector<2x8x8x128xf32>
    %c0_3 = arith.constant 0 : index
    %c0_4 = arith.constant 0 : index
    %c0_5 = arith.constant 0 : index
    %c0_6 = arith.constant 0 : index
    %2 = vector.load %arg2[%c0_3, %c0_4, %c0_5, %c0_6] : memref<1x1x1x128xf32, #tpu.memory_space<vmem>>, vector<1x1x1x128xf32>
    %3 = vector.broadcast %2 : vector<1x1x1x128xf32> to vector<2x8x8x128xf32>
    %4 = arith.mulf %1, %3 : vector<2x8x8x128xf32>
    %c0_7 = arith.constant 0 : index
    %c0_8 = arith.constant 0 : index
    %c0_9 = arith.constant 0 : index
    %c0_10 = arith.constant 0 : index
    %5 = vector.load %arg3[%c0_7, %c0_8, %c0_9, %c0_10] : memref<1x1x1x128xf32, #tpu.memory_space<vmem>>, vector<1x1x1x128xf32>
    %6 = vector.broadcast %5 : vector<1x1x1x128xf32> to vector<2x8x8x128xf32>
    %7 = arith.addf %4, %6 : vector<2x8x8x128xf32>
    %8 = arith.truncf %7 : vector<2x8x8x128xf32> to vector<2x8x8x128xbf16>
    %c0_11 = arith.constant 0 : index
    %c0_12 = arith.constant 0 : index
    %c0_13 = arith.constant 0 : index
    %c0_14 = arith.constant 0 : index
    %9 = vector.load %arg4[%c0_11, %c0_12, %c0_13, %c0_14] : memref<2x8x8x128xbf16, #tpu.memory_space<vmem>>, vector<2x8x8x128xbf16>
    tpu.vector_store %arg4[%c0_11, %c0_12, %c0_13, %c0_14], %8 {strides = array<i32>} : memref<2x8x8x128xbf16, #tpu.memory_space<vmem>>, vector<2x8x8x128xbf16>,
    return
  }
  func.func @transform_0(%arg0: i32) -> (i32, i32, i32, i32) {
    %c0_i32 = arith.constant 0 : i32
    %c0_i32_0 = arith.constant 0 : i32
    %c0_i32_1 = arith.constant 0 : i32
    %c0_i32_2 = arith.constant 0 : i32
    return %arg0, %c0_i32, %c0_i32_0, %c0_i32_1 : i32, i32, i32, i32
  }
  func.func @transform_1(%arg0: i32) -> (i32, i32, i32, i32) {
    %c0_i32 = arith.constant 0 : i32
    %c0_i32_0 = arith.constant 0 : i32
    %c0_i32_1 = arith.constant 0 : i32
    %c0_i32_2 = arith.constant 0 : i32
    %c0_i32_3 = arith.constant 0 : i32
    return %c0_i32, %c0_i32_0, %c0_i32_1, %c0_i32_2 : i32, i32, i32, i32
  }
  func.func @transform_2(%arg0: i32) -> (i32, i32, i32, i32) {
    %c0_i32 = arith.constant 0 : i32
    %c0_i32_0 = arith.constant 0 : i32
    %c0_i32_1 = arith.constant 0 : i32
    %c0_i32_2 = arith.constant 0 : i32
    %c0_i32_3 = arith.constant 0 : i32
    return %c0_i32, %c0_i32_0, %c0_i32_1, %c0_i32_2 : i32, i32, i32, i32
  }
  func.func @transform_3(%arg0: i32) -> (i32, i32, i32, i32) {
    %c0_i32 = arith.constant 0 : i32
    %c0_i32_0 = arith.constant 0 : i32
    %c0_i32_1 = arith.constant 0 : i32
    %c0_i32_2 = arith.constant 0 : i32
    return %arg0, %c0_i32, %c0_i32_0, %c0_i32_1 : i32, i32, i32, i32
  }
}

module attributes {stable_mosaic.version = 11 : i64} {
  func.func @_conv_stats_kernel(%arg0: i32, %arg1: memref<2x8x8x4xbf16, #tpu.memory_space<vmem>>, %arg2: memref<1x4x128xbf16, #tpu.memory_space<vmem>>, %arg3: memref<2x8x8x128xbf16, #tpu.memory_space<vmem>>, %arg4: memref<1x2x128xf32, #tpu.memory_space<vmem>>) attributes {dimension_semantics = [#tpu.dimension_semantics<parallel>], iteration_bounds = array<i64: 1>, scalar_prefetch = 0 : i64, scratch_operands = 0 : i64, tpu.core_type = #tpu.core_type<tc>, window_params = [{transform_indices = @transform_0, window_bounds = array<i64: 2, 8, 8, 4>}, {pipeline_mode = #tpu.pipeline_mode<synchronous>, transform_indices = @transform_1, window_bounds = array<i64: 1, 4, 128>}, {transform_indices = @transform_2, window_bounds = array<i64: 2, 8, 8, 128>}, {transform_indices = @transform_3, window_bounds = array<i64: 1, 2, 128>}]} {
    %cst = arith.constant 0.000000e+00 : f32
    %0 = vector.broadcast %cst : f32 to vector<128x128xf32>
    %c0 = arith.constant 0 : index
    %c0_0 = arith.constant 0 : index
    %c0_1 = arith.constant 0 : index
    %c0_2 = arith.constant 0 : index
    %1 = vector.load %arg1[%c0, %c0_0, %c0_1, %c0_2] : memref<2x8x8x4xbf16, #tpu.memory_space<vmem>>, vector<2x8x8x4xbf16>
    %2 = vector.shape_cast %1 : vector<2x8x8x4xbf16> to vector<128x4xbf16>
    %c0_3 = arith.constant 0 : index
    %c0_4 = arith.constant 0 : index
    %c0_5 = arith.constant 0 : index
    %3 = vector.load %arg2[%c0_3, %c0_4, %c0_5] : memref<1x4x128xbf16, #tpu.memory_space<vmem>>, vector<1x4x128xbf16>
    %4 = vector.shape_cast %3 : vector<1x4x128xbf16> to vector<4x128xbf16>
    %cst_6 = arith.constant dense<0.000000e+00> : vector<128x128xf32>
    %5 = tpu.matmul %2, %4, %cst_6 {dimension_numbers = #tpu.dot_dimension_numbers<[1], [0], [0], [1], [0, 0, 1, 1], [], []>} : vector<128x4xbf16>, vector<4x128xbf16>, vector<128x128xf32> -> vector<128x128xf32>
    %6 = arith.addf %0, %5 : vector<128x128xf32>
    %7 = vector.shape_cast %6 : vector<128x128xf32> to vector<2x8x8x128xf32>
    %8 = arith.truncf %7 : vector<2x8x8x128xf32> to vector<2x8x8x128xbf16>
    %c0_7 = arith.constant 0 : index
    %c0_8 = arith.constant 0 : index
    %c0_9 = arith.constant 0 : index
    %c0_10 = arith.constant 0 : index
    %9 = vector.load %arg3[%c0_7, %c0_8, %c0_9, %c0_10] : memref<2x8x8x128xbf16, #tpu.memory_space<vmem>>, vector<2x8x8x128xbf16>
    tpu.vector_store %arg3[%c0_7, %c0_8, %c0_9, %c0_10], %8 {strides = array<i32>} : memref<2x8x8x128xbf16, #tpu.memory_space<vmem>>, vector<2x8x8x128xbf16>,
    %cst_11 = arith.constant dense<0.000000e+00> : vector<128xf32>
    %10 = vector.multi_reduction <add>, %6, %cst_11 [0] : vector<128x128xf32> to vector<128xf32>
    %11 = vector.shape_cast %10 : vector<128xf32> to vector<1x128xf32>
    %c0_12 = arith.constant 0 : index
    %c0_13 = arith.constant 0 : index
    %c0_14 = arith.constant 0 : index
    %12 = vector.load %arg4[%c0_12, %c0_13, %c0_14] : memref<1x2x128xf32, #tpu.memory_space<vmem>>, vector<1x1x128xf32>
    %13 = vector.shape_cast %12 : vector<1x1x128xf32> to vector<1x128xf32>
    %14 = vector.shape_cast %11 : vector<1x128xf32> to vector<1x1x128xf32>
    tpu.vector_store %arg4[%c0_12, %c0_13, %c0_14], %14 {strides = array<i32>} : memref<1x2x128xf32, #tpu.memory_space<vmem>>, vector<1x1x128xf32>,
    %15 = arith.mulf %6, %6 : vector<128x128xf32>
    %cst_15 = arith.constant dense<0.000000e+00> : vector<128xf32>
    %16 = vector.multi_reduction <add>, %15, %cst_15 [0] : vector<128x128xf32> to vector<128xf32>
    %17 = vector.shape_cast %16 : vector<128xf32> to vector<1x128xf32>
    %c0_16 = arith.constant 0 : index
    %c1 = arith.constant 1 : index
    %c0_17 = arith.constant 0 : index
    %18 = vector.load %arg4[%c0_16, %c1, %c0_17] : memref<1x2x128xf32, #tpu.memory_space<vmem>>, vector<1x1x128xf32>
    %19 = vector.shape_cast %18 : vector<1x1x128xf32> to vector<1x128xf32>
    %20 = vector.shape_cast %17 : vector<1x128xf32> to vector<1x1x128xf32>
    tpu.vector_store %arg4[%c0_16, %c1, %c0_17], %20 {strides = array<i32>} : memref<1x2x128xf32, #tpu.memory_space<vmem>>, vector<1x1x128xf32>,
    return
  }
  func.func @transform_0(%arg0: i32) -> (i32, i32, i32, i32) {
    %c0_i32 = arith.constant 0 : i32
    %c0_i32_0 = arith.constant 0 : i32
    %c0_i32_1 = arith.constant 0 : i32
    %c0_i32_2 = arith.constant 0 : i32
    return %arg0, %c0_i32, %c0_i32_0, %c0_i32_1 : i32, i32, i32, i32
  }
  func.func @transform_1(%arg0: i32) -> (i32, i32, i32) {
    %c0_i32 = arith.constant 0 : i32
    %c0_i32_0 = arith.constant 0 : i32
    %c0_i32_1 = arith.constant 0 : i32
    %c0_i32_2 = arith.constant 0 : i32
    return %c0_i32, %c0_i32_0, %c0_i32_1 : i32, i32, i32
  }
  func.func @transform_2(%arg0: i32) -> (i32, i32, i32, i32) {
    %c0_i32 = arith.constant 0 : i32
    %c0_i32_0 = arith.constant 0 : i32
    %c0_i32_1 = arith.constant 0 : i32
    %c0_i32_2 = arith.constant 0 : i32
    return %arg0, %c0_i32, %c0_i32_0, %c0_i32_1 : i32, i32, i32, i32
  }
  func.func @transform_3(%arg0: i32) -> (i32, i32, i32) {
    %c0_i32 = arith.constant 0 : i32
    %c0_i32_0 = arith.constant 0 : i32
    %c0_i32_1 = arith.constant 0 : i32
    return %arg0, %c0_i32, %c0_i32_0 : i32, i32, i32
  }
}

module attributes {stable_mosaic.version = 11 : i64} {
  func.func @_bn_act_kernel(%arg0: i32, %arg1: memref<2x8x8x128xbf16, #tpu.memory_space<vmem>>, %arg2: memref<1x1x1x128xf32, #tpu.memory_space<vmem>>, %arg3: memref<1x1x1x128xf32, #tpu.memory_space<vmem>>, %arg4: memref<2x8x8x128xbf16, #tpu.memory_space<vmem>>, %arg5: memref<2x8x8x128xf32, #tpu.memory_space<vmem>>) attributes {dimension_semantics = [#tpu.dimension_semantics<parallel>], iteration_bounds = array<i64: 1>, scalar_prefetch = 0 : i64, scratch_operands = 0 : i64, tpu.core_type = #tpu.core_type<tc>, window_params = [{transform_indices = @transform_0, window_bounds = array<i64: 2, 8, 8, 128>}, {pipeline_mode = #tpu.pipeline_mode<synchronous>, transform_indices = @transform_1, window_bounds = array<i64: 1, 1, 1, 128>}, {pipeline_mode = #tpu.pipeline_mode<synchronous>, transform_indices = @transform_2, window_bounds = array<i64: 1, 1, 1, 128>}, {transform_indices = @transform_3, window_bounds = array<i64: 2, 8, 8, 128>}, {transform_indices = @transform_4, window_bounds = array<i64: 2, 8, 8, 128>}]} {
    %c0 = arith.constant 0 : index
    %c0_0 = arith.constant 0 : index
    %c0_1 = arith.constant 0 : index
    %c0_2 = arith.constant 0 : index
    %0 = vector.load %arg1[%c0, %c0_0, %c0_1, %c0_2] : memref<2x8x8x128xbf16, #tpu.memory_space<vmem>>, vector<2x8x8x128xbf16>
    %1 = arith.extf %0 : vector<2x8x8x128xbf16> to vector<2x8x8x128xf32>
    %c0_3 = arith.constant 0 : index
    %c0_4 = arith.constant 0 : index
    %c0_5 = arith.constant 0 : index
    %c0_6 = arith.constant 0 : index
    %2 = vector.load %arg2[%c0_3, %c0_4, %c0_5, %c0_6] : memref<1x1x1x128xf32, #tpu.memory_space<vmem>>, vector<1x1x1x128xf32>
    %3 = vector.broadcast %2 : vector<1x1x1x128xf32> to vector<2x8x8x128xf32>
    %4 = arith.mulf %1, %3 : vector<2x8x8x128xf32>
    %c0_7 = arith.constant 0 : index
    %c0_8 = arith.constant 0 : index
    %c0_9 = arith.constant 0 : index
    %c0_10 = arith.constant 0 : index
    %5 = vector.load %arg3[%c0_7, %c0_8, %c0_9, %c0_10] : memref<1x1x1x128xf32, #tpu.memory_space<vmem>>, vector<1x1x1x128xf32>
    %6 = vector.broadcast %5 : vector<1x1x1x128xf32> to vector<2x8x8x128xf32>
    %7 = arith.addf %4, %6 : vector<2x8x8x128xf32>
    %c0_11 = arith.constant 0 : index
    %c0_12 = arith.constant 0 : index
    %c0_13 = arith.constant 0 : index
    %c0_14 = arith.constant 0 : index
    %8 = vector.load %arg4[%c0_11, %c0_12, %c0_13, %c0_14] : memref<2x8x8x128xbf16, #tpu.memory_space<vmem>>, vector<2x8x8x128xbf16>
    %9 = arith.extf %8 : vector<2x8x8x128xbf16> to vector<2x8x8x128xf32>
    %10 = arith.addf %7, %9 : vector<2x8x8x128xf32>
    %cst = arith.constant 0.000000e+00 : f32
    %11 = vector.broadcast %cst : f32 to vector<2x8x8x128xf32>
    %12 = arith.maximumf %10, %11 : vector<2x8x8x128xf32>
    %c0_15 = arith.constant 0 : index
    %c0_16 = arith.constant 0 : index
    %c0_17 = arith.constant 0 : index
    %c0_18 = arith.constant 0 : index
    %13 = vector.load %arg5[%c0_15, %c0_16, %c0_17, %c0_18] : memref<2x8x8x128xf32, #tpu.memory_space<vmem>>, vector<2x8x8x128xf32>
    tpu.vector_store %arg5[%c0_15, %c0_16, %c0_17, %c0_18], %12 {strides = array<i32>} : memref<2x8x8x128xf32, #tpu.memory_space<vmem>>, vector<2x8x8x128xf32>,
    return
  }
  func.func @transform_0(%arg0: i32) -> (i32, i32, i32, i32) {
    %c0_i32 = arith.constant 0 : i32
    %c0_i32_0 = arith.constant 0 : i32
    %c0_i32_1 = arith.constant 0 : i32
    %c0_i32_2 = arith.constant 0 : i32
    return %arg0, %c0_i32, %c0_i32_0, %c0_i32_1 : i32, i32, i32, i32
  }
  func.func @transform_1(%arg0: i32) -> (i32, i32, i32, i32) {
    %c0_i32 = arith.constant 0 : i32
    %c0_i32_0 = arith.constant 0 : i32
    %c0_i32_1 = arith.constant 0 : i32
    %c0_i32_2 = arith.constant 0 : i32
    %c0_i32_3 = arith.constant 0 : i32
    return %c0_i32, %c0_i32_0, %c0_i32_1, %c0_i32_2 : i32, i32, i32, i32
  }
  func.func @transform_2(%arg0: i32) -> (i32, i32, i32, i32) {
    %c0_i32 = arith.constant 0 : i32
    %c0_i32_0 = arith.constant 0 : i32
    %c0_i32_1 = arith.constant 0 : i32
    %c0_i32_2 = arith.constant 0 : i32
    %c0_i32_3 = arith.constant 0 : i32
    return %c0_i32, %c0_i32_0, %c0_i32_1, %c0_i32_2 : i32, i32, i32, i32
  }
  func.func @transform_3(%arg0: i32) -> (i32, i32, i32, i32) {
    %c0_i32 = arith.constant 0 : i32
    %c0_i32_0 = arith.constant 0 : i32
    %c0_i32_1 = arith.constant 0 : i32
    %c0_i32_2 = arith.constant 0 : i32
    return %arg0, %c0_i32, %c0_i32_0, %c0_i32_1 : i32, i32, i32, i32
  }
  func.func @transform_4(%arg0: i32) -> (i32, i32, i32, i32) {
    %c0_i32 = arith.constant 0 : i32
    %c0_i32_0 = arith.constant 0 : i32
    %c0_i32_1 = arith.constant 0 : i32
    %c0_i32_2 = arith.constant 0 : i32
    return %arg0, %c0_i32, %c0_i32_0, %c0_i32_1 : i32, i32, i32, i32
  }
}

</mosaic_0001>

<bundles_post_ra>
// kernel: basic_block_forward.9
= control target key start
LH: loop header
LB: loop body
LE: loop exit
PB: predicated region body
PF: predicated region fallthrough
CT: control target
= control target key end

     0   :  { %s336_s0 = inlined_call_operand.vmem [shape: bf16[2,8,8,128], index: 0, kind: input, shape index: {}, may-alias: {0,3}]   ;;  %s337_s1 = inlined_call_operand.vmem [shape: f32[1,1,1,128], index: 1, kind: input, shape index: {}]   ;;  %s338_s2 = inlined_call_operand.vmem [shape: f32[1,1,1,128], index: 2, kind: input, shape index: {}]   ;;  %s339_s3 = inlined_call_operand.vmem [shape: bf16[2,8,8,128], index: 3, kind: output, shape index: {}, may-alias: {0,3}]  }
   0x1   :  { %v139_v0 = vld [vmem:[%s336_s0] sm:$0xff]   ;;  %v210_v5 = vld [vmem:[%s336_s0 + $0x8] sm:$0xff]   ;;  %v211_v8 = vld [vmem:[%s336_s0 + $0x10] sm:$0xff]  }
   0x2   :  { %v252_v1 = vld [vmem:[%s337_s1] ss:$0 sm:$0xff]  ;;  %v140_v2 = vunpack.c.l.bf16 %v139_v0  ;;  %v141_v3 = vunpack.c.h.bf16 %v139_v0  ;;  %v144_v6 = vunpack.c.l.bf16 %v210_v5  ;;  %v145_v7 = vunpack.c.h.bf16 %v210_v5  ;;  %v212_v9 = vld [vmem:[%s336_s0 + $0x18] sm:$0xff]   ;;  %v214_v35 = vld [vmem:[%s336_s0 + $0x28] sm:$0xff]  }
   0x3   :  { %v257_v4 = vld [vmem:[%s338_s2] ss:$0 sm:$0xff]  ;;  %v148_v12 = vunpack.c.l.bf16 %v211_v8  ;;  %v149_v13 = vunpack.c.h.bf16 %v211_v8  ;;  %v152_v16 = vunpack.c.l.bf16 %v212_v9  ;;  %v153_v17 = vunpack.c.h.bf16 %v212_v9  ;;  %v215_v40 = vld [vmem:[%s336_s0 + $0x30] sm:$0xff]   ;;  %v216_v45 = vld [vmem:[%s336_s0 + $0x38] sm:$0xff]  }
   0x4   :  { %v50_v10 = vmul.f32 %v252_v1, %v140_v2  ;;  %v51_v11 = vmul.f32 %v252_v1, %v141_v3  ;;  %v52_v14 = vmul.f32 %v252_v1, %v144_v6  ;;  %v53_v15 = vmul.f32 %v252_v1, %v145_v7  ;;  %v213_v26 = vld [vmem:[%s336_s0 + $0x20] sm:$0xff]  }
   0x5   :  { %v54_v20 = vmul.f32 %v252_v1, %v148_v12  ;;  %v55_v21 = vmul.f32 %v252_v1, %v149_v13  ;;  %v56_v24 = vmul.f32 %v252_v1, %v152_v16  ;;  %v57_v25 = vmul.f32 %v252_v1, %v153_v17 }
   0x6   :  { %v70_v18 = vadd.f32 %v257_v4, %v50_v10  ;;  %v71_v19 = vadd.f32 %v257_v4, %v51_v11  ;;  %v72_v22 = vadd.f32 %v257_v4, %v52_v14  ;;  %v73_v23 = vadd.f32 %v257_v4, %v53_v15 }
   0x7   :  { %v74_v29 = vadd.f32 %v257_v4, %v54_v20  ;;  %v75_v30 = vadd.f32 %v257_v4, %v55_v21  ;;  %v76_v33 = vadd.f32 %v257_v4, %v56_v24  ;;  %v77_v34 = vadd.f32 %v257_v4, %v57_v25 }
   0x8   :  { %v86_v27 = vmax.f32 %v70_v18, 0.0  ;;  %v87_v28 = vmax.f32 %v71_v19, 0.0  ;;  %v88_v31 = vmax.f32 %v72_v22, 0.0  ;;  %v89_v32 = vmax.f32 %v73_v23, 0.0 }
   0x9   :  { %v90_v37 = vmax.f32 %v74_v29, 0.0  ;;  %v91_v38 = vmax.f32 %v75_v30, 0.0  ;;  %v156_v39 = vunpack.c.l.bf16 %v213_v26  ;;  %v92_v42 = vmax.f32 %v76_v33, 0.0 }
   0xa   :  { %v173_v36 = vpack.c.bf16 %v87_v28, %v86_v27  ;;  %v178_v41 = vpack.c.bf16 %v89_v32, %v88_v31  ;;  %v93_v43 = vmax.f32 %v77_v34, 0.0  ;;  %v157_v44 = vunpack.c.h.bf16 %v213_v26 }
   0xb   :  { %v183_v46 = vpack.c.bf16 %v91_v38, %v90_v37  ;;  %v58_v47 = vmul.f32 %v252_v1, %v156_v39  ;;  %v160_v48 = vunpack.c.l.bf16 %v214_v35  ;;  %v161_v49 = vunpack.c.h.bf16 %v214_v35 }
   0xc   :  { %174 = vst [vmem:[%s339_s3] sm:$0xff] %v173_v36   ;;  %v188_v50 = vpack.c.bf16 %v93_v43, %v92_v42  ;;  %v59_v51 = vmul.f32 %v252_v1, %v157_v44  ;;  %v164_v52 = vunpack.c.l.bf16 %v215_v40  ;;  %v165_v53 = vunpack.c.h.bf16 %v215_v40 }
   0xd   :  { %217 = vst [vmem:[%s339_s3 + $0x8] sm:$0xff] %v178_v41   ;;  %v78_v54 = vadd.f32 %v257_v4, %v58_v47  ;;  %v60_v55 = vmul.f32 %v252_v1, %v160_v48  ;;  %v61_v56 = vmul.f32 %v252_v1, %v161_v49  ;;  %v168_v57 = vunpack.c.l.bf16 %v216_v45 }
   0xe   :  { %218 = vst [vmem:[%s339_s3 + $0x10] sm:$0xff] %v183_v46   ;;  %v79_v58 = vadd.f32 %v257_v4, %v59_v51  ;;  %v62_v59 = vmul.f32 %v252_v1, %v164_v52  ;;  %v63_v60 = vmul.f32 %v252_v1, %v165_v53  ;;  %v169_v61 = vunpack.c.h.bf16 %v216_v45 }
   0xf   :  { %219 = vst [vmem:[%s339_s3 + $0x18] sm:$0xff] %v188_v50   ;;  %v94_v62 = vmax.f32 %v78_v54, 0.0  ;;  %v80_v63 = vadd.f32 %v257_v4, %v60_v55  ;;  %v81_v0 = vadd.f32 %v257_v4, %v61_v56  ;;  %v64_v2 = vmul.f32 %v252_v1, %v168_v57 }
  0x10   :  { %v95_v3 = vmax.f32 %v79_v58, 0.0  ;;  %v82_v5 = vadd.f32 %v257_v4, %v62_v59  ;;  %v83_v6 = vadd.f32 %v257_v4, %v63_v60  ;;  %v65_v7 = vmul.f32 %v252_v1, %v169_v61 }
  0x11   :  { %v96_v8 = vmax.f32 %v80_v63, 0.0  ;;  %v97_v9 = vmax.f32 %v81_v0, 0.0  ;;  %v84_v10 = vadd.f32 %v257_v4, %v64_v2 }
  0x12   :  { %v193_v11 = vpack.c.bf16 %v95_v3, %v94_v62  ;;  %v98_v12 = vmax.f32 %v82_v5, 0.0  ;;  %v99_v13 = vmax.f32 %v83_v6, 0.0  ;;  %v85_v14 = vadd.f32 %v257_v4, %v65_v7 }
  0x13   :  { %v198_v15 = vpack.c.bf16 %v97_v9, %v96_v8  ;;  %v100_v16 = vmax.f32 %v84_v10, 0.0 }
  0x14   :  { %220 = vst [vmem:[%s339_s3 + $0x20] sm:$0xff] %v193_v11   ;;  %v203_v17 = vpack.c.bf16 %v99_v13, %v98_v12  ;;  %v101_v18 = vmax.f32 %v85_v14, 0.0 }
  0x15   :  { %221 = vst [vmem:[%s339_s3 + $0x28] sm:$0xff] %v198_v15  }
  0x16   :  { %222 = vst [vmem:[%s339_s3 + $0x30] sm:$0xff] %v203_v17   ;;  %v208_v1 = vpack.c.bf16 %v101_v18, %v100_v16 }
  0x18   :  { %223 = vst [vmem:[%s339_s3 + $0x38] sm:$0xff] %v208_v1  }

// kernel: basic_block_forward.8
= control target key start
LH: loop header
LB: loop body
LE: loop exit
PB: predicated region body
PF: predicated region fallthrough
CT: control target
= control target key end

     0   :  { %vm308_vm0 = vcmask 130048   ;;  %vm48_vm1 = vsmask.f32 3328  ;;  %vm49_vm2 = vsmask.f32 7440  ;;  %s1831_s1 = inlined_call_operand.vmem [shape: bf16[4,16,128], index: 1, kind: input, shape index: {}]   ;;  %s1832_s0 = inlined_call_operand.vmem [shape: bf16[2,9,9,16], index: 0, kind: input, shape index: {}]   ;;  %s1833_s2 = inlined_call_operand.vmem [shape: bf16[2,8,8,128], index: 2, kind: output, shape index: {0}]   ;;  %s1834_s3 = inlined_call_operand.vmem [shape: f32[1,2,128], index: 3, kind: output, shape index: {1}]  }
   0x1   :  { %v1318_v0 = vld [vmem:[%s1831_s1 + $0x10] sm:$0xff]  ;;  %v1308_v1 = vld [vmem:[%s1831_s1] sm:$0xff]  ;;  %v1212_v2 = vld [vmem:[%s1832_s0 + $0x8] sm:$0xf] }
   0x2   :  { %v1310_v3 = vld [vmem:[%s1832_s0 + $0xc] sm:$0xf0]  ;;  %v1150_v4 = vld [vmem:[%s1832_s0] sm:$0xf]  ;;  %v1300_v5 = vld [vmem:[%s1832_s0 + $0x4] sm:$0xf0]  ;;  %598 = vmatpush.bf16.msra.mxu2 %v1318_v0  ;;  %459 = vmatpush.bf16.msra.mxu1 %v1308_v1 }
   0x3   :  { %v1213_v6 = vor.u32 %v1310_v3, %v1212_v2  ;;  %v1151_v7 = vor.u32 %v1300_v5, %v1150_v4  ;;  %v1309_v8 = vld [vmem:[%s1831_s1 + $0x8] sm:$0xff]  ;;  %v1319_v9 = vld [vmem:[%s1831_s1 + $0x18] sm:$0xff]  ;;  %v14_v10 = vld [vmem:[%s1832_s0] sm:$0xf] }
   0x4   :  { %v15_v11 = vld [vmem:[%s1832_s0 + $0x8] sm:$0xf]  ;;  %v32_v12 = vld [vmem:[%s1832_s0 + $0x4] sm:$0x1]  ;;  %v33_v13 = vld [vmem:[%s1832_s0 + $0xc] sm:$0x1]  ;;  %340 = vmatpush.bf16.msra.mxu0 %v1309_v8  ;;  %976 = vmatpush.bf16.msra.mxu3 %v1319_v9 }
   0x5   :  { %v52_v14 = vshrl.u32 %v14_v10, 16  ;;  %v55_v15 = vshll.u32 %v14_v10, 16  ;;  %v61_v16 = vshll.u32 %v32_v12, 16  ;;  %v66_v17 = vshrl.u32 %v15_v11, 16  ;;  %v1254_v18 = vld [vmem:[%s1832_s0 + $0x8] sm:$0xf]  ;;  %1246 = vmatmul.msk.bf16.vlgmr.msra.gmra.mxu2 %vm308_vm0, %v1213_v6  ;;  %1184 = vmatmul.msk.bf16.vlgmr.msra.gmra.mxu1 %vm308_vm0, %v1151_v7  ;;  %vm1449_vm3 = vmor %vm48_vm1, %vm49_vm2 }
   0x6   :  { %v69_v19 = vshll.u32 %v15_v11, 16  ;;  %v75_v20 = vshll.u32 %v33_v13, 16  ;;  %v1255_v21 = vld [vmem:[%s1832_s0 + $0xc] sm:$0x1]  ;;  %v1256_v22 = vld [vmem:[%s1832_s0 + $0x10] sm:$0xf] }
   0x7   :  { %v54_v23 = vrot.slane %v52_v14, 4  ;;  %v57_v24 = vrot.slane %v55_v15, 5  ;;  %v63_v25 = vrot.slane %v61_v16, 5  ;;  %v68_v26 = vrot.slane %v66_v17, 4  ;;  %v1257_v27 = vld [vmem:[%s1832_s0 + $0x14] sm:$0x1] }
   0x8   :  { %v71_v28 = vrot.slane %v69_v19, 5  ;;  %v77_v29 = vrot.slane %v75_v20, 5  ;;  %v689_v30 = vshrl.u32 %v1254_v18, 16  ;;  %v692_v31 = vshll.u32 %v1254_v18, 16  ;;  %v1440_v32 = vld [vmem:[%s1832_s0 + $0x18] sm:$0xf] }
   0x9   :  { %v58_v33 = vor.u32 %v57_v24, %v54_v23  ;;  %v698_v34 = vshll.u32 %v1255_v21, 16  ;;  %v703_v35 = vshrl.u32 %v1256_v22, 16  ;;  %v706_v36 = vshll.u32 %v1256_v22, 16  ;;  %v1445_v37 = vld [vmem:[%s1832_s0 + $0x1c] sm:$0xf0] }
   0xa   :  { %v72_v39 = vor.u32 %v71_v28, %v68_v26  ;;  %v691_v40 = vrot.slane %v689_v30, 4  ;;  %v694_v41 = vrot.slane %v692_v31, 5  ;;  %v712_v42 = vshll.u32 %v1257_v27, 16  ;;  %v1154_v43 = vld [vmem:[%s1832_s0 + $0x10] sm:$0xf] }
   0xb   :  { %v59_v44 = vrot.slane %v58_v33, 4  ;;  %v700_v45 = vrot.slane %v698_v34, 5  ;;  %v705_v46 = vrot.slane %v703_v35, 4  ;;  %v708_v47 = vrot.slane %v706_v36, 5  ;;  %v1301_v48 = vld [vmem:[%s1832_s0 + $0x14] sm:$0xf0] }
   0xc   :  { %v73_v49 = vrot.slane %v72_v39, 4  ;;  %v695_v50 = vor.u32 %v694_v41, %v691_v40  ;;  %v714_v51 = vrot.slane %v712_v42, 5  ;;  %v1217_v52 = vor.u32 %v1445_v37, %v1440_v32  ;;  %v16_v53 = vld [vmem:[%s1832_s0 + $0x10] sm:$0xf]  ;;  %v17_v57 = vld [vmem:[%s1832_s0 + $0x18] sm:$0xf] }
   0xd   :  { %v64_v54 = vsel %vm1449_vm3, %v59_v44, %v63_v25  ;;  %v709_v55 = vor.u32 %v708_v47, %v705_v46  ;;  %v1155_v56 = vor.u32 %v1301_v48, %v1154_v43  ;;  %v34_v58 = vld [vmem:[%s1832_s0 + $0x14] sm:$0x1]  ;;  %v80_v59 = vshrl.u32 %v16_v53, 16  ;;  %v35_v63 = vld [vmem:[%s1832_s0 + $0x1c] sm:$0x1] }
   0xe   :  { %v78_v60 = vsel %vm1449_vm3, %v73_v49, %v77_v29  ;;  %v278_v61 = vunpack.c.l.b16 %v64_v54  ;;  %v696_v62 = vrot.slane %v695_v50, 4  ;;  %v83_v0 = vshll.u32 %v16_v53, 16  ;;  %v1258_v5 = vld [vmem:[%s1832_s0 + $0x18] sm:$0xf]  ;;  %v1259_v10 = vld [vmem:[%s1832_s0 + $0x1c] sm:$0x1] }
   0xf   :  { %v279_v1 = vunpack.c.l.b16 %v78_v60  ;;  %v710_v2 = vrot.slane %v709_v55, 4  ;;  %v82_v3 = vrot.slane %v80_v59, 4  ;;  %v89_v4 = vshll.u32 %v34_v58, 16  ;;  %v1260_v15 = vld [vmem:[%s1832_s0 + $0x20] sm:$0xf] }
  0x10   :  { %v701_v6 = vsel %vm1449_vm3, %v696_v62, %v700_v45  ;;  %v85_v7 = vrot.slane %v83_v0, 5  ;;  %v94_v8 = vshrl.u32 %v17_v57, 16  ;;  %v97_v9 = vshll.u32 %v17_v57, 16  ;;  %v1261_v27 = vld [vmem:[%s1832_s0 + $0x24] sm:$0x1] }
  0x11   :  { %v294_v11 = vpack.c.b16 %v279_v1, %v278_v61  ;;  %v715_v12 = vsel %vm1449_vm3, %v710_v2, %v714_v51  ;;  %v915_v13 = vunpack.c.l.b16 %v701_v6  ;;  %v91_v14 = vrot.slane %v89_v4, 5  ;;  %v18_v32 = vld [vmem:[%s1832_s0 + $0x20] sm:$0xf]  ;;  %v19_v41 = vld [vmem:[%s1832_s0 + $0x28] sm:$0xf] }
  0x12   :  { %v916_v16 = vunpack.c.l.b16 %v715_v12  ;;  %v86_v17 = vor.u32 %v85_v7, %v82_v3  ;;  %v96_v18 = vrot.slane %v94_v8, 4  ;;  %v99_v19 = vrot.slane %v97_v9, 5  ;;  %v36_v47 = vld [vmem:[%s1832_s0 + $0x24] sm:$0x1]  ;;  %v1262_v53 = vld [vmem:[%s1832_s0 + $0x28] sm:$0xf] }
  0x13   :  { %1140 = vmatmul.msk.bf16.vlgmr.msra.gmra.mxu0 %vm308_vm0, %v294_v11  ;;  %v103_v20 = vshll.u32 %v35_v63, 16  ;;  %v717_v21 = vshrl.u32 %v1258_v5, 16  ;;  %v720_v22 = vshll.u32 %v1258_v5, 16  ;;  %v726_v23 = vshll.u32 %v1259_v10, 16  ;;  %v1264_v59 = vld [vmem:[%s1832_s0 + $0x30] sm:$0xf] }
  0x14   :  { %v931_v24 = vpack.c.b16 %v916_v16, %v915_v13  ;;  %v87_v25 = vrot.slane %v86_v17, 4  ;;  %v100_v26 = vor.u32 %v99_v19, %v96_v18  ;;  %v731_v28 = vshrl.u32 %v1260_v15, 16  ;;  %v1220_v0 = vld [vmem:[%s1832_s0 + $0x28] sm:$0xf]  ;;  %v1312_v1 = vld [vmem:[%s1832_s0 + $0x2c] sm:$0xf0] }
  0x15   :  { %v105_v29 = vrot.slane %v103_v20, 5  ;;  %v719_v30 = vrot.slane %v717_v21, 4  ;;  %v722_v31 = vrot.slane %v720_v22, 5  ;;  %1247 = vmatmul.msk.bf16.gmra.mxu2 %vm308_vm0, %v1217_v52  ;;  %v734_v36 = vshll.u32 %v1260_v15, 16  ;;  %1185 = vmatmul.msk.bf16.gmra.mxu1 %vm308_vm0, %v1155_v56  ;;  %v37_v56 = vld [vmem:[%s1832_s0 + $0x2c] sm:$0x1] }
  0x16   :  { %1292 = vmatmul.msk.bf16.vlgmr.msra.gmra.mxu3 %vm308_vm0, %v931_v24  ;;  %v92_v33 = vsel %vm1449_vm3, %v87_v25, %v91_v14  ;;  %v101_v34 = vrot.slane %v100_v26, 4  ;;  %v733_v35 = vrot.slane %v731_v28, 4  ;;  %v728_v39 = vrot.slane %v726_v23, 5  ;;  %v1263_v7 = vld [vmem:[%s1832_s0 + $0x2c] sm:$0x1] }
  0x17   :  { %v723_v37 = vor.u32 %v722_v31, %v719_v30  ;;  %v740_v40 = vshll.u32 %v1261_v27, 16  ;;  %v736_v43 = vrot.slane %v734_v36, 5  ;;  %v108_v44 = vshrl.u32 %v18_v32, 16  ;;  %v1158_v12 = vld [vmem:[%s1832_s0 + $0x20] sm:$0xf] }
  0x18   :  { %v106_v42 = vsel %vm1449_vm3, %v101_v34, %v105_v29  ;;  %v280_v45 = vunpack.c.l.b16 %v92_v33  ;;  %v111_v48 = vshll.u32 %v18_v32, 16  ;;  %v122_v52 = vshrl.u32 %v19_v41, 16  ;;  %v1302_v13 = vld [vmem:[%s1832_s0 + $0x24] sm:$0xf0]  ;;  %v1265_v17 = vld [vmem:[%s1832_s0 + $0x34] sm:$0x1] }
  0x19   :  { %v724_v46 = vrot.slane %v723_v37, 4  ;;  %v737_v49 = vor.u32 %v736_v43, %v733_v35  ;;  %v742_v50 = vrot.slane %v740_v40, 5  ;;  %v110_v51 = vrot.slane %v108_v44, 4  ;;  %v20_v28 = vld [vmem:[%s1832_s0 + $0x30] sm:$0xf] }
  0x1a   :  { %v281_v54 = vunpack.c.l.b16 %v106_v42  ;;  %v113_v57 = vrot.slane %v111_v48, 5  ;;  %v125_v58 = vshll.u32 %v19_v41, 16  ;;  %v117_v61 = vshll.u32 %v36_v47, 16  ;;  %v21_v32 = vld [vmem:[%s1832_s0 + $0x38] sm:$0xf] }
  0x1b   :  { %v729_v55 = vsel %vm1449_vm3, %v724_v46, %v728_v39  ;;  %v738_v60 = vrot.slane %v737_v49, 4  ;;  %v124_v62 = vrot.slane %v122_v52, 4  ;;  %v745_v4 = vshrl.u32 %v1262_v53, 16  ;;  %v1268_v46 = vld [vmem:[%s1832_s0 + $0x40] sm:$0xf] }
  0x1c   :  { %v917_v63 = vunpack.c.l.b16 %v729_v55  ;;  %v114_v2 = vor.u32 %v113_v57, %v110_v51  ;;  %v127_v3 = vrot.slane %v125_v58, 5  ;;  %v131_v6 = vshll.u32 %v37_v56, 16  ;;  %v38_v51 = vld [vmem:[%s1832_s0 + $0x34] sm:$0x1] }
  0x1d   :  { %v743_v5 = vsel %vm1449_vm3, %v738_v60, %v742_v50  ;;  %v748_v8 = vshll.u32 %v1262_v53, 16  ;;  %v759_v9 = vshrl.u32 %v1264_v59, 16  ;;  %v295_v10 = vpack.c.b16 %v281_v54, %v280_v45  ;;  %v1266_v45 = vld [vmem:[%s1832_s0 + $0x38] sm:$0xf] }
  0x1e   :  { %v918_v11 = vunpack.c.l.b16 %v743_v5  ;;  %v128_v14 = vor.u32 %v127_v3, %v124_v62  ;;  %v1221_v15 = vor.u32 %v1312_v1, %v1220_v0  ;;  %v119_v16 = vrot.slane %v117_v61, 5  ;;  %v1313_v0 = vld [vmem:[%s1832_s0 + $0x3c] sm:$0xf0]  ;;  %v1162_v3 = vld [vmem:[%s1832_s0 + $0x30] sm:$0xf] }
  0x1f   :  { %v747_v18 = vrot.slane %v745_v4, 4  ;;  %v750_v19 = vrot.slane %v748_v8, 5  ;;  %v115_v20 = vrot.slane %v114_v2, 4  ;;  %v754_v21 = vshll.u32 %v1263_v7, 16  ;;  %v1303_v4 = vld [vmem:[%s1832_s0 + $0x34] sm:$0xf0] }
  0x20   :  { %v761_v22 = vrot.slane %v759_v9, 4  ;;  %v762_v23 = vshll.u32 %v1264_v59, 16  ;;  %v932_v24 = vpack.c.b16 %v918_v11, %v917_v63  ;;  %v129_v25 = vrot.slane %v128_v14, 4  ;;  %v39_v59 = vld [vmem:[%s1832_s0 + $0x3c] sm:$0x1] }
  0x21   :  { %v133_v26 = vrot.slane %v131_v6, 5  ;;  %v751_v27 = vor.u32 %v750_v19, %v747_v18  ;;  %v1159_v29 = vor.u32 %v1302_v13, %v1158_v12  ;;  %v768_v31 = vshll.u32 %v1265_v17, 16  ;;  %v1224_v63 = vld [vmem:[%s1832_s0 + $0x38] sm:$0xf]  ;;  %v1269_v13 = vld [vmem:[%s1832_s0 + $0x44] sm:$0x1] }
  0x22   :  { %v764_v30 = vrot.slane %v762_v23, 5  ;;  %v756_v33 = vrot.slane %v754_v21, 5  ;;  %v136_v35 = vshrl.u32 %v20_v28, 16  ;;  %v120_v36 = vsel %vm1449_vm3, %v115_v20, %v119_v16 }
  0x23   :  { %1141 = vmatmul.msk.bf16.gmra.mxu0 %vm308_vm0, %v295_v10  ;;  %v134_v37 = vsel %vm1449_vm3, %v129_v25, %v133_v26  ;;  %v752_v39 = vrot.slane %v751_v27, 4  ;;  %v139_v40 = vshll.u32 %v20_v28, 16  ;;  %v770_v42 = vrot.slane %v768_v31, 5  ;;  %v1267_v10 = vld [vmem:[%s1832_s0 + $0x3c] sm:$0x1] }
  0x24   :  { %v765_v34 = vor.u32 %v764_v30, %v761_v22  ;;  %v150_v43 = vshrl.u32 %v21_v32, 16  ;;  %v153_v44 = vshll.u32 %v21_v32, 16  ;;  %v282_v47 = vunpack.c.l.b16 %v120_v36  ;;  %v22_v25 = vld [vmem:[%s1832_s0 + $0x48] sm:$0xf]  ;;  %v23_v26 = vld [vmem:[%s1832_s0 + $0x50] sm:$0xf] }
  0x25   :  { %1248 = vmatmul.msk.bf16.gmra.mxu2 %vm308_vm0, %v1221_v15  ;;  %1186 = vmatmul.msk.bf16.gmra.mxu1 %vm308_vm0, %v1159_v29  ;;  %v283_v48 = vunpack.c.l.b16 %v134_v37  ;;  %v138_v49 = vrot.slane %v136_v35, 4  ;;  %v757_v50 = vsel %vm1449_vm3, %v752_v39, %v756_v33  ;;  %v141_v52 = vrot.slane %v139_v40, 5  ;;  %v1270_v27 = vld [vmem:[%s1832_s0 + $0x50] sm:$0xf]  ;;  %v1272_v39 = vld [vmem:[%s1832_s0 + $0x58] sm:$0xf] }
  0x26   :  { %1293 = vmatmul.msk.bf16.gmra.mxu3 %vm308_vm0, %v932_v24  ;;  %v766_v41 = vrot.slane %v765_v34, 4  ;;  %v773_v53 = vshrl.u32 %v1266_v45, 16  ;;  %v776_v54 = vshll.u32 %v1266_v45, 16  ;;  %v152_v56 = vrot.slane %v150_v43, 4 }
  0x27   :  { %v155_v57 = vrot.slane %v153_v44, 5  ;;  %v787_v58 = vshrl.u32 %v1268_v46, 16  ;;  %v790_v60 = vshll.u32 %v1268_v46, 16  ;;  %v296_v61 = vpack.c.b16 %v283_v48, %v282_v47  ;;  %v40_v47 = vld [vmem:[%s1832_s0 + $0x4c] sm:$0x1] }
  0x28   :  { %v771_v55 = vsel %vm1449_vm3, %v766_v41, %v770_v42  ;;  %v919_v62 = vunpack.c.l.b16 %v757_v50  ;;  %v145_v1 = vshll.u32 %v38_v51, 16  ;;  %v142_v5 = vor.u32 %v141_v52, %v138_v49 }
  0x29   :  { %v920_v2 = vunpack.c.l.b16 %v771_v55  ;;  %v775_v6 = vrot.slane %v773_v53, 4  ;;  %v778_v7 = vrot.slane %v776_v54, 5  ;;  %v156_v8 = vor.u32 %v155_v57, %v152_v56  ;;  %v41_v55 = vld [vmem:[%s1832_s0 + $0x54] sm:$0x1] }
  0x2a   :  { %v159_v9 = vshll.u32 %v39_v59, 16  ;;  %v789_v11 = vrot.slane %v787_v58, 4  ;;  %v792_v12 = vrot.slane %v790_v60, 5  ;;  %v1225_v14 = vor.u32 %v1313_v0, %v1224_v63  ;;  %v1271_v56 = vld [vmem:[%s1832_s0 + $0x54] sm:$0x1] }
  0x2b   :  { %v1163_v15 = vor.u32 %v1303_v4, %v1162_v3  ;;  %v147_v16 = vrot.slane %v145_v1, 5  ;;  %v933_v17 = vpack.c.b16 %v920_v2, %v919_v62  ;;  %v143_v18 = vrot.slane %v142_v5, 4  ;;  %v1228_v59 = vld [vmem:[%s1832_s0 + $0x50] sm:$0xf]  ;;  %v1314_v60 = vld [vmem:[%s1832_s0 + $0x54] sm:$0xf0] }
  0x2c   :  { %v779_v19 = vor.u32 %v778_v7, %v775_v6  ;;  %v782_v20 = vshll.u32 %v1267_v10, 16  ;;  %v157_v21 = vrot.slane %v156_v8, 4  ;;  %v161_v22 = vrot.slane %v159_v9, 5  ;;  %v1166_v63 = vld [vmem:[%s1832_s0 + $0x48] sm:$0xf] }
  0x2d   :  { %v793_v23 = vor.u32 %v792_v12, %v789_v11  ;;  %v796_v24 = vshll.u32 %v1269_v13, 16  ;;  %v148_v28 = vsel %vm1449_vm3, %v143_v18, %v147_v16  ;;  %v164_v31 = vshrl.u32 %v22_v25, 16  ;;  %v1304_v0 = vld [vmem:[%s1832_s0 + $0x4c] sm:$0xf0]  ;;  %v1273_v6 = vld [vmem:[%s1832_s0 + $0x5c] sm:$0x1] }
  0x2e   :  { %v780_v29 = vrot.slane %v779_v19, 4  ;;  %v784_v30 = vrot.slane %v782_v20, 5  ;;  %v162_v32 = vsel %vm1449_vm3, %v157_v21, %v161_v22  ;;  %v167_v35 = vshll.u32 %v22_v25, 16  ;;  %v24_v12 = vld [vmem:[%s1832_s0 + $0x58] sm:$0xf] }
  0x2f   :  { %v794_v33 = vrot.slane %v793_v23, 4  ;;  %v798_v34 = vrot.slane %v796_v24, 5  ;;  %v178_v36 = vshrl.u32 %v23_v26, 16  ;;  %v181_v37 = vshll.u32 %v23_v26, 16  ;;  %v1274_v26 = vld [vmem:[%s1832_s0 + $0x60] sm:$0xf] }
  0x30   :  { %v801_v40 = vshrl.u32 %v1270_v27, 16  ;;  %v804_v41 = vshll.u32 %v1270_v27, 16  ;;  %v284_v42 = vunpack.c.l.b16 %v148_v28  ;;  %v285_v43 = vunpack.c.l.b16 %v162_v32  ;;  %v1276_v27 = vld [vmem:[%s1832_s0 + $0x68] sm:$0xf] }
  0x31   :  { %v785_v44 = vsel %vm1449_vm3, %v780_v29, %v784_v30  ;;  %v166_v45 = vrot.slane %v164_v31, 4  ;;  %v799_v46 = vsel %vm1449_vm3, %v794_v33, %v798_v34  ;;  %v169_v48 = vrot.slane %v167_v35, 5  ;;  %v42_v33 = vld [vmem:[%s1832_s0 + $0x5c] sm:$0x1] }
  0x32   :  { %v815_v49 = vshrl.u32 %v1272_v39, 16  ;;  %v818_v50 = vshll.u32 %v1272_v39, 16  ;;  %v180_v51 = vrot.slane %v178_v36, 4  ;;  %v183_v52 = vrot.slane %v181_v37, 5 }
  0x33   :  { %1142 = vmatmul.msk.bf16.gmra.mxu0 %vm308_vm0, %v296_v61  ;;  %v803_v53 = vrot.slane %v801_v40, 4  ;;  %v806_v54 = vrot.slane %v804_v41, 5  ;;  %v921_v57 = vunpack.c.l.b16 %v785_v44  ;;  %v922_v58 = vunpack.c.l.b16 %v799_v46  ;;  %v43_v46 = vld [vmem:[%s1832_s0 + $0x64] sm:$0x1] }
  0x34   :  { %v173_v61 = vshll.u32 %v40_v47, 16  ;;  %v297_v62 = vpack.c.b16 %v285_v43, %v284_v42  ;;  %v170_v1 = vor.u32 %v169_v48, %v166_v45  ;;  %v817_v2 = vrot.slane %v815_v49, 4  ;;  %v1232_v48 = vld [vmem:[%s1832_s0 + $0x60] sm:$0xf] }
  0x35   :  { %1249 = vmatmul.msk.bf16.gmra.mxu2 %vm308_vm0, %v1225_v14  ;;  %1187 = vmatmul.msk.bf16.gmra.mxu1 %vm308_vm0, %v1163_v15  ;;  %v820_v3 = vrot.slane %v818_v50, 5  ;;  %v184_v4 = vor.u32 %v183_v52, %v180_v51  ;;  %v187_v5 = vshll.u32 %v41_v55, 16  ;;  %v807_v7 = vor.u32 %v806_v54, %v803_v53  ;;  %v1315_v50 = vld [vmem:[%s1832_s0 + $0x64] sm:$0xf0] }
  0x36   :  { %1294 = vmatmul.msk.bf16.gmra.mxu3 %vm308_vm0, %v933_v17  ;;  %v810_v8 = vshll.u32 %v1271_v56, 16  ;;  %v934_v9 = vpack.c.b16 %v922_v58, %v921_v57  ;;  %v1229_v10 = vor.u32 %v1314_v60, %v1228_v59  ;;  %v1167_v11 = vor.u32 %v1304_v0, %v1166_v63  ;;  %v25_v17 = vld [vmem:[%s1832_s0 + $0x60] sm:$0xf]  ;;  %v1275_v59 = vld [vmem:[%s1832_s0 + $0x64] sm:$0x1] }
  0x37   :  { %v171_v13 = vrot.slane %v170_v1, 4  ;;  %v175_v14 = vrot.slane %v173_v61, 5  ;;  %v821_v15 = vor.u32 %v820_v3, %v817_v2  ;;  %v824_v16 = vshll.u32 %v1273_v6, 16  ;;  %v1277_v60 = vld [vmem:[%s1832_s0 + $0x6c] sm:$0x1] }
  0x38   :  { %v185_v18 = vrot.slane %v184_v4, 4  ;;  %v189_v19 = vrot.slane %v187_v5, 5  ;;  %v808_v20 = vrot.slane %v807_v7, 4  ;;  %v812_v21 = vrot.slane %v810_v8, 5  ;;  %v1170_v63 = vld [vmem:[%s1832_s0 + $0x58] sm:$0xf] }
  0x39   :  { %v192_v22 = vshrl.u32 %v24_v12, 16  ;;  %v195_v23 = vshll.u32 %v24_v12, 16  ;;  %v206_v24 = vshrl.u32 %v25_v17, 16  ;;  %v209_v25 = vshll.u32 %v25_v17, 16  ;;  %v1305_v0 = vld [vmem:[%s1832_s0 + $0x5c] sm:$0xf0] }
  0x3a   :  { %v822_v28 = vrot.slane %v821_v15, 4  ;;  %v826_v29 = vrot.slane %v824_v16, 5  ;;  %v176_v30 = vsel %vm1449_vm3, %v171_v13, %v175_v14  ;;  %v190_v31 = vsel %vm1449_vm3, %v185_v18, %v189_v19  ;;  %v27_v12 = vld [vmem:[%s1832_s0 + $0x70] sm:$0xf] }
  0x3b   :  { %v813_v32 = vsel %vm1449_vm3, %v808_v20, %v812_v21  ;;  %v829_v34 = vshrl.u32 %v1274_v26, 16  ;;  %v832_v35 = vshll.u32 %v1274_v26, 16  ;;  %v843_v36 = vshrl.u32 %v1276_v27, 16 }
  0x3c   :  { %v846_v37 = vshll.u32 %v1276_v27, 16  ;;  %v194_v39 = vrot.slane %v192_v22, 4  ;;  %v197_v40 = vrot.slane %v195_v23, 5  ;;  %v208_v41 = vrot.slane %v206_v24, 4  ;;  %v1278_v23 = vld [vmem:[%s1832_s0 + $0x70] sm:$0xf] }
  0x3d   :  { %v211_v42 = vrot.slane %v209_v25, 5  ;;  %v286_v43 = vunpack.c.l.b16 %v176_v30  ;;  %v287_v44 = vunpack.c.l.b16 %v190_v31  ;;  %v827_v45 = vsel %vm1449_vm3, %v822_v28, %v826_v29  ;;  %v1280_v24 = vld [vmem:[%s1832_s0 + $0x78] sm:$0xf] }
  0x3e   :  { %v923_v47 = vunpack.c.l.b16 %v813_v32  ;;  %v201_v49 = vshll.u32 %v42_v33, 16  ;;  %v831_v51 = vrot.slane %v829_v34, 4  ;;  %v834_v52 = vrot.slane %v832_v35, 5 }
  0x3f   :  { %v845_v53 = vrot.slane %v843_v36, 4  ;;  %v848_v54 = vrot.slane %v846_v37, 5  ;;  %v924_v55 = vunpack.c.l.b16 %v827_v45  ;;  %v198_v56 = vor.u32 %v197_v40, %v194_v39  ;;  %v44_v37 = vld [vmem:[%s1832_s0 + $0x6c] sm:$0x1]  ;;  %v45_v39 = vld [vmem:[%s1832_s0 + $0x74] sm:$0x1] }
  0x40   :  { %v212_v57 = vor.u32 %v211_v42, %v208_v41  ;;  %v215_v58 = vshll.u32 %v43_v46, 16  ;;  %v298_v61 = vpack.c.b16 %v287_v44, %v286_v43  ;;  %v203_v1 = vrot.slane %v201_v49, 5  ;;  %v1236_v43 = vld [vmem:[%s1832_s0 + $0x70] sm:$0xf]  ;;  %v1316_v44 = vld [vmem:[%s1832_s0 + $0x74] sm:$0xf0] }
  0x41   :  { %v835_v2 = vor.u32 %v834_v52, %v831_v51  ;;  %v838_v3 = vshll.u32 %v1275_v59, 16  ;;  %v849_v4 = vor.u32 %v848_v54, %v845_v53  ;;  %v852_v5 = vshll.u32 %v1277_v60, 16  ;;  %v1174_v45 = vld [vmem:[%s1832_s0 + $0x68] sm:$0xf]  ;;  %v1306_v46 = vld [vmem:[%s1832_s0 + $0x6c] sm:$0xf0] }
  0x42   :  { %v935_v6 = vpack.c.b16 %v924_v55, %v923_v47  ;;  %v199_v7 = vrot.slane %v198_v56, 4  ;;  %v213_v8 = vrot.slane %v212_v57, 4  ;;  %v234_v21 = vshrl.u32 %v27_v12, 16  ;;  %v1279_v55 = vld [vmem:[%s1832_s0 + $0x74] sm:$0x1] }
  0x43   :  { %1143 = vmatmul.msk.bf16.gmra.mxu0 %vm308_vm0, %v297_v62  ;;  %v1233_v62 = vor.u32 %v1315_v50, %v1232_v48  ;;  %v836_v13 = vrot.slane %v835_v2, 4  ;;  %v840_v14 = vrot.slane %v838_v3, 5  ;;  %v850_v15 = vrot.slane %v849_v4, 4  ;;  %v1281_v56 = vld [vmem:[%s1832_s0 + $0x7c] sm:$0x1] }
  0x44   :  { %v854_v16 = vrot.slane %v852_v5, 5  ;;  %v204_v17 = vsel %vm1449_vm3, %v199_v7, %v203_v1  ;;  %v237_v22 = vshll.u32 %v27_v12, 16  ;;  %v857_v29 = vshrl.u32 %v1278_v23, 16  ;;  %v28_v4 = vld [vmem:[%s1832_s0 + $0x78] sm:$0xf] }
  0x45   :  { %1250 = vmatmul.msk.bf16.gmra.mxu2 %vm308_vm0, %v1229_v10  ;;  %1188 = vmatmul.msk.bf16.gmra.mxu1 %vm308_vm0, %v1167_v11  ;;  %v1171_v10 = vor.u32 %v1305_v0, %v1170_v63  ;;  %v26_v11 = vld [vmem:[%s1832_s0 + $0x68] sm:$0xf]  ;;  %v288_v25 = vunpack.c.l.b16 %v204_v17  ;;  %v841_v27 = vsel %vm1449_vm3, %v836_v13, %v840_v14  ;;  %v860_v30 = vshll.u32 %v1278_v23, 16  ;;  %v29_v5 = vld [vmem:[%s1832_s0 + $0x80] sm:$0xf] }
  0x46   :  { %1295 = vmatmul.msk.bf16.gmra.mxu3 %vm308_vm0, %v934_v9  ;;  %v217_v9 = vrot.slane %v215_v58, 5  ;;  %v220_v19 = vshrl.u32 %v26_v11, 16  ;;  %v223_v20 = vshll.u32 %v26_v11, 16  ;;  %v855_v28 = vsel %vm1449_vm3, %v850_v15, %v854_v16  ;;  %v1282_v16 = vld [vmem:[%s1832_s0 + $0x80] sm:$0xf] }
  0x47   :  { %v871_v31 = vshrl.u32 %v1280_v24, 16  ;;  %v874_v32 = vshll.u32 %v1280_v24, 16  ;;  %v236_v35 = vrot.slane %v234_v21, 4  ;;  %v239_v36 = vrot.slane %v237_v22, 5  ;;  %v1284_v17 = vld [vmem:[%s1832_s0 + $0x88] sm:$0xf] }
  0x48   :  { %v218_v18 = vsel %vm1449_vm3, %v213_v8, %v217_v9  ;;  %v222_v33 = vrot.slane %v220_v19, 4  ;;  %v225_v34 = vrot.slane %v223_v20, 5  ;;  %v925_v41 = vunpack.c.l.b16 %v841_v27 }
  0x49   :  { %v289_v26 = vunpack.c.l.b16 %v218_v18  ;;  %v926_v42 = vunpack.c.l.b16 %v855_v28  ;;  %v859_v47 = vrot.slane %v857_v29, 4  ;;  %v862_v48 = vrot.slane %v860_v30, 5  ;;  %v46_v30 = vld [vmem:[%s1832_s0 + $0x7c] sm:$0x1] }
  0x4a   :  { %v873_v49 = vrot.slane %v871_v31, 4  ;;  %v876_v50 = vrot.slane %v874_v32, 5  ;;  %v226_v51 = vor.u32 %v225_v34, %v222_v33  ;;  %v229_v52 = vshll.u32 %v44_v37, 16  ;;  %v47_v31 = vld [vmem:[%s1832_s0 + $0x84] sm:$0x1] }
  0x4b   :  { %v299_v40 = vpack.c.b16 %v289_v26, %v288_v25  ;;  %v240_v53 = vor.u32 %v239_v36, %v236_v35  ;;  %v243_v54 = vshll.u32 %v45_v39, 16  ;;  %v936_v57 = vpack.c.b16 %v926_v42, %v925_v41  ;;  %v1240_v35 = vld [vmem:[%s1832_s0 + $0x80] sm:$0xf]  ;;  %v1317_v36 = vld [vmem:[%s1832_s0 + $0x84] sm:$0xf0] }
  0x4c   :  { %v1237_v58 = vor.u32 %v1316_v44, %v1236_v43  ;;  %v1175_v59 = vor.u32 %v1306_v46, %v1174_v45  ;;  %v863_v60 = vor.u32 %v862_v48, %v859_v47  ;;  %v880_v63 = vshll.u32 %v1281_v56, 16  ;;  %v1178_v37 = vld [vmem:[%s1832_s0 + $0x78] sm:$0xf]  ;;  %v1307_v39 = vld [vmem:[%s1832_s0 + $0x7c] sm:$0xf0] }
  0x4d   :  { %v227_v0 = vrot.slane %v226_v51, 4  ;;  %v231_v1 = vrot.slane %v229_v52, 5  ;;  %v241_v2 = vrot.slane %v240_v53, 4  ;;  %v245_v3 = vrot.slane %v243_v54, 5  ;;  %v1283_v48 = vld [vmem:[%s1832_s0 + $0x84] sm:$0x1] }
  0x4e   :  { %v882_v9 = vrot.slane %v880_v63, 5  ;;  %v248_v12 = vshrl.u32 %v28_v4, 16  ;;  %v251_v13 = vshll.u32 %v28_v4, 16  ;;  %v262_v14 = vshrl.u32 %v29_v5, 16 }
  0x4f   :  { %v246_v11 = vsel %vm1449_vm3, %v241_v2, %v245_v3  ;;  %v265_v15 = vshll.u32 %v29_v5, 16  ;;  %v885_v22 = vshrl.u32 %v1282_v16, 16  ;;  %v888_v23 = vshll.u32 %v1282_v16, 16 }
  0x50   :  { %v291_v19 = vunpack.c.l.b16 %v246_v11  ;;  %v899_v24 = vshrl.u32 %v1284_v17, 16  ;;  %v902_v25 = vshll.u32 %v1284_v17, 16  ;;  %v250_v26 = vrot.slane %v248_v12, 4 }
  0x51   :  { %v253_v27 = vrot.slane %v251_v13, 5  ;;  %v264_v28 = vrot.slane %v262_v14, 4  ;;  %v267_v29 = vrot.slane %v265_v15, 5  ;;  %v890_v41 = vrot.slane %v888_v23, 5 }
  0x52   :  { %v901_v42 = vrot.slane %v899_v24, 4  ;;  %v904_v43 = vrot.slane %v902_v25, 5  ;;  %v257_v45 = vshll.u32 %v46_v30, 16  ;;  %v271_v47 = vshll.u32 %v47_v31, 16 }
  0x53   :  { %1144 = vmatmul.msk.bf16.gmra.mxu0 %vm308_vm0, %v298_v61  ;;  %v866_v61 = vshll.u32 %v1279_v55, 16  ;;  %v254_v44 = vor.u32 %v253_v27, %v250_v26  ;;  %v268_v46 = vor.u32 %v267_v29, %v264_v28  ;;  %v1241_v51 = vor.u32 %v1317_v36, %v1240_v35 }
  0x54   :  { %v1179_v52 = vor.u32 %v1307_v39, %v1178_v37  ;;  %v894_v54 = vshll.u32 %v1283_v48, 16  ;;  %v905_v55 = vor.u32 %v904_v43, %v901_v42 }
  0x55   :  { %1251 = vmatmul.msk.bf16.gmra.mxu2 %vm308_vm0, %v1233_v62  ;;  %1189 = vmatmul.msk.bf16.gmra.mxu1 %vm308_vm0, %v1171_v10  ;;  %v877_v62 = vor.u32 %v876_v50, %v873_v49  ;;  %v868_v7 = vrot.slane %v866_v61, 5  ;;  %v232_v10 = vsel %vm1449_vm3, %v227_v0, %v231_v1  ;;  %v1285_v49 = vld [vmem:[%s1832_s0 + $0x8c] sm:$0x1] }
  0x56   :  { %1296 = vmatmul.msk.bf16.gmra.mxu3 %vm308_vm0, %v935_v6  ;;  %v864_v6 = vrot.slane %v863_v60, 4  ;;  %v290_v18 = vunpack.c.l.b16 %v232_v10  ;;  %v908_v56 = vshll.u32 %v1285_v49, 16  ;;  %v273_v60 = vrot.slane %v271_v47, 5 }
  0x57   :  { %v878_v8 = vrot.slane %v877_v62, 4  ;;  %v896_v62 = vrot.slane %v894_v54, 5  ;;  %v906_v63 = vrot.slane %v905_v55, 4 }
  0x58   :  { %v869_v20 = vsel %vm1449_vm3, %v864_v6, %v868_v7  ;;  %v300_v32 = vpack.c.b16 %v291_v19, %v290_v18  ;;  %v910_v0 = vrot.slane %v908_v56, 5 }
  0x59   :  { %v883_v21 = vsel %vm1449_vm3, %v878_v8, %v882_v9  ;;  %v927_v33 = vunpack.c.l.b16 %v869_v20 }
  0x5a   :  { %v928_v34 = vunpack.c.l.b16 %v883_v21  ;;  %v911_v6 = vsel %vm1449_vm3, %v906_v63, %v910_v0 }
  0x5b   :  { %v930_v8 = vunpack.c.l.b16 %v911_v6 }
  0x5c   :  { %v937_v50 = vpack.c.b16 %v928_v34, %v927_v33 }
  0x63   :  { %1145 = vmatmul.msk.bf16.gmra.mxu0 %vm308_vm0, %v299_v40  ;;  %v887_v40 = vrot.slane %v885_v22, 4 }
  0x65   :  { %1252 = vmatmul.msk.bf16.gmra.mxu2 %vm308_vm0, %v1237_v58  ;;  %1190 = vmatmul.msk.bf16.gmra.mxu1 %vm308_vm0, %v1175_v59  ;;  %v891_v53 = vor.u32 %v890_v41, %v887_v40  ;;  %v259_v58 = vrot.slane %v257_v45, 5  ;;  %v269_v59 = vrot.slane %v268_v46, 4 }
  0x66   :  { %1297 = vmatmul.msk.bf16.gmra.mxu3 %vm308_vm0, %v936_v57  ;;  %v255_v57 = vrot.slane %v254_v44, 4 }
  0x67   :  { %v892_v61 = vrot.slane %v891_v53, 4  ;;  %v274_v2 = vsel %vm1449_vm3, %v269_v59, %v273_v60 }
  0x68   :  { %v260_v1 = vsel %vm1449_vm3, %v255_v57, %v259_v58  ;;  %v293_v4 = vunpack.c.l.b16 %v274_v2 }
  0x69   :  { %v292_v3 = vunpack.c.l.b16 %v260_v1  ;;  %v897_v5 = vsel %vm1449_vm3, %v892_v61, %v896_v62 }
  0x6a   :  { %v929_v7 = vunpack.c.l.b16 %v897_v5 }
  0x6b   :  { %v301_v9 = vpack.c.b16 %v293_v4, %v292_v3 }
  0x6c   :  { %v938_v10 = vpack.c.b16 %v930_v8, %v929_v7 }
  0x73   :  { %1146 = vmatmul.msk.bf16.gmra.mxu0 %vm308_vm0, %v300_v32 }
  0x75   :  { %1253 = vmatmul.msk.bf16.gmra.mxu2 %vm308_vm0, %v1241_v51  ;;  %1191 = vmatmul.msk.bf16.gmra.mxu1 %vm308_vm0, %v1179_v52 }
  0x76   :  { %1298 = vmatmul.msk.bf16.gmra.mxu3 %vm308_vm0, %v937_v50 }
  0x82   :  { %v461_v11 = vpop.f32.mrf.mxu1 }
  0x83   :  { %1147 = vmatmul.msk.bf16.gmra.mxu0 %vm308_vm0, %v301_v9 }
  0x86   :  { %1299 = vmatmul.msk.bf16.gmra.mxu3 %vm308_vm0, %v938_v10 }
  0x88   :  { %v600_v12 = vpop.f32.mrf.mxu2 }
  0x8a   :  { %v463_v13 = vpop.f32.mrf.mxu1 }
  0x90   :  { %v342_v14 = vpop.f32.mrf.mxu0  ;;  %v602_v15 = vpop.f32.mrf.mxu2 }
  0x91   :  { %v462_v17 = vadd.f32 %v461_v11, %v342_v14 }
  0x92   :  { %v466_v16 = vpop.f32.mrf.mxu1 }
  0x93   :  { %v640_v38 = vadd.f32 %v600_v12, %v462_v17 }
  0x98   :  { %v344_v18 = vpop.f32.mrf.mxu0  ;;  %v605_v20 = vpop.f32.mrf.mxu2 }
  0x99   :  { %v978_v19 = vpop.f32.mrf.mxu3  ;;  %v464_v21 = vadd.f32 %v463_v13, %v344_v18 }
  0x9a   :  { %v468_v22 = vpop.f32.mrf.mxu1  ;;  %v1018_v23 = vadd.f32 %v978_v19, %v640_v38 }
  0x9b   :  { %v641_v24 = vadd.f32 %v602_v15, %v464_v21 }
  0x9c   :  { %v1088_v30 = vmul.f32 %v1018_v23, %v1018_v23 }
  0xa0   :  { %v347_v25 = vpop.f32.mrf.mxu0  ;;  %v607_v27 = vpop.f32.mrf.mxu2 }
  0xa1   :  { %v980_v26 = vpop.f32.mrf.mxu3  ;;  %v467_v29 = vadd.f32 %v466_v16, %v347_v25 }
  0xa2   :  { %v1019_v28 = vadd.f32 %v980_v26, %v641_v24  ;;  %v471_v34 = vpop.f32.mrf.mxu1 }
  0xa3   :  { %v642_v36 = vadd.f32 %v605_v20, %v467_v29 }
  0xa4   :  { %v1323_v31 = vpack.c.bf16 %v1019_v28, %v1018_v23  ;;  %v1066_v32 = vadd.f32 %v1019_v28, %v1018_v23  ;;  %v1089_v33 = vmul.f32 %v1019_v28, %v1019_v28 }
  0xa6   :  { %1324 = vst [vmem:[%s1833_s2] sm:$0xff] %v1323_v31   ;;  %v1104_v35 = vadd.f32 %v1089_v33, %v1088_v30 }
  0xa8   :  { %v349_v37 = vpop.f32.mrf.mxu0  ;;  %v610_v40 = vpop.f32.mrf.mxu2 }
  0xa9   :  { %v983_v39 = vpop.f32.mrf.mxu3  ;;  %v469_v44 = vadd.f32 %v468_v22, %v349_v37 }
  0xaa   :  { %v1020_v41 = vadd.f32 %v983_v39, %v642_v36  ;;  %v473_v45 = vpop.f32.mrf.mxu1 }
  0xab   :  { %v643_v47 = vadd.f32 %v607_v27, %v469_v44 }
  0xac   :  { %v1067_v42 = vadd.f32 %v1066_v32, %v1020_v41  ;;  %v1090_v43 = vmul.f32 %v1020_v41, %v1020_v41 }
  0xae   :  { %v1105_v46 = vadd.f32 %v1104_v35, %v1090_v43 }
  0xb0   :  { %v352_v48 = vpop.f32.mrf.mxu0  ;;  %v612_v50 = vpop.f32.mrf.mxu2 }
  0xb1   :  { %v985_v49 = vpop.f32.mrf.mxu3  ;;  %v472_v60 = vadd.f32 %v471_v34, %v352_v48 }
  0xb2   :  { %v1021_v51 = vadd.f32 %v985_v49, %v643_v47  ;;  %v476_v55 = vpop.f32.mrf.mxu1 }
  0xb3   :  { %v644_v63 = vadd.f32 %v610_v40, %v472_v60 }
  0xb4   :  { %v1328_v52 = vpack.c.bf16 %v1021_v51, %v1020_v41  ;;  %v1798_v53 = vadd.f32 %v1067_v42, %v1021_v51  ;;  %v1091_v54 = vmul.f32 %v1021_v51, %v1021_v51 }
  0xb6   :  { %1360 = vst [vmem:[%s1833_s2 + $0x8] sm:$0xff] %v1328_v52   ;;  %v1803_v56 = vadd.f32 %v1105_v46, %v1091_v54 }
  0xb8   :  { %v354_v57 = vpop.f32.mrf.mxu0  ;;  %v615_v59 = vpop.f32.mrf.mxu2 }
  0xb9   :  { %v988_v58 = vpop.f32.mrf.mxu3  ;;  %v474_v61 = vadd.f32 %v473_v45, %v354_v57 }
  0xba   :  { %v478_v62 = vpop.f32.mrf.mxu1  ;;  %v1022_v4 = vadd.f32 %v988_v58, %v644_v63 }
  0xbb   :  { %v645_v0 = vadd.f32 %v612_v50, %v474_v61 }
  0xbc   :  { %v1069_v60 = vadd.f32 %v1798_v53, %v1022_v4 }
  0xc0   :  { %v357_v1 = vpop.f32.mrf.mxu0  ;;  %v617_v3 = vpop.f32.mrf.mxu2 }
  0xc1   :  { %v990_v2 = vpop.f32.mrf.mxu3  ;;  %v477_v11 = vadd.f32 %v476_v55, %v357_v1  ;;  %v1092_v55 = vmul.f32 %v1022_v4, %v1022_v4 }
  0xc2   :  { %v1023_v5 = vadd.f32 %v990_v2, %v645_v0  ;;  %v481_v7 = vpop.f32.mrf.mxu1 }
  0xc3   :  { %v646_v13 = vadd.f32 %v615_v59, %v477_v11 }
  0xc4   :  { %v1333_v6 = vpack.c.bf16 %v1023_v5, %v1022_v4  ;;  %v1093_v59 = vmul.f32 %v1023_v5, %v1023_v5  ;;  %v1070_v0 = vadd.f32 %v1069_v60, %v1023_v5 }
  0xc6   :  { %1361 = vst [vmem:[%s1833_s2 + $0x10] sm:$0xff] %v1333_v6  }
  0xc8   :  { %v359_v8 = vpop.f32.mrf.mxu0  ;;  %v620_v10 = vpop.f32.mrf.mxu2 }
  0xc9   :  { %v993_v9 = vpop.f32.mrf.mxu3  ;;  %v479_v12 = vadd.f32 %v478_v62, %v359_v8  ;;  %v1107_v62 = vadd.f32 %v1803_v56, %v1092_v55 }
  0xca   :  { %v483_v14 = vpop.f32.mrf.mxu1  ;;  %v1024_v18 = vadd.f32 %v993_v9, %v646_v13 }
  0xcb   :  { %v647_v15 = vadd.f32 %v617_v3, %v479_v12  ;;  %v1108_v3 = vadd.f32 %v1107_v62, %v1093_v59 }
  0xcc   :  { %v1094_v63 = vmul.f32 %v1024_v18, %v1024_v18  ;;  %v1071_v9 = vadd.f32 %v1070_v0, %v1024_v18 }
  0xce   :  { %v1109_v12 = vadd.f32 %v1108_v3, %v1094_v63 }
  0xd0   :  { %v362_v16 = vpop.f32.mrf.mxu0  ;;  %v622_v20 = vpop.f32.mrf.mxu2 }
  0xd1   :  { %v995_v17 = vpop.f32.mrf.mxu3  ;;  %v482_v24 = vadd.f32 %v481_v7, %v362_v16 }
  0xd2   :  { %v1025_v19 = vadd.f32 %v995_v17, %v647_v15  ;;  %v486_v23 = vpop.f32.mrf.mxu1 }
  0xd3   :  { %v648_v27 = vadd.f32 %v620_v10, %v482_v24 }
  0xd4   :  { %v1338_v38 = vpack.c.bf16 %v1025_v19, %v1024_v18  ;;  %v1095_v6 = vmul.f32 %v1025_v19, %v1025_v19 }
  0xd6   :  { %1362 = vst [vmem:[%s1833_s2 + $0x18] sm:$0xff] %v1338_v38   ;;  %v1110_v53 = vadd.f32 %v1109_v12, %v1095_v6 }
  0xd8   :  { %v364_v21 = vpop.f32.mrf.mxu0  ;;  %v625_v26 = vpop.f32.mrf.mxu2 }
  0xd9   :  { %v998_v22 = vpop.f32.mrf.mxu3  ;;  %v484_v25 = vadd.f32 %v483_v14, %v364_v21  ;;  %v1072_v14 = vadd.f32 %v1071_v9, %v1025_v19 }
  0xda   :  { %v1026_v31 = vadd.f32 %v998_v22, %v648_v27  ;;  %v488_v33 = vpop.f32.mrf.mxu1 }
  0xdb   :  { %v649_v28 = vadd.f32 %v622_v20, %v484_v25 }
  0xdc   :  { %v1096_v13 = vmul.f32 %v1026_v31, %v1026_v31  ;;  %v1073_v56 = vadd.f32 %v1072_v14, %v1026_v31 }
  0xde   :  { %v1111_v5 = vadd.f32 %v1110_v53, %v1096_v13 }
  0xe0   :  { %v367_v29 = vpop.f32.mrf.mxu0  ;;  %v627_v35 = vpop.f32.mrf.mxu2 }
  0xe1   :  { %v1000_v30 = vpop.f32.mrf.mxu3  ;;  %v487_v39 = vadd.f32 %v486_v23, %v367_v29 }
  0xe2   :  { %v1027_v32 = vadd.f32 %v1000_v30, %v649_v28  ;;  %v491_v41 = vpop.f32.mrf.mxu1 }
  0xe3   :  { %v650_v42 = vadd.f32 %v625_v26, %v487_v39 }
  0xe4   :  { %v1343_v34 = vpack.c.bf16 %v1027_v32, %v1026_v31  ;;  %v1097_v4 = vmul.f32 %v1027_v32, %v1027_v32  ;;  %v1074_v38 = vadd.f32 %v1073_v56, %v1027_v32 }
  0xe6   :  { %1363 = vst [vmem:[%s1833_s2 + $0x20] sm:$0xff] %v1343_v34   ;;  %v1112_v18 = vadd.f32 %v1111_v5, %v1097_v4 }
  0xe8   :  { %v369_v36 = vpop.f32.mrf.mxu0  ;;  %v630_v45 = vpop.f32.mrf.mxu2 }
  0xe9   :  { %v1003_v37 = vpop.f32.mrf.mxu3  ;;  %v489_v40 = vadd.f32 %v488_v33, %v369_v36 }
  0xea   :  { %v1028_v47 = vadd.f32 %v1003_v37, %v650_v42  ;;  %v493_v50 = vpop.f32.mrf.mxu1 }
  0xeb   :  { %v651_v43 = vadd.f32 %v627_v35, %v489_v40 }
  0xec   :  { %v1098_v20 = vmul.f32 %v1028_v47, %v1028_v47  ;;  %v1075_v24 = vadd.f32 %v1074_v38, %v1028_v47 }
  0xee   :  { %v1113_v19 = vadd.f32 %v1112_v18, %v1098_v20 }
  0xf0   :  { %v372_v44 = vpop.f32.mrf.mxu0  ;;  %v632_v57 = vpop.f32.mrf.mxu2 }
  0xf1   :  { %v1005_v46 = vpop.f32.mrf.mxu3  ;;  %v492_v54 = vadd.f32 %v491_v41, %v372_v44 }
  0xf2   :  { %v1029_v48 = vadd.f32 %v1005_v46, %v651_v43  ;;  %v496_v7 = vpop.f32.mrf.mxu1 }
  0xf3   :  { %v652_v61 = vadd.f32 %v630_v45, %v492_v54 }
  0xf4   :  { %v1348_v49 = vpack.c.bf16 %v1029_v48, %v1028_v47  ;;  %v1099_v25 = vmul.f32 %v1029_v48, %v1029_v48  ;;  %v1076_v27 = vadd.f32 %v1075_v24, %v1029_v48 }
  0xf6   :  { %1364 = vst [vmem:[%s1833_s2 + $0x28] sm:$0xff] %v1348_v49   ;;  %v1114_v31 = vadd.f32 %v1113_v19, %v1099_v25 }
  0xf8   :  { %v374_v51 = vpop.f32.mrf.mxu0  ;;  %v635_v17 = vpop.f32.mrf.mxu2 }
  0xf9   :  { %v1008_v52 = vpop.f32.mrf.mxu3  ;;  %v494_v58 = vadd.f32 %v493_v50, %v374_v51 }
  0xfa   :  { %v1030_v10 = vadd.f32 %v1008_v52, %v652_v61  ;;  %v498_v26 = vpop.f32.mrf.mxu1 }
  0xfb   :  { %v653_v1 = vadd.f32 %v632_v57, %v494_v58 }
  0xfc   :  { %v1100_v28 = vmul.f32 %v1030_v10, %v1030_v10  ;;  %v1077_v33 = vadd.f32 %v1076_v27, %v1030_v10 }
  0xfe   :  { %v1115_v36 = vadd.f32 %v1114_v31, %v1100_v28 }
 0x100   :  { %v377_v2 = vpop.f32.mrf.mxu0  ;;  %v637_v35 = vpop.f32.mrf.mxu2 }
 0x101   :  { %v1010_v8 = vpop.f32.mrf.mxu3  ;;  %v497_v16 = vadd.f32 %v496_v7, %v377_v2 }
 0x102   :  { %v1031_v11 = vadd.f32 %v1010_v8, %v653_v1 }
 0x103   :  { %v654_v21 = vadd.f32 %v635_v17, %v497_v16 }
 0x104   :  { %v1353_v15 = vpack.c.bf16 %v1031_v11, %v1030_v10  ;;  %v1101_v34 = vmul.f32 %v1031_v11, %v1031_v11  ;;  %v1078_v37 = vadd.f32 %v1077_v33, %v1031_v11 }
 0x106   :  { %1365 = vst [vmem:[%s1833_s2 + $0x30] sm:$0xff] %v1353_v15   ;;  %v1116_v41 = vadd.f32 %v1115_v36, %v1101_v34 }
 0x108   :  { %v379_v23 = vpop.f32.mrf.mxu0 }
 0x109   :  { %v1013_v22 = vpop.f32.mrf.mxu3  ;;  %v499_v30 = vadd.f32 %v498_v26, %v379_v23 }
 0x10a   :  { %v1032_v29 = vadd.f32 %v1013_v22, %v654_v21 }
 0x10b   :  { %v655_v32 = vadd.f32 %v637_v35, %v499_v30 }
 0x10c   :  { %v1102_v39 = vmul.f32 %v1032_v29, %v1032_v29  ;;  %v1079_v42 = vadd.f32 %v1078_v37, %v1032_v29 }
 0x10e   :  { %v1117_v44 = vadd.f32 %v1116_v41, %v1102_v39 }
 0x111   :  { %v1015_v40 = vpop.f32.mrf.mxu3 }
 0x112   :  { %v1033_v43 = vadd.f32 %v1015_v40, %v655_v32 }
 0x114   :  { %v1358_v45 = vpack.c.bf16 %v1033_v43, %v1032_v29  ;;  %v1080_v46 = vadd.f32 %v1079_v42, %v1033_v43  ;;  %v1103_v47 = vmul.f32 %v1033_v43, %v1033_v43 }
 0x116   :  { %1366 = vst [vmem:[%s1833_s2 + $0x38] sm:$0xff] %v1358_v45   ;;  %v1081_v48 = vrot.slane %v1080_v46, 4  ;;  %v1118_v49 = vadd.f32 %v1117_v44, %v1103_v47 }
 0x118   :  { %v1082_v50 = vadd.f32 %v1081_v48, %v1080_v46  ;;  %v1119_v51 = vrot.slane %v1118_v49, 4 }
 0x11a   :  { %v1083_v52 = vrot.slane %v1082_v50, 2  ;;  %v1120_v54 = vadd.f32 %v1119_v51, %v1118_v49 }
 0x11c   :  { %v1084_v55 = vadd.f32 %v1083_v52, %v1082_v50  ;;  %v1121_v57 = vrot.slane %v1120_v54, 2 }
 0x11e   :  { %v1085_v58 = vrot.slane %v1084_v55, 1  ;;  %v1122_v59 = vadd.f32 %v1121_v57, %v1120_v54 }
 0x120   :  { %v1086_v60 = vadd.f32 %v1085_v58, %v1084_v55  ;;  %v1123_v61 = vrot.slane %v1122_v59, 1 }
 0x122   :  { %1087 = vst [vmem:[%s1834_s3] sm:$0x1] %v1086_v60  ;;  %v1124_v62 = vadd.f32 %v1123_v61, %v1122_v59 }
 0x124   :  { %1125 = vst [vmem:[%s1834_s3 + $0x1] sm:$0x1] %v1124_v62 }

// kernel: basic_block_forward.7
= control target key start
LH: loop header
LB: loop body
LE: loop exit
PB: predicated region body
PF: predicated region fallthrough
CT: control target
= control target key end

     0   :  { %s320_s0 = inlined_call_operand.vmem [shape: bf16[2,8,8,128], index: 0, kind: input, shape index: {}, may-alias: {0,3}]   ;;  %s321_s1 = inlined_call_operand.vmem [shape: f32[1,1,1,128], index: 1, kind: input, shape index: {}]   ;;  %s322_s2 = inlined_call_operand.vmem [shape: f32[1,1,1,128], index: 2, kind: input, shape index: {}]   ;;  %s323_s3 = inlined_call_operand.vmem [shape: bf16[2,8,8,128], index: 3, kind: output, shape index: {}, may-alias: {0,3}]  }
   0x1   :  { %v123_v0 = vld [vmem:[%s320_s0] sm:$0xff]   ;;  %v194_v5 = vld [vmem:[%s320_s0 + $0x8] sm:$0xff]   ;;  %v195_v8 = vld [vmem:[%s320_s0 + $0x10] sm:$0xff]  }
   0x2   :  { %v236_v1 = vld [vmem:[%s321_s1] ss:$0 sm:$0xff]  ;;  %v124_v2 = vunpack.c.l.bf16 %v123_v0  ;;  %v125_v3 = vunpack.c.h.bf16 %v123_v0  ;;  %v128_v6 = vunpack.c.l.bf16 %v194_v5  ;;  %v129_v7 = vunpack.c.h.bf16 %v194_v5  ;;  %v196_v9 = vld [vmem:[%s320_s0 + $0x18] sm:$0xff]   ;;  %v198_v27 = vld [vmem:[%s320_s0 + $0x28] sm:$0xff]  }
   0x3   :  { %v241_v4 = vld [vmem:[%s322_s2] ss:$0 sm:$0xff]  ;;  %v132_v12 = vunpack.c.l.bf16 %v195_v8  ;;  %v133_v13 = vunpack.c.h.bf16 %v195_v8  ;;  %v136_v16 = vunpack.c.l.bf16 %v196_v9  ;;  %v137_v17 = vunpack.c.h.bf16 %v196_v9  ;;  %v199_v32 = vld [vmem:[%s320_s0 + $0x30] sm:$0xff]   ;;  %v200_v37 = vld [vmem:[%s320_s0 + $0x38] sm:$0xff]  }
   0x4   :  { %v50_v10 = vmul.f32 %v236_v1, %v124_v2  ;;  %v51_v11 = vmul.f32 %v236_v1, %v125_v3  ;;  %v52_v14 = vmul.f32 %v236_v1, %v128_v6  ;;  %v53_v15 = vmul.f32 %v236_v1, %v129_v7  ;;  %v197_v18 = vld [vmem:[%s320_s0 + $0x20] sm:$0xff]  }
   0x5   :  { %v54_v21 = vmul.f32 %v236_v1, %v132_v12  ;;  %v55_v22 = vmul.f32 %v236_v1, %v133_v13  ;;  %v56_v25 = vmul.f32 %v236_v1, %v136_v16  ;;  %v57_v26 = vmul.f32 %v236_v1, %v137_v17 }
   0x6   :  { %v70_v19 = vadd.f32 %v241_v4, %v50_v10  ;;  %v71_v20 = vadd.f32 %v241_v4, %v51_v11  ;;  %v72_v23 = vadd.f32 %v241_v4, %v52_v14  ;;  %v73_v24 = vadd.f32 %v241_v4, %v53_v15 }
   0x7   :  { %v74_v29 = vadd.f32 %v241_v4, %v54_v21  ;;  %v75_v30 = vadd.f32 %v241_v4, %v55_v22  ;;  %v140_v31 = vunpack.c.l.bf16 %v197_v18  ;;  %v76_v34 = vadd.f32 %v241_v4, %v56_v25 }
   0x8   :  { %v157_v28 = vpack.c.bf16 %v71_v20, %v70_v19  ;;  %v162_v33 = vpack.c.bf16 %v73_v24, %v72_v23  ;;  %v77_v35 = vadd.f32 %v241_v4, %v57_v26  ;;  %v141_v36 = vunpack.c.h.bf16 %v197_v18 }
   0x9   :  { %v167_v38 = vpack.c.bf16 %v75_v30, %v74_v29  ;;  %v58_v39 = vmul.f32 %v236_v1, %v140_v31  ;;  %v144_v40 = vunpack.c.l.bf16 %v198_v27  ;;  %v145_v41 = vunpack.c.h.bf16 %v198_v27 }
   0xa   :  { %158 = vst [vmem:[%s323_s3] sm:$0xff] %v157_v28   ;;  %v172_v42 = vpack.c.bf16 %v77_v35, %v76_v34  ;;  %v59_v43 = vmul.f32 %v236_v1, %v141_v36  ;;  %v148_v44 = vunpack.c.l.bf16 %v199_v32  ;;  %v149_v45 = vunpack.c.h.bf16 %v199_v32 }
   0xb   :  { %201 = vst [vmem:[%s323_s3 + $0x8] sm:$0xff] %v162_v33   ;;  %v78_v46 = vadd.f32 %v241_v4, %v58_v39  ;;  %v60_v47 = vmul.f32 %v236_v1, %v144_v40  ;;  %v61_v48 = vmul.f32 %v236_v1, %v145_v41  ;;  %v152_v49 = vunpack.c.l.bf16 %v200_v37 }
   0xc   :  { %202 = vst [vmem:[%s323_s3 + $0x10] sm:$0xff] %v167_v38   ;;  %v79_v50 = vadd.f32 %v241_v4, %v59_v43  ;;  %v62_v51 = vmul.f32 %v236_v1, %v148_v44  ;;  %v63_v52 = vmul.f32 %v236_v1, %v149_v45  ;;  %v153_v53 = vunpack.c.h.bf16 %v200_v37 }
   0xd   :  { %203 = vst [vmem:[%s323_s3 + $0x18] sm:$0xff] %v172_v42   ;;  %v80_v54 = vadd.f32 %v241_v4, %v60_v47  ;;  %v81_v55 = vadd.f32 %v241_v4, %v61_v48  ;;  %v64_v56 = vmul.f32 %v236_v1, %v152_v49 }
   0xe   :  { %v177_v57 = vpack.c.bf16 %v79_v50, %v78_v46  ;;  %v82_v58 = vadd.f32 %v241_v4, %v62_v51  ;;  %v83_v59 = vadd.f32 %v241_v4, %v63_v52  ;;  %v65_v60 = vmul.f32 %v236_v1, %v153_v53 }
   0xf   :  { %v182_v61 = vpack.c.bf16 %v81_v55, %v80_v54  ;;  %v84_v62 = vadd.f32 %v241_v4, %v64_v56 }
  0x10   :  { %204 = vst [vmem:[%s323_s3 + $0x20] sm:$0xff] %v177_v57   ;;  %v187_v63 = vpack.c.bf16 %v83_v59, %v82_v58  ;;  %v85_v0 = vadd.f32 %v241_v4, %v65_v60 }
  0x11   :  { %205 = vst [vmem:[%s323_s3 + $0x28] sm:$0xff] %v182_v61  }
  0x12   :  { %206 = vst [vmem:[%s323_s3 + $0x30] sm:$0xff] %v187_v63   ;;  %v192_v2 = vpack.c.bf16 %v85_v0, %v84_v62 }
  0x14   :  { %207 = vst [vmem:[%s323_s3 + $0x38] sm:$0xff] %v192_v2  }

// kernel: basic_block_forward.6
= control target key start
LH: loop header
LB: loop body
LE: loop exit
PB: predicated region body
PF: predicated region fallthrough
CT: control target
= control target key end

     0   :  { %vm96_vm0 = vcmask 1041408   ;;  %vm71_vm1 = vcmask 31744   ;;  %s438_s1 = inlined_call_operand.vmem [shape: bf16[1,4,128], index: 1, kind: input, shape index: {}]   ;;  %s439_s0 = inlined_call_operand.vmem [shape: bf16[2,8,8,4], index: 0, kind: input, shape index: {}]   ;;  %s440_s2 = inlined_call_operand.vmem [shape: bf16[2,8,8,128], index: 2, kind: output, shape index: {0}]   ;;  %s441_s3 = inlined_call_operand.vmem [shape: f32[1,2,128], index: 3, kind: output, shape index: {1}]  }
   0x1   :  { %v30_v0 = vld [vmem:[%s438_s1] sm:$0x3]  ;;  %v291_v3 = vld [vmem:[%s439_s0 + $0x10] sm:$0xff]  ;;  %v290_v6 = vld [vmem:[%s439_s0 + $0x8] sm:$0xff] }
   0x2   :  { %v98_v1 = vsel %vm96_vm0, %v30_v0, 0  ;;  %v289_v2 = vld [vmem:[%s439_s0] sm:$0xff]  ;;  %v295_v5 = vld [vmem:[%s439_s0 + $0x30] sm:$0xff]  ;;  %v292_v7 = vld [vmem:[%s439_s0 + $0x18] sm:$0xff] }
   0x3   :  { %107 = vmatpush.bf16.msra.mxu0 %v98_v1  ;;  %344 = vmatpush.bf16.msra.mxu1 %v98_v1  ;;  %v293_v4 = vld [vmem:[%s439_s0 + $0x20] sm:$0xff]  ;;  %v294_v8 = vld [vmem:[%s439_s0 + $0x28] sm:$0xff]  ;;  %v296_v9 = vld [vmem:[%s439_s0 + $0x38] sm:$0xff] }
   0x4   :  { %345 = vmatpush.bf16.msra.mxu2 %v98_v1  ;;  %346 = vmatpush.bf16.msra.mxu3 %v98_v1 }
   0x6   :  { %281 = vmatmul.msk.bf16.vlgmr.msra.gmra.mxu0 %vm71_vm1, %v289_v2  ;;  %283 = vmatmul.msk.bf16.vlgmr.msra.gmra.mxu1 %vm71_vm1, %v291_v3 }
   0x7   :  { %285 = vmatmul.msk.bf16.vlgmr.msra.gmra.mxu2 %vm71_vm1, %v293_v4  ;;  %287 = vmatmul.msk.bf16.vlgmr.msra.gmra.mxu3 %vm71_vm1, %v295_v5 }
  0x16   :  { %282 = vmatmul.msk.bf16.gmra.mxu0 %vm71_vm1, %v290_v6  ;;  %284 = vmatmul.msk.bf16.gmra.mxu1 %vm71_vm1, %v292_v7 }
  0x17   :  { %286 = vmatmul.msk.bf16.gmra.mxu2 %vm71_vm1, %v294_v8  ;;  %288 = vmatmul.msk.bf16.gmra.mxu3 %vm71_vm1, %v296_v9 }
  0x83   :  { %v109_v10 = vpop.f32.mrf.mxu0  ;;  %v119_v11 = vpop.f32.mrf.mxu1 }
  0x84   :  { %v203_v25 = vmul.f32 %v109_v10, %v109_v10  ;;  %v207_v39 = vmul.f32 %v119_v11, %v119_v11 }
  0x8a   :  { %v129_v12 = vpop.f32.mrf.mxu2  ;;  %v402_v13 = vpop.f32.mrf.mxu3 }
  0x8b   :  { %v111_v14 = vpop.f32.mrf.mxu0  ;;  %v121_v15 = vpop.f32.mrf.mxu1  ;;  %v211_v55 = vmul.f32 %v129_v12, %v129_v12  ;;  %v215_v3 = vmul.f32 %v402_v13, %v402_v13 }
  0x8c   :  { %v300_v16 = vpack.c.bf16 %v111_v14, %v109_v10  ;;  %v310_v17 = vpack.c.bf16 %v121_v15, %v119_v11  ;;  %v204_v24 = vmul.f32 %v111_v14, %v111_v14  ;;  %v181_v27 = vadd.f32 %v111_v14, %v109_v10 }
  0x8d   :  { %v208_v42 = vmul.f32 %v121_v15, %v121_v15 }
  0x8e   :  { %301 = vst [vmem:[%s440_s2] sm:$0xff] %v300_v16   ;;  %v219_v28 = vadd.f32 %v204_v24, %v203_v25 }
  0x8f   :  { %338 = vst [vmem:[%s440_s2 + $0x10] sm:$0xff] %v310_v17  }
  0x92   :  { %v131_v18 = vpop.f32.mrf.mxu2  ;;  %v141_v19 = vpop.f32.mrf.mxu3 }
  0x93   :  { %v114_v20 = vpop.f32.mrf.mxu0  ;;  %v124_v21 = vpop.f32.mrf.mxu1  ;;  %v320_v22 = vpack.c.bf16 %v131_v18, %v129_v12  ;;  %v330_v23 = vpack.c.bf16 %v141_v19, %v402_v13  ;;  %v212_v58 = vmul.f32 %v131_v18, %v131_v18  ;;  %v216_v6 = vmul.f32 %v141_v19, %v141_v19 }
  0x94   :  { %v205_v26 = vmul.f32 %v114_v20, %v114_v20  ;;  %v182_v29 = vadd.f32 %v181_v27, %v114_v20  ;;  %v209_v45 = vmul.f32 %v124_v21, %v124_v21 }
  0x95   :  { %340 = vst [vmem:[%s440_s2 + $0x20] sm:$0xff] %v320_v22  }
  0x96   :  { %342 = vst [vmem:[%s440_s2 + $0x30] sm:$0xff] %v330_v23   ;;  %v220_v32 = vadd.f32 %v219_v28, %v205_v26 }
  0x9a   :  { %v134_v30 = vpop.f32.mrf.mxu2  ;;  %v144_v31 = vpop.f32.mrf.mxu3 }
  0x9b   :  { %v116_v33 = vpop.f32.mrf.mxu0  ;;  %v126_v34 = vpop.f32.mrf.mxu1  ;;  %v213_v62 = vmul.f32 %v134_v30, %v134_v30  ;;  %v217_v10 = vmul.f32 %v144_v31, %v144_v31 }
  0x9c   :  { %v305_v35 = vpack.c.bf16 %v116_v33, %v114_v20  ;;  %v183_v36 = vadd.f32 %v182_v29, %v116_v33  ;;  %v206_v37 = vmul.f32 %v116_v33, %v116_v33  ;;  %v315_v38 = vpack.c.bf16 %v126_v34, %v124_v21 }
  0x9d   :  { %v210_v53 = vmul.f32 %v126_v34, %v126_v34 }
  0x9e   :  { %337 = vst [vmem:[%s440_s2 + $0x8] sm:$0xff] %v305_v35   ;;  %v184_v40 = vadd.f32 %v183_v36, %v119_v11  ;;  %v221_v41 = vadd.f32 %v220_v32, %v206_v37 }
  0x9f   :  { %339 = vst [vmem:[%s440_s2 + $0x18] sm:$0xff] %v315_v38  }
  0xa0   :  { %v222_v43 = vadd.f32 %v221_v41, %v207_v39  ;;  %v185_v44 = vadd.f32 %v184_v40, %v121_v15 }
  0xa2   :  { %v186_v46 = vadd.f32 %v185_v44, %v124_v21  ;;  %v223_v47 = vadd.f32 %v222_v43, %v208_v42  ;;  %v136_v48 = vpop.f32.mrf.mxu2  ;;  %v146_v49 = vpop.f32.mrf.mxu3 }
  0xa3   :  { %v325_v50 = vpack.c.bf16 %v136_v48, %v134_v30  ;;  %v335_v51 = vpack.c.bf16 %v146_v49, %v144_v31  ;;  %v214_v2 = vmul.f32 %v136_v48, %v136_v48  ;;  %v218_v15 = vmul.f32 %v146_v49, %v146_v49 }
  0xa4   :  { %v187_v52 = vadd.f32 %v186_v46, %v126_v34  ;;  %v224_v54 = vadd.f32 %v223_v47, %v209_v45 }
  0xa5   :  { %341 = vst [vmem:[%s440_s2 + $0x28] sm:$0xff] %v325_v50  }
  0xa6   :  { %v188_v56 = vadd.f32 %v187_v52, %v129_v12  ;;  %v225_v57 = vadd.f32 %v224_v54, %v210_v53  ;;  %343 = vst [vmem:[%s440_s2 + $0x38] sm:$0xff] %v335_v51  }
  0xa8   :  { %v226_v59 = vadd.f32 %v225_v57, %v211_v55  ;;  %v189_v60 = vadd.f32 %v188_v56, %v131_v18 }
  0xaa   :  { %v190_v61 = vadd.f32 %v189_v60, %v134_v30  ;;  %v227_v63 = vadd.f32 %v226_v59, %v212_v58 }
  0xac   :  { %v228_v0 = vadd.f32 %v227_v63, %v213_v62  ;;  %v191_v1 = vadd.f32 %v190_v61, %v136_v48 }
  0xae   :  { %v192_v4 = vadd.f32 %v191_v1, %v402_v13  ;;  %v229_v5 = vadd.f32 %v228_v0, %v214_v2 }
  0xb0   :  { %v230_v7 = vadd.f32 %v229_v5, %v215_v3  ;;  %v193_v8 = vadd.f32 %v192_v4, %v141_v19 }
  0xb2   :  { %v194_v9 = vadd.f32 %v193_v8, %v144_v31  ;;  %v231_v11 = vadd.f32 %v230_v7, %v216_v6 }
  0xb4   :  { %v232_v12 = vadd.f32 %v231_v11, %v217_v10  ;;  %v195_v14 = vadd.f32 %v194_v9, %v146_v49 }
  0xb6   :  { %v196_v16 = vrot.slane %v195_v14, 4  ;;  %v233_v17 = vadd.f32 %v232_v12, %v218_v15 }
  0xb8   :  { %v197_v18 = vadd.f32 %v196_v16, %v195_v14  ;;  %v234_v20 = vrot.slane %v233_v17, 4 }
  0xba   :  { %v198_v21 = vrot.slane %v197_v18, 2  ;;  %v235_v22 = vadd.f32 %v234_v20, %v233_v17 }
  0xbc   :  { %v199_v23 = vadd.f32 %v198_v21, %v197_v18  ;;  %v236_v24 = vrot.slane %v235_v22, 2 }
  0xbe   :  { %v200_v25 = vrot.slane %v199_v23, 1  ;;  %v237_v13 = vadd.f32 %v236_v24, %v235_v22 }
  0xc0   :  { %v201_v26 = vadd.f32 %v200_v25, %v199_v23  ;;  %v238_v27 = vrot.slane %v237_v13, 1 }
  0xc2   :  { %202 = vst [vmem:[%s441_s3] sm:$0x1] %v201_v26  ;;  %v239_v19 = vadd.f32 %v238_v27, %v237_v13 }
  0xc4   :  { %240 = vst [vmem:[%s441_s3 + $0x1] sm:$0x1] %v239_v19 }

// kernel: basic_block_forward.11
= control target key start
LH: loop header
LB: loop body
LE: loop exit
PB: predicated region body
PF: predicated region fallthrough
CT: control target
= control target key end

     0   :  { %s416_s0 = inlined_call_operand.vmem [shape: bf16[2,8,8,128], index: 0, kind: input, shape index: {}]   ;;  %s417_s1 = inlined_call_operand.vmem [shape: f32[1,1,1,128], index: 1, kind: input, shape index: {}]   ;;  %s418_s2 = inlined_call_operand.vmem [shape: f32[1,1,1,128], index: 2, kind: input, shape index: {}]   ;;  %s419_s3 = inlined_call_operand.vmem [shape: bf16[2,8,8,128], index: 3, kind: input, shape index: {}]   ;;  %s420_s4 = inlined_call_operand.vmem [shape: f32[2,8,8,128], index: 4, kind: output, shape index: {}]  }
   0x1   :  { %v174_v0 = vld [vmem:[%s416_s0] sm:$0xff]   ;;  %v237_v8 = vld [vmem:[%s416_s0 + $0x8] sm:$0xff]   ;;  %v238_v10 = vld [vmem:[%s416_s0 + $0x10] sm:$0xff]  }
   0x2   :  { %v284_v1 = vld [vmem:[%s417_s1] ss:$0 sm:$0xff]  ;;  %v175_v2 = vunpack.c.l.bf16 %v174_v0  ;;  %v176_v5 = vunpack.c.h.bf16 %v174_v0  ;;  %v244_v9 = vld [vmem:[%s419_s3 + $0x8] sm:$0xff]   ;;  %v179_v13 = vunpack.c.l.bf16 %v237_v8  ;;  %v245_v15 = vld [vmem:[%s419_s3 + $0x10] sm:$0xff]   ;;  %v180_v17 = vunpack.c.h.bf16 %v237_v8 }
   0x3   :  { %v289_v3 = vld [vmem:[%s418_s2] ss:$0 sm:$0xff]  ;;  %v211_v14 = vunpack.c.l.bf16 %v244_v9  ;;  %v239_v16 = vld [vmem:[%s416_s0 + $0x18] sm:$0xff]   ;;  %v212_v18 = vunpack.c.h.bf16 %v244_v9  ;;  %v183_v19 = vunpack.c.l.bf16 %v238_v10  ;;  %v215_v20 = vunpack.c.l.bf16 %v245_v15  ;;  %v241_v52 = vld [vmem:[%s416_s0 + $0x28] sm:$0xff]  }
   0x4   :  { %v206_v4 = vld [vmem:[%s419_s3] sm:$0xff]   ;;  %v53_v11 = vmul.f32 %v284_v1, %v175_v2  ;;  %v54_v12 = vmul.f32 %v284_v1, %v176_v5  ;;  %v55_v23 = vmul.f32 %v284_v1, %v179_v13  ;;  %v184_v24 = vunpack.c.h.bf16 %v238_v10  ;;  %v246_v25 = vld [vmem:[%s419_s3 + $0x18] sm:$0xff]   ;;  %v248_v57 = vld [vmem:[%s419_s3 + $0x28] sm:$0xff]  }
   0x5   :  { %v207_v6 = vunpack.c.l.bf16 %v206_v4  ;;  %v208_v7 = vunpack.c.h.bf16 %v206_v4  ;;  %v56_v26 = vmul.f32 %v284_v1, %v180_v17  ;;  %v57_v27 = vmul.f32 %v284_v1, %v183_v19  ;;  %v240_v38 = vld [vmem:[%s416_s0 + $0x20] sm:$0xff]   ;;  %v242_v62 = vld [vmem:[%s416_s0 + $0x30] sm:$0xff]  }
   0x6   :  { %v73_v21 = vadd.f32 %v289_v3, %v53_v11  ;;  %v74_v22 = vadd.f32 %v289_v3, %v54_v12  ;;  %v216_v28 = vunpack.c.h.bf16 %v245_v15  ;;  %v187_v29 = vunpack.c.l.bf16 %v239_v16  ;;  %v247_v47 = vld [vmem:[%s419_s3 + $0x20] sm:$0xff]   ;;  %v249_v5 = vld [vmem:[%s419_s3 + $0x30] sm:$0xff]  }
   0x7   :  { %v75_v32 = vadd.f32 %v289_v3, %v55_v23  ;;  %v58_v33 = vmul.f32 %v284_v1, %v184_v24  ;;  %v76_v34 = vadd.f32 %v289_v3, %v56_v26  ;;  %v77_v35 = vadd.f32 %v289_v3, %v57_v27  ;;  %v250_v23 = vld [vmem:[%s419_s3 + $0x38] sm:$0xff]  }
   0x8   :  { %v121_v30 = vadd.f32 %v207_v6, %v73_v21  ;;  %v122_v31 = vadd.f32 %v208_v7, %v74_v22  ;;  %v59_v36 = vmul.f32 %v284_v1, %v187_v29  ;;  %v219_v37 = vunpack.c.l.bf16 %v246_v25 }
   0x9   :  { %v123_v41 = vadd.f32 %v211_v14, %v75_v32  ;;  %v78_v42 = vadd.f32 %v289_v3, %v58_v33  ;;  %v124_v43 = vadd.f32 %v212_v18, %v76_v34  ;;  %v125_v44 = vadd.f32 %v215_v20, %v77_v35  ;;  %v243_v18 = vld [vmem:[%s416_s0 + $0x38] sm:$0xff]  }
   0xa   :  { %v137_v39 = vmax.f32 %v121_v30, 0.0  ;;  %v138_v40 = vmax.f32 %v122_v31, 0.0  ;;  %v79_v45 = vadd.f32 %v289_v3, %v59_v36  ;;  %v188_v46 = vunpack.c.h.bf16 %v239_v16 }
   0xb   :  { %v139_v48 = vmax.f32 %v123_v41, 0.0  ;;  %v126_v49 = vadd.f32 %v216_v28, %v78_v42  ;;  %v220_v50 = vunpack.c.h.bf16 %v246_v25  ;;  %v191_v51 = vunpack.c.l.bf16 %v240_v38 }
   0xc   :  { %153 = vst [vmem:[%s420_s4] sm:$0xff] %v137_v39  ;;  %v140_v53 = vmax.f32 %v124_v43, 0.0  ;;  %v141_v54 = vmax.f32 %v125_v44, 0.0  ;;  %v127_v55 = vadd.f32 %v219_v37, %v79_v45  ;;  %v60_v56 = vmul.f32 %v284_v1, %v188_v46 }
   0xd   :  { %154 = vst [vmem:[%s420_s4 + $0x8] sm:$0xff] %v138_v40  ;;  %v142_v58 = vmax.f32 %v126_v49, 0.0  ;;  %v61_v59 = vmul.f32 %v284_v1, %v191_v51  ;;  %v223_v60 = vunpack.c.l.bf16 %v247_v47  ;;  %v192_v61 = vunpack.c.h.bf16 %v240_v38 }
   0xe   :  { %155 = vst [vmem:[%s420_s4 + $0x10] sm:$0xff] %v139_v48  ;;  %v143_v63 = vmax.f32 %v127_v55, 0.0  ;;  %v80_v0 = vadd.f32 %v289_v3, %v60_v56  ;;  %v224_v2 = vunpack.c.h.bf16 %v247_v47  ;;  %v195_v4 = vunpack.c.l.bf16 %v241_v52 }
   0xf   :  { %156 = vst [vmem:[%s420_s4 + $0x18] sm:$0xff] %v140_v53  ;;  %v81_v6 = vadd.f32 %v289_v3, %v61_v59  ;;  %v62_v7 = vmul.f32 %v284_v1, %v192_v61  ;;  %v227_v8 = vunpack.c.l.bf16 %v248_v57  ;;  %v196_v9 = vunpack.c.h.bf16 %v241_v52 }
  0x10   :  { %157 = vst [vmem:[%s420_s4 + $0x20] sm:$0xff] %v141_v54  ;;  %v128_v10 = vadd.f32 %v220_v50, %v80_v0  ;;  %v63_v11 = vmul.f32 %v284_v1, %v195_v4  ;;  %v228_v12 = vunpack.c.h.bf16 %v248_v57  ;;  %v199_v13 = vunpack.c.l.bf16 %v242_v62 }
  0x11   :  { %158 = vst [vmem:[%s420_s4 + $0x28] sm:$0xff] %v142_v58  ;;  %v129_v14 = vadd.f32 %v223_v60, %v81_v6  ;;  %v82_v15 = vadd.f32 %v289_v3, %v62_v7  ;;  %v64_v16 = vmul.f32 %v284_v1, %v196_v9  ;;  %v231_v17 = vunpack.c.l.bf16 %v249_v5 }
  0x12   :  { %159 = vst [vmem:[%s420_s4 + $0x30] sm:$0xff] %v143_v63  ;;  %v144_v19 = vmax.f32 %v128_v10, 0.0  ;;  %v83_v20 = vadd.f32 %v289_v3, %v63_v11  ;;  %v65_v21 = vmul.f32 %v284_v1, %v199_v13  ;;  %v200_v22 = vunpack.c.h.bf16 %v242_v62 }
  0x13   :  { %v145_v24 = vmax.f32 %v129_v14, 0.0  ;;  %v130_v25 = vadd.f32 %v224_v2, %v82_v15  ;;  %v84_v26 = vadd.f32 %v289_v3, %v64_v16  ;;  %v232_v27 = vunpack.c.h.bf16 %v249_v5 }
  0x14   :  { %160 = vst [vmem:[%s420_s4 + $0x38] sm:$0xff] %v144_v19  ;;  %v131_v28 = vadd.f32 %v227_v8, %v83_v20  ;;  %v85_v29 = vadd.f32 %v289_v3, %v65_v21  ;;  %v66_v30 = vmul.f32 %v284_v1, %v200_v22  ;;  %v203_v31 = vunpack.c.l.bf16 %v243_v18 }
  0x15   :  { %161 = vst [vmem:[%s420_s4 + $0x40] sm:$0xff] %v145_v24  ;;  %v146_v32 = vmax.f32 %v130_v25, 0.0  ;;  %v132_v33 = vadd.f32 %v228_v12, %v84_v26  ;;  %v235_v34 = vunpack.c.l.bf16 %v250_v23  ;;  %v204_v35 = vunpack.c.h.bf16 %v243_v18 }
  0x16   :  { %v147_v36 = vmax.f32 %v131_v28, 0.0  ;;  %v133_v37 = vadd.f32 %v231_v17, %v85_v29  ;;  %v86_v38 = vadd.f32 %v289_v3, %v66_v30  ;;  %v67_v39 = vmul.f32 %v284_v1, %v203_v31 }
  0x17   :  { %162 = vst [vmem:[%s420_s4 + $0x48] sm:$0xff] %v146_v32  ;;  %v148_v40 = vmax.f32 %v132_v33, 0.0  ;;  %v68_v41 = vmul.f32 %v284_v1, %v204_v35  ;;  %v236_v42 = vunpack.c.h.bf16 %v250_v23 }
  0x18   :  { %163 = vst [vmem:[%s420_s4 + $0x50] sm:$0xff] %v147_v36  ;;  %v149_v43 = vmax.f32 %v133_v37, 0.0  ;;  %v134_v44 = vadd.f32 %v232_v27, %v86_v38  ;;  %v87_v45 = vadd.f32 %v289_v3, %v67_v39 }
  0x19   :  { %164 = vst [vmem:[%s420_s4 + $0x58] sm:$0xff] %v148_v40  ;;  %v88_v46 = vadd.f32 %v289_v3, %v68_v41 }
  0x1a   :  { %165 = vst [vmem:[%s420_s4 + $0x60] sm:$0xff] %v149_v43  ;;  %v150_v1 = vmax.f32 %v134_v44, 0.0  ;;  %v135_v47 = vadd.f32 %v235_v34, %v87_v45 }
  0x1b   :  { %v136_v48 = vadd.f32 %v236_v42, %v88_v46 }
  0x1c   :  { %166 = vst [vmem:[%s420_s4 + $0x68] sm:$0xff] %v150_v1  ;;  %v151_v49 = vmax.f32 %v135_v47, 0.0 }
  0x1d   :  { %v152_v50 = vmax.f32 %v136_v48, 0.0 }
  0x1e   :  { %167 = vst [vmem:[%s420_s4 + $0x70] sm:$0xff] %v151_v49 }
  0x1f   :  { %168 = vst [vmem:[%s420_s4 + $0x78] sm:$0xff] %v152_v50 }

// kernel: basic_block_forward.10
= control target key start
LH: loop header
LB: loop body
LE: loop exit
PB: predicated region body
PF: predicated region fallthrough
CT: control target
= control target key end

     0   :  { %vm61_vm0 = vsmask.f32 3328  ;;  %vm62_vm1 = vsmask.f32 7440  ;;  %vm627_vm3 = vcmask 1042432   ;;  %vm628_vm4 = vcmask 1046532   ;;  %s4946_s1 = inlined_call_operand.vmem [shape: bf16[9,128,128], index: 1, kind: input, shape index: {}]   ;;  %s4947_s0 = inlined_call_operand.vmem [shape: bf16[2,10,10,128], index: 0, kind: input, shape index: {}]   ;;  %s4948_s2 = inlined_call_operand.vmem [shape: bf16[2,8,8,128], index: 2, kind: output, shape index: {0}]   ;;  %s4949_s3 = inlined_call_operand.vmem [shape: f32[1,2,128], index: 3, kind: output, shape index: {1}]  }
   0x1   :  { %v3441_v0 = vld [vmem:[%s4946_s1 + $0x78] sm:$0xff]  ;;  %v3440_v1 = vld [vmem:[%s4946_s1 + $0x70] sm:$0xff]  ;;  %v17_v2 = vld [vmem:[%s4947_s0 + $0x20] sm:$0xf] }
   0x2   :  { %3561 = vmatpush.bf16.msra.mxu1 %v3441_v0  ;;  %3562 = vmatpush.bf16.msra.mxu2 %v3441_v0  ;;  %v18_v3 = vld [vmem:[%s4947_s0 + $0x28] sm:$0xf]  ;;  %v3632_v4 = vld [vmem:[%s4947_s0 + $0x24] sm:$0x1]  ;;  %v3637_v5 = vld [vmem:[%s4947_s0 + $0x2c] sm:$0x1] }
   0x3   :  { %3563 = vmatpush.bf16.msra.mxu3 %v3441_v0  ;;  %385 = vmatpush.bf16.msra.mxu0 %v3441_v0  ;;  %v3439_v6 = vld [vmem:[%s4946_s1 + $0x68] sm:$0xff]  ;;  %v121_v7 = vshrl.u32 %v17_v2, 16  ;;  %v124_v8 = vshll.u32 %v17_v2, 16  ;;  %v130_v9 = vshll.u32 %v3632_v4, 16  ;;  %v135_v10 = vshrl.u32 %v18_v3, 16  ;;  %vm3661_vm2 = vmor %vm61_vm0, %vm62_vm1  ;;  %v3438_v36 = vld [vmem:[%s4946_s1 + $0x60] sm:$0xff] }
   0x4   :  { %v21_v11 = vld [vmem:[%s4947_s0 + $0x50] sm:$0xf]  ;;  %v138_v12 = vshll.u32 %v18_v3, 16  ;;  %v144_v13 = vshll.u32 %v3637_v5, 16  ;;  %v22_v14 = vld [vmem:[%s4947_s0 + $0x58] sm:$0xf]  ;;  %vm3928_vm5 = vmor %vm627_vm3, %vm628_vm4 }
   0x5   :  { %v53_v15 = vld [vmem:[%s4947_s0 + $0x54] sm:$0x1]  ;;  %v123_v16 = vrot.slane %v121_v7, 4  ;;  %v126_v17 = vrot.slane %v124_v8, 5  ;;  %v132_v18 = vrot.slane %v130_v9, 5  ;;  %v137_v19 = vrot.slane %v135_v10, 4 }
   0x6   :  { %3564 = vmatpush.bf16.msra.mxu1 %v3440_v1  ;;  %3565 = vmatpush.bf16.msra.mxu2 %v3440_v1  ;;  %v54_v20 = vld [vmem:[%s4947_s0 + $0x5c] sm:$0x1]  ;;  %v140_v21 = vrot.slane %v138_v12, 5  ;;  %v146_v22 = vrot.slane %v144_v13, 5  ;;  %v177_v23 = vshrl.u32 %v21_v11, 16  ;;  %v180_v24 = vshll.u32 %v21_v11, 16 }
   0x7   :  { %3566 = vmatpush.bf16.msra.mxu3 %v3440_v1  ;;  %386 = vmatpush.bf16.msra.mxu0 %v3440_v1  ;;  %v127_v25 = vor.u32 %v126_v17, %v123_v16  ;;  %v186_v26 = vshll.u32 %v53_v15, 16  ;;  %v191_v27 = vshrl.u32 %v22_v14, 16  ;;  %v194_v28 = vshll.u32 %v22_v14, 16  ;;  %v25_v29 = vld [vmem:[%s4947_s0 + $0x70] sm:$0xf]  ;;  %v3437_v55 = vld [vmem:[%s4946_s1 + $0x58] sm:$0xff] }
   0x8   :  { %v141_v31 = vor.u32 %v140_v21, %v137_v19  ;;  %v179_v32 = vrot.slane %v177_v23, 4  ;;  %v182_v33 = vrot.slane %v180_v24, 5  ;;  %v200_v34 = vshll.u32 %v54_v20, 16  ;;  %v57_v35 = vld [vmem:[%s4947_s0 + $0x74] sm:$0x1] }
   0x9   :  { %v128_v37 = vrot.slane %v127_v25, 4  ;;  %v188_v38 = vrot.slane %v186_v26, 5  ;;  %v193_v39 = vrot.slane %v191_v27, 4  ;;  %v196_v40 = vrot.slane %v194_v28, 5  ;;  %v26_v47 = vld [vmem:[%s4947_s0 + $0x78] sm:$0xf] }
   0xa   :  { %3567 = vmatpush.bf16.msra.mxu1 %v3439_v6  ;;  %3568 = vmatpush.bf16.msra.mxu2 %v3439_v6  ;;  %v142_v41 = vrot.slane %v141_v31, 4  ;;  %v183_v42 = vor.u32 %v182_v33, %v179_v32  ;;  %v202_v43 = vrot.slane %v200_v34, 5  ;;  %v233_v44 = vshrl.u32 %v25_v29, 16  ;;  %v58_v48 = vld [vmem:[%s4947_s0 + $0x7c] sm:$0x1]  ;;  %v3436_v8 = vld [vmem:[%s4946_s1 + $0x50] sm:$0xff] }
   0xb   :  { %3569 = vmatpush.bf16.msra.mxu3 %v3439_v6  ;;  %387 = vmatpush.bf16.msra.mxu0 %v3439_v6  ;;  %v133_v45 = vsel %vm3661_vm2, %v128_v37, %v132_v18  ;;  %v197_v46 = vor.u32 %v196_v40, %v193_v39  ;;  %v236_v49 = vshll.u32 %v25_v29, 16  ;;  %v242_v50 = vshll.u32 %v57_v35, 16  ;;  %v13_v59 = vld [vmem:[%s4947_s0] sm:$0xf]  ;;  %v3696_v0 = vld [vmem:[%s4947_s0 + $0x4] sm:$0x1] }
   0xc   :  { %v147_v51 = vsel %vm3661_vm2, %v142_v41, %v146_v22  ;;  %v3681_v52 = vunpack.c.l.b16 %v133_v45  ;;  %v184_v53 = vrot.slane %v183_v42, 4  ;;  %v235_v54 = vrot.slane %v233_v44, 4  ;;  %v14_v7 = vld [vmem:[%s4947_s0 + $0x8] sm:$0xf]  ;;  %v3713_v14 = vld [vmem:[%s4947_s0 + $0xc] sm:$0x1] }
   0xd   :  { %v3686_v56 = vunpack.c.l.b16 %v147_v51  ;;  %v198_v57 = vrot.slane %v197_v46, 4  ;;  %v238_v58 = vrot.slane %v236_v49, 5  ;;  %v247_v61 = vshrl.u32 %v26_v47, 16  ;;  %v19_v22 = vld [vmem:[%s4947_s0 + $0x30] sm:$0xf]  ;;  %v3435_v34 = vld [vmem:[%s4946_s1 + $0x48] sm:$0xff] }
   0xe   :  { %3570 = vmatpush.bf16.msra.mxu1 %v3438_v36  ;;  %3571 = vmatpush.bf16.msra.mxu2 %v3438_v36  ;;  %v189_v60 = vsel %vm3661_vm2, %v184_v53, %v188_v38  ;;  %v250_v62 = vshll.u32 %v26_v47, 16  ;;  %v256_v63 = vshll.u32 %v58_v48, 16  ;;  %v244_v6 = vrot.slane %v242_v50, 5  ;;  %v20_v23 = vld [vmem:[%s4947_s0 + $0x38] sm:$0xf] }
   0xf   :  { %3572 = vmatpush.bf16.msra.mxu3 %v3438_v36  ;;  %388 = vmatpush.bf16.msra.mxu0 %v3438_v36  ;;  %v323_v1 = vpack.c.b16 %v3686_v56, %v3681_v52  ;;  %v203_v2 = vsel %vm3661_vm2, %v198_v57, %v202_v43  ;;  %v239_v3 = vor.u32 %v238_v58, %v235_v54  ;;  %v3708_v9 = vunpack.c.l.b16 %v189_v60  ;;  %v3729_v28 = vld [vmem:[%s4947_s0 + $0x34] sm:$0x1]  ;;  %v3742_v41 = vld [vmem:[%s4947_s0 + $0x3c] sm:$0x1]  ;;  %v23_v48 = vld [vmem:[%s4947_s0 + $0x60] sm:$0xf] }
  0x10   :  { %v249_v10 = vrot.slane %v247_v61, 4  ;;  %v252_v11 = vrot.slane %v250_v62, 5  ;;  %v258_v12 = vrot.slane %v256_v63, 5  ;;  %v65_v15 = vshrl.u32 %v13_v59, 16  ;;  %v24_v54 = vld [vmem:[%s4947_s0 + $0x68] sm:$0xf] }
  0x11   :  { %v240_v13 = vrot.slane %v239_v3, 4  ;;  %v68_v16 = vshll.u32 %v13_v59, 16  ;;  %v74_v17 = vshll.u32 %v3696_v0, 16  ;;  %v3716_v18 = vunpack.c.l.b16 %v203_v2  ;;  %v3766_v61 = vld [vmem:[%s4947_s0 + $0x64] sm:$0x1]  ;;  %v3472_v56 = vld [vmem:[%s4946_s1 + $0x130] sm:$0xff] }
  0x12   :  { %3573 = vmatpush.bf16.msra.mxu1 %v3437_v55  ;;  %3574 = vmatpush.bf16.msra.mxu2 %v3437_v55  ;;  %v253_v19 = vor.u32 %v252_v11, %v249_v10  ;;  %v79_v20 = vshrl.u32 %v14_v7, 16  ;;  %v82_v21 = vshll.u32 %v14_v7, 16  ;;  %v67_v25 = vrot.slane %v65_v15, 4  ;;  %v3449_v7 = vld [vmem:[%s4946_s1 + $0xb8] sm:$0xff]  ;;  %v3781_v11 = vld [vmem:[%s4947_s0 + $0x6c] sm:$0x1] }
  0x13   :  { %3575 = vmatpush.bf16.msra.mxu3 %v3437_v55  ;;  %389 = vmatpush.bf16.msra.mxu0 %v3437_v55  ;;  %v245_v24 = vsel %vm3661_vm2, %v240_v13, %v244_v6  ;;  %v70_v26 = vrot.slane %v68_v16, 5  ;;  %v76_v27 = vrot.slane %v74_v17, 5  ;;  %v88_v36 = vshll.u32 %v3713_v14, 16  ;;  %v3434_v55 = vld [vmem:[%s4946_s1 + $0x40] sm:$0xff]  ;;  %v3465_v13 = vld [vmem:[%s4946_s1 + $0xf8] sm:$0xff] }
  0x14   :  { %v254_v29 = vrot.slane %v253_v19, 4  ;;  %v3731_v31 = vunpack.c.l.b16 %v245_v24  ;;  %v81_v32 = vrot.slane %v79_v20, 4  ;;  %v84_v33 = vrot.slane %v82_v21, 5  ;;  %v59_v24 = vld [vmem:[%s4947_s0 + $0x84] sm:$0x1] }
  0x15   :  { %v71_v35 = vor.u32 %v70_v26, %v67_v25  ;;  %v149_v37 = vshrl.u32 %v19_v22, 16  ;;  %v152_v38 = vshll.u32 %v19_v22, 16  ;;  %v158_v42 = vshll.u32 %v3729_v28, 16  ;;  %v3473_v25 = vld [vmem:[%s4946_s1 + $0x138] sm:$0xff] }
  0x16   :  { %3576 = vmatpush.bf16.msra.mxu1 %v3436_v8  ;;  %3577 = vmatpush.bf16.msra.mxu2 %v3436_v8  ;;  %v259_v39 = vsel %vm3661_vm2, %v254_v29, %v258_v12  ;;  %v85_v40 = vor.u32 %v84_v33, %v81_v32  ;;  %v163_v43 = vshrl.u32 %v20_v23, 16  ;;  %v90_v46 = vrot.slane %v88_v36, 5  ;;  %v3448_v32 = vld [vmem:[%s4946_s1 + $0xb0] sm:$0xff] }
  0x17   :  { %3578 = vmatpush.bf16.msra.mxu3 %v3436_v8  ;;  %390 = vmatpush.bf16.msra.mxu0 %v3436_v8  ;;  %v3745_v44 = vunpack.c.l.b16 %v259_v39  ;;  %v72_v45 = vrot.slane %v71_v35, 4  ;;  %v151_v47 = vrot.slane %v149_v37, 4  ;;  %v325_v49 = vpack.c.b16 %v3716_v18, %v3708_v9  ;;  %v3433_v8 = vld [vmem:[%s4946_s1 + $0x38] sm:$0xff]  ;;  %v3432_v33 = vld [vmem:[%s4946_s1 + $0x30] sm:$0xff] }
  0x18   :  { %v86_v50 = vrot.slane %v85_v40, 4  ;;  %v154_v51 = vrot.slane %v152_v38, 5  ;;  %v3752_v53 = vrot.slane %v158_v42, 5  ;;  %v165_v58 = vrot.slane %v163_v43, 4  ;;  %v3464_v43 = vld [vmem:[%s4946_s1 + $0xf0] sm:$0xff] }
  0x19   :  { %v77_v57 = vsel %vm3661_vm2, %v72_v45, %v76_v27  ;;  %v166_v59 = vshll.u32 %v20_v23, 16  ;;  %v172_v60 = vshll.u32 %v3742_v41, 16  ;;  %v205_v3 = vshrl.u32 %v23_v48, 16  ;;  %v27_v23 = vld [vmem:[%s4947_s0 + $0x80] sm:$0xf] }
  0x1a   :  { %3579 = vmatpush.bf16.msra.mxu1 %v3435_v34  ;;  %3580 = vmatpush.bf16.msra.mxu2 %v3435_v34  ;;  %v91_v62 = vsel %vm3661_vm2, %v86_v50, %v90_v46  ;;  %v305_v63 = vunpack.c.l.b16 %v77_v57  ;;  %v155_v2 = vor.u32 %v154_v51, %v151_v47  ;;  %v327_v6 = vpack.c.b16 %v3745_v44, %v3731_v31  ;;  %v28_v31 = vld [vmem:[%s4947_s0 + $0x88] sm:$0xf]  ;;  %v60_v47 = vld [vmem:[%s4947_s0 + $0x8c] sm:$0x1]  ;;  %v15_v51 = vld [vmem:[%s4947_s0 + $0x10] sm:$0xf] }
  0x1b   :  { %3581 = vmatpush.bf16.msra.mxu3 %v3435_v34  ;;  %391 = vmatpush.bf16.msra.mxu0 %v3435_v34  ;;  %v306_v9 = vunpack.c.l.b16 %v91_v62  ;;  %v168_v10 = vrot.slane %v166_v59, 5  ;;  %v208_v12 = vshll.u32 %v23_v48, 16  ;;  %v207_v16 = vrot.slane %v205_v3, 4  ;;  %v3837_v59 = vld [vmem:[%s4947_s0 + $0x14] sm:$0x1] }
  0x1c   :  { %v156_v15 = vrot.slane %v155_v2, 4  ;;  %v214_v17 = vshll.u32 %v3766_v61, 16  ;;  %v219_v18 = vshrl.u32 %v24_v54, 16  ;;  %v222_v22 = vshll.u32 %v24_v54, 16  ;;  %v16_v3 = vld [vmem:[%s4947_s0 + $0x18] sm:$0xf] }
  0x1d   :  { %v321_v19 = vpack.c.b16 %v306_v9, %v305_v63  ;;  %v169_v20 = vor.u32 %v168_v10, %v165_v58  ;;  %v210_v21 = vrot.slane %v208_v12, 5  ;;  %v174_v26 = vrot.slane %v172_v60, 5  ;;  %v3463_v10 = vld [vmem:[%s4946_s1 + $0xe8] sm:$0xff] }
  0x1e   :  { %3582 = vmatpush.bf16.msra.mxu1 %v3434_v55  ;;  %3583 = vmatpush.bf16.msra.mxu2 %v3434_v55  ;;  %v221_v27 = vrot.slane %v219_v18, 4  ;;  %v228_v29 = vshll.u32 %v3781_v11, 16  ;;  %v161_v34 = vsel %vm3661_vm2, %v156_v15, %v3752_v53  ;;  %v224_v37 = vrot.slane %v222_v22, 5  ;;  %v3431_v53 = vld [vmem:[%s4946_s1 + $0x28] sm:$0xff] }
  0x1f   :  { %3584 = vmatpush.bf16.msra.mxu3 %v3434_v55  ;;  %392 = vmatpush.bf16.msra.mxu0 %v3434_v55  ;;  %v170_v35 = vrot.slane %v169_v20, 4  ;;  %v211_v36 = vor.u32 %v210_v21, %v207_v16  ;;  %v216_v38 = vrot.slane %v214_v17, 5  ;;  %v261_v39 = vshrl.u32 %v27_v23, 16  ;;  %v3471_v12 = vld [vmem:[%s4946_s1 + $0x128] sm:$0xff]  ;;  %v3864_v21 = vld [vmem:[%s4947_s0 + $0x1c] sm:$0x1] }
  0x20   :  { %v264_v40 = vshll.u32 %v27_v23, 16  ;;  %v270_v42 = vshll.u32 %v59_v24, 16  ;;  %v225_v45 = vor.u32 %v224_v37, %v221_v27  ;;  %v230_v46 = vrot.slane %v228_v29, 5 }
  0x21   :  { %403 = vmatmul.bf16.vlgmr.msra.gmra.mxu1 %v323_v1  ;;  %413 = vmatmul.bf16.vlgmr.msra.gmra.mxu2 %v325_v49  ;;  %v212_v44 = vrot.slane %v211_v36, 4  ;;  %v275_v52 = vshrl.u32 %v28_v31, 16  ;;  %v3447_v1 = vld [vmem:[%s4946_s1 + $0xa8] sm:$0xff]  ;;  %v3824_v48 = vunpack.c.l.b16 %v161_v34  ;;  %v263_v49 = vrot.slane %v261_v39, 4  ;;  %v3470_v36 = vld [vmem:[%s4946_s1 + $0x120] sm:$0xff] }
  0x22   :  { %791 = vmatpush.bf16.msrb.mxu2 %v3449_v7  ;;  %530 = vmatpush.bf16.msrb.mxu1 %v3433_v8  ;;  %v266_v50 = vrot.slane %v264_v40, 5  ;;  %v175_v54 = vsel %vm3661_vm2, %v170_v35, %v174_v26  ;;  %v226_v55 = vrot.slane %v225_v45, 4  ;;  %v278_v58 = vshll.u32 %v28_v31, 16  ;;  %v3462_v35 = vld [vmem:[%s4946_s1 + $0xe0] sm:$0xff] }
  0x23   :  { %423 = vmatmul.bf16.vlgmr.msra.gmra.mxu3 %v327_v6  ;;  %393 = vmatmul.bf16.vlgmr.msra.gmra.mxu0 %v321_v19  ;;  %v277_v57 = vrot.slane %v275_v52, 4  ;;  %v217_v60 = vsel %vm3661_vm2, %v212_v44, %v216_v38  ;;  %v272_v63 = vrot.slane %v270_v42, 5  ;;  %v284_v2 = vshll.u32 %v60_v47, 16  ;;  %v3430_v19 = vld [vmem:[%s4946_s1 + $0x20] sm:$0xff]  ;;  %v3429_v44 = vld [vmem:[%s4946_s1 + $0x18] sm:$0xff] }
  0x24   :  { %986 = vmatpush.bf16.msrb.mxu3 %v3465_v13  ;;  %1404 = vmatpush.bf16.msrb.mxu0 %v3473_v25  ;;  %v267_v62 = vor.u32 %v266_v50, %v263_v49  ;;  %v231_v6 = vsel %vm3661_vm2, %v226_v55, %v230_v46  ;;  %v280_v7 = vrot.slane %v278_v58, 5  ;;  %v93_v8 = vshrl.u32 %v15_v51, 16  ;;  %v3446_v13 = vld [vmem:[%s4946_s1 + $0xa0] sm:$0xff]  ;;  %v3002_v49 = vld [vmem:[%s4947_s0 + $0x8] sm:$0xf]  ;;  %v3461_v55 = vld [vmem:[%s4946_s1 + $0xd8] sm:$0xff] }
  0x25   :  { %v96_v9 = vshll.u32 %v15_v51, 16  ;;  %v3855_v15 = vunpack.c.l.b16 %v175_v54  ;;  %v286_v17 = vrot.slane %v284_v2, 5  ;;  %v102_v18 = vshll.u32 %v3837_v59, 16  ;;  %v579_v46 = vld [vmem:[%s4947_s0] sm:$0xe]  ;;  %v3469_v58 = vld [vmem:[%s4946_s1 + $0x118] sm:$0xff] }
  0x26   :  { %792 = vmatpush.bf16.msrb.mxu2 %v3448_v32  ;;  %531 = vmatpush.bf16.msrb.mxu1 %v3432_v33  ;;  %v268_v16 = vrot.slane %v267_v62, 4  ;;  %v281_v20 = vor.u32 %v280_v7, %v277_v57  ;;  %v95_v22 = vrot.slane %v93_v8, 4  ;;  %v107_v24 = vshrl.u32 %v16_v3, 16  ;;  %v3899_v51 = vld [vmem:[%s4947_s0 + $0xc] sm:$0x1] }
  0x27   :  { %v98_v23 = vrot.slane %v96_v9, 5  ;;  %v315_v25 = vunpack.c.l.b16 %v217_v60  ;;  %v316_v26 = vunpack.c.l.b16 %v231_v6  ;;  %v110_v29 = vshll.u32 %v16_v3, 16  ;;  %v3444_v60 = vld [vmem:[%s4946_s1 + $0x90] sm:$0xff] }
  0x28   :  { %987 = vmatpush.bf16.msrb.mxu3 %v3464_v43  ;;  %1405 = vmatpush.bf16.msrb.mxu0 %v3472_v56  ;;  %v273_v27 = vsel %vm3661_vm2, %v268_v16, %v272_v63  ;;  %v282_v31 = vrot.slane %v281_v20, 4  ;;  %v104_v33 = vrot.slane %v102_v18, 5  ;;  %v109_v34 = vrot.slane %v107_v24, 4  ;;  %v3445_v43 = vld [vmem:[%s4946_s1 + $0x98] sm:$0xff]  ;;  %v3428_v3 = vld [vmem:[%s4946_s1 + $0x10] sm:$0xff] }
  0x29   :  { %v99_v32 = vor.u32 %v98_v23, %v95_v22  ;;  %v319_v37 = vunpack.c.l.b16 %v273_v27  ;;  %v112_v38 = vrot.slane %v110_v29, 5  ;;  %v116_v39 = vshll.u32 %v3864_v21, 16  ;;  %v3920_v7 = vld [vmem:[%s4947_s0 + $0x14] sm:$0x1] }
  0x2a   :  { %793 = vmatpush.bf16.msrb.mxu2 %v3447_v1  ;;  %532 = vmatpush.bf16.msrb.mxu1 %v3431_v53  ;;  %v324_v40 = vpack.c.b16 %v3855_v15, %v3824_v48  ;;  %v287_v42 = vsel %vm3661_vm2, %v282_v31, %v286_v17  ;;  %v326_v47 = vpack.c.b16 %v316_v26, %v315_v25  ;;  %v580_v48 = vld [vmem:[%s4947_s0 + $0x8] sm:$0xe]  ;;  %v3004_v53 = vld [vmem:[%s4947_s0 + $0x10] sm:$0xf]  ;;  %v2842_v62 = vrot.slane %v579_v46, 9 }
  0x2b   :  { %v100_v45 = vrot.slane %v99_v32, 4  ;;  %v320_v52 = vunpack.c.l.b16 %v287_v42  ;;  %v113_v56 = vor.u32 %v112_v38, %v109_v34  ;;  %v118_v1 = vrot.slane %v116_v39, 5  ;;  %v3468_v20 = vld [vmem:[%s4946_s1 + $0x110] sm:$0xff]  ;;  %v3443_v25 = vld [vmem:[%s4946_s1 + $0x88] sm:$0xff]  ;;  %v3442_v39 = vld [vmem:[%s4946_s1 + $0x80] sm:$0xff] }
  0x2c   :  { %988 = vmatpush.bf16.msrb.mxu3 %v3463_v10  ;;  %1406 = vmatpush.bf16.msrb.mxu0 %v3471_v12  ;;  %v632_v63 = vrot.slane %v3696_v0, 5  ;;  %v2843_v6 = vrot.slane %v580_v48, 9  ;;  %v1084_v8 = vshrl.u32 %v3002_v49, 16  ;;  %v1087_v9 = vshll.u32 %v3002_v49, 16  ;;  %v3427_v26 = vld [vmem:[%s4946_s1 + $0x8] sm:$0xff]  ;;  %v3426_v42 = vld [vmem:[%s4946_s1] sm:$0xff] }
  0x2d   :  { %v105_v50 = vsel %vm3661_vm2, %v100_v45, %v104_v33  ;;  %v328_v54 = vpack.c.b16 %v320_v52, %v319_v37  ;;  %v114_v57 = vrot.slane %v113_v56, 4  ;;  %v636_v10 = vrot.slane %v3713_v14, 5  ;;  %v3460_v14 = vld [vmem:[%s4946_s1 + $0xd0] sm:$0xff]  ;;  %v3459_v37 = vld [vmem:[%s4946_s1 + $0xc8] sm:$0xff]  ;;  %v3008_v45 = vld [vmem:[%s4947_s0 + $0x20] sm:$0xf] }
  0x2e   :  { %794 = vmatpush.bf16.msrb.mxu2 %v3446_v13  ;;  %533 = vmatpush.bf16.msrb.mxu1 %v3430_v19  ;;  %v307_v2 = vunpack.c.l.b16 %v105_v50  ;;  %v1093_v12 = vshll.u32 %v3899_v51, 16  ;;  %v1098_v13 = vshrl.u32 %v3004_v53, 16  ;;  %v1086_v17 = vrot.slane %v1084_v8, 4  ;;  %v3467_v38 = vld [vmem:[%s4946_s1 + $0x108] sm:$0xff]  ;;  %v3497_v56 = vld [vmem:[%s4946_s1 + $0x1b8] sm:$0xff] }
  0x2f   :  { %v119_v0 = vsel %vm3661_vm2, %v114_v57, %v118_v1  ;;  %v1089_v18 = vrot.slane %v1087_v9, 5  ;;  %v1101_v19 = vshll.u32 %v3004_v53, 16  ;;  %v1107_v23 = vshll.u32 %v3920_v7, 16  ;;  %v3418_v46 = vld [vmem:[%s4947_s0 + $0x4] sm:$0xf0]  ;;  %v3481_v1 = vld [vmem:[%s4946_s1 + $0x178] sm:$0xff] }
  0x30   :  { %989 = vmatpush.bf16.msrb.mxu3 %v3462_v35  ;;  %1407 = vmatpush.bf16.msrb.mxu0 %v3470_v36  ;;  %v308_v15 = vunpack.c.l.b16 %v119_v0  ;;  %v1100_v22 = vrot.slane %v1098_v13, 4  ;;  %v633_v31 = vsel %vm3928_vm5, %v2842_v62, %v632_v63  ;;  %v637_v32 = vsel %vm3928_vm5, %v2843_v6, %v636_v10  ;;  %v3006_v36 = vld [vmem:[%s4947_s0 + $0x18] sm:$0xf]  ;;  %v2940_v49 = vld [vmem:[%s4947_s0 + $0x8] sm:$0xf] }
  0x31   :  { %408 = vmatmul.bf16.gmra.mxu1 %v324_v40  ;;  %418 = vmatmul.bf16.gmra.mxu2 %v326_v47  ;;  %v1090_v27 = vor.u32 %v1089_v18, %v1086_v17  ;;  %v1103_v29 = vrot.slane %v1101_v19, 5  ;;  %v1095_v34 = vrot.slane %v1093_v12, 5  ;;  %v1109_v40 = vrot.slane %v1107_v23, 5  ;;  %v3450_v50 = vld [vmem:[%s4947_s0 + $0xc] sm:$0xf0] }
  0x32   :  { %795 = vmatpush.bf16.msrb.mxu2 %v3445_v43  ;;  %534 = vmatpush.bf16.msrb.mxu1 %v3429_v44  ;;  %v322_v24 = vpack.c.b16 %v308_v15, %v307_v2  ;;  %v2780_v43 = vld [vmem:[%s4947_s0] sm:$0xf]  ;;  %v711_v47 = vunpack.c.l.b16 %v633_v31  ;;  %v712_v52 = vunpack.c.l.b16 %v637_v32  ;;  %v1112_v48 = vshrl.u32 %v3006_v36, 16  ;;  %v584_v8 = vld [vmem:[%s4947_s0 + $0x28] sm:$0xe]  ;;  %v3496_v18 = vld [vmem:[%s4946_s1 + $0x1b0] sm:$0xff] }
  0x33   :  { %428 = vmatmul.bf16.gmra.mxu3 %v328_v54  ;;  %v1091_v33 = vrot.slane %v1090_v27, 4  ;;  %v1104_v35 = vor.u32 %v1103_v29, %v1100_v22  ;;  %v3458_v54 = vld [vmem:[%s4946_s1 + $0xc0] sm:$0xff]  ;;  %v1126_v62 = vshrl.u32 %v3008_v45, 16  ;;  %v1129_v63 = vshll.u32 %v3008_v45, 16  ;;  %v581_v12 = vld [vmem:[%s4947_s0 + $0x10] sm:$0xe] }
  0x34   :  { %990 = vmatpush.bf16.msrb.mxu3 %v3461_v55  ;;  %1408 = vmatpush.bf16.msrb.mxu0 %v3469_v58  ;;  %v3466_v55 = vld [vmem:[%s4946_s1 + $0x100] sm:$0xff]  ;;  %v3505_v58 = vld [vmem:[%s4946_s1 + $0x1f8] sm:$0xff]  ;;  %v2781_v2 = vor.u32 %v3418_v46, %v2780_v43  ;;  %v727_v9 = vpack.c.b16 %v712_v52, %v711_v47  ;;  %v2941_v0 = vor.u32 %v3450_v50, %v2940_v49  ;;  %v1114_v15 = vrot.slane %v1112_v48, 4  ;;  %v3504_v32 = vld [vmem:[%s4946_s1 + $0x1f0] sm:$0xff] }
  0x35   :  { %398 = vmatmul.bf16.gmra.mxu0 %v322_v24  ;;  %v1105_v44 = vrot.slane %v1104_v35, 4  ;;  %v1096_v53 = vsel %vm3661_vm2, %v1091_v33, %v1095_v34  ;;  %v583_v6 = vld [vmem:[%s4947_s0 + $0x20] sm:$0xe]  ;;  %v582_v13 = vld [vmem:[%s4947_s0 + $0x18] sm:$0xe]  ;;  %v2847_v22 = vrot.slane %v584_v8, 9 }
  0x36   :  { %796 = vmatpush.bf16.msrb.mxu2 %v3444_v60  ;;  %535 = vmatpush.bf16.msrb.mxu1 %v3428_v3  ;;  %v1115_v60 = vshll.u32 %v3006_v36, 16  ;;  %v3513_v3 = vld [vmem:[%s4946_s1 + $0x238] sm:$0xff]  ;;  %v1324_v10 = vunpack.c.l.b16 %v1096_v53  ;;  %v1128_v24 = vrot.slane %v1126_v62, 4  ;;  %v652_v27 = vrot.slane %v3637_v5, 5  ;;  %v3512_v33 = vld [vmem:[%s4946_s1 + $0x230] sm:$0xff]  ;;  %v3503_v47 = vld [vmem:[%s4946_s1 + $0x1e8] sm:$0xff] }
  0x37   :  { %v1110_v57 = vsel %vm3661_vm2, %v1105_v44, %v1109_v40  ;;  %v4019_v19 = vld [vmem:[%s4947_s0 + $0x1c] sm:$0x1]  ;;  %v2844_v29 = vrot.slane %v581_v12, 9  ;;  %v640_v31 = vrot.slane %v3837_v59, 5  ;;  %v2845_v34 = vrot.slane %v582_v13, 9  ;;  %v3479_v52 = vld [vmem:[%s4946_s1 + $0x168] sm:$0xff] }
  0x38   :  { %991 = vmatpush.bf16.msrb.mxu3 %v3460_v14  ;;  %1409 = vmatpush.bf16.msrb.mxu0 %v3468_v20  ;;  %v1325_v17 = vunpack.c.l.b16 %v1110_v57  ;;  %v2846_v14 = vrot.slane %v583_v6, 9  ;;  %v648_v20 = vrot.slane %v3632_v4, 5  ;;  %v1117_v23 = vrot.slane %v1115_v60, 5  ;;  %v4030_v4 = vld [vmem:[%s4947_s0 + $0x24] sm:$0x1] }
  0x39   :  { %v644_v59 = vrot.slane %v3864_v21, 5  ;;  %v653_v35 = vsel %vm3928_vm5, %v2847_v22, %v652_v27  ;;  %v1135_v44 = vshll.u32 %v4030_v4, 16  ;;  %v641_v45 = vsel %vm3928_vm5, %v2844_v29, %v640_v31  ;;  %v3010_v53 = vld [vmem:[%s4947_s0 + $0x28] sm:$0xf]  ;;  %v3419_v60 = vld [vmem:[%s4947_s0 + $0x14] sm:$0xf0] }
  0x3a   :  { %797 = vmatpush.bf16.msrb.mxu2 %v3443_v25  ;;  %536 = vmatpush.bf16.msrb.mxu1 %v3427_v26  ;;  %v1131_v25 = vrot.slane %v1129_v63, 5  ;;  %v3480_v26 = vld [vmem:[%s4946_s1 + $0x170] sm:$0xff]  ;;  %v649_v5 = vsel %vm3928_vm5, %v2846_v14, %v648_v20  ;;  %v1118_v40 = vor.u32 %v1117_v23, %v1114_v15  ;;  %v2944_v62 = vld [vmem:[%s4947_s0 + $0x18] sm:$0xf]  ;;  %v3451_v63 = vld [vmem:[%s4947_s0 + $0x1c] sm:$0xf0] }
  0x3b   :  { %v715_v36 = vunpack.c.l.b16 %v649_v5  ;;  %v645_v46 = vsel %vm3928_vm5, %v2845_v34, %v644_v59  ;;  %v1137_v50 = vrot.slane %v1135_v44, 5  ;;  %v2945_v13 = vor.u32 %v3451_v63, %v2944_v62  ;;  %v585_v15 = vld [vmem:[%s4947_s0 + $0x30] sm:$0xe]  ;;  %v3510_v44 = vld [vmem:[%s4946_s1 + $0x220] sm:$0xff] }
  0x3c   :  { %992 = vmatpush.bf16.msrb.mxu3 %v3459_v37  ;;  %1410 = vmatpush.bf16.msrb.mxu0 %v3467_v38  ;;  %v1340_v37 = vpack.c.b16 %v1325_v17, %v1324_v10  ;;  %v716_v38 = vunpack.c.l.b16 %v653_v35  ;;  %v1132_v43 = vor.u32 %v1131_v25, %v1128_v24  ;;  %v714_v57 = vunpack.c.l.b16 %v645_v46  ;;  %v586_v17 = vld [vmem:[%s4947_s0 + $0x38] sm:$0xe]  ;;  %v3494_v35 = vld [vmem:[%s4946_s1 + $0x1a0] sm:$0xff] }
  0x3d   :  { %v656_v14 = vrot.slane %v3729_v28, 5  ;;  %v2849_v20 = vrot.slane %v586_v17, 9  ;;  %v660_v22 = vrot.slane %v3742_v41, 5  ;;  %v4105_v28 = vld [vmem:[%s4947_s0 + $0x34] sm:$0x1] }
  0x3e   :  { %798 = vmatpush.bf16.msrb.mxu2 %v3442_v39  ;;  %537 = vmatpush.bf16.msrb.mxu1 %v3426_v42  ;;  %v3495_v39 = vld [vmem:[%s4946_s1 + $0x1a8] sm:$0xff]  ;;  %v1121_v42 = vshll.u32 %v4019_v19, 16  ;;  %v4048_v21 = vpack.c.b16 %v716_v38, %v715_v36  ;;  %v1133_v49 = vrot.slane %v1132_v43, 4  ;;  %v3478_v43 = vld [vmem:[%s4946_s1 + $0x160] sm:$0xff] }
  0x40   :  { %993 = vmatpush.bf16.msrb.mxu3 %v3458_v54  ;;  %1411 = vmatpush.bf16.msrb.mxu0 %v3466_v55  ;;  %v1123_v48 = vrot.slane %v1121_v42, 5  ;;  %v2784_v54 = vld [vmem:[%s4947_s0 + $0x10] sm:$0xf]  ;;  %v713_v55 = vunpack.c.l.b16 %v641_v45  ;;  %v1138_v8 = vsel %vm3661_vm2, %v1133_v49, %v1137_v50  ;;  %v3502_v42 = vld [vmem:[%s4946_s1 + $0x1e0] sm:$0xff] }
  0x41   :  { %538 = vmatmul.bf16.vlgmr.msrb.gmra.mxu1 %v2781_v2  ;;  %799 = vmatmul.bf16.vlgmr.msrb.gmra.mxu2 %v727_v9  ;;  %v1140_v2 = vshrl.u32 %v3010_v53, 16  ;;  %v2785_v10 = vor.u32 %v3419_v60, %v2784_v54  ;;  %v1327_v24 = vunpack.c.l.b16 %v1138_v8  ;;  %v3452_v54 = vld [vmem:[%s4947_s0 + $0x2c] sm:$0xf0] }
  0x42   :  { %1873 = vmatpush.bf16.msra.mxu2 %v3497_v56  ;;  %1678 = vmatpush.bf16.msra.mxu1 %v3481_v1  ;;  %v3511_v56 = vld [vmem:[%s4946_s1 + $0x228] sm:$0xff]  ;;  %v1119_v1 = vrot.slane %v1118_v40, 4  ;;  %v728_v12 = vpack.c.b16 %v714_v57, %v713_v55  ;;  %v3014_v40 = vld [vmem:[%s4947_s0 + $0x38] sm:$0xf] }
  0x43   :  { %994 = vmatmul.bf16.vlgmr.msrb.gmra.mxu3 %v2941_v0  ;;  %v1142_v25 = vrot.slane %v1140_v2, 4  ;;  %v1168_v49 = vshrl.u32 %v3014_v40, 16  ;;  %v1171_v50 = vshll.u32 %v3014_v40, 16 }
  0x44   :  { %2291 = vmatpush.bf16.msra.mxu3 %v3505_v58  ;;  %2565 = vmatpush.bf16.msra.mxu0 %v3513_v3  ;;  %v3012_v58 = vld [vmem:[%s4947_s0 + $0x30] sm:$0xf]  ;;  %v1143_v3 = vshll.u32 %v3010_v53, 16  ;;  %v1124_v6 = vsel %vm3661_vm2, %v1119_v1, %v1123_v48  ;;  %v2788_v1 = vld [vmem:[%s4947_s0 + $0x20] sm:$0xf] }
  0x45   :  { %1412 = vmatmul.bf16.vlgmr.msrb.gmra.mxu0 %v1340_v37  ;;  %v1154_v9 = vshrl.u32 %v3012_v58, 16  ;;  %v1157_v0 = vshll.u32 %v3012_v58, 16  ;;  %v1326_v23 = vunpack.c.l.b16 %v1124_v6  ;;  %v3420_v48 = vld [vmem:[%s4947_s0 + $0x24] sm:$0xf0]  ;;  %v1170_v2 = vrot.slane %v1168_v49, 4 }
  0x46   :  { %1874 = vmatpush.bf16.msra.mxu2 %v3496_v18  ;;  %1679 = vmatpush.bf16.msra.mxu1 %v3480_v26  ;;  %v2848_v18 = vrot.slane %v585_v15, 9  ;;  %v1145_v26 = vrot.slane %v1143_v3, 5  ;;  %v2948_v53 = vld [vmem:[%s4947_s0 + $0x28] sm:$0xf]  ;;  %v2789_v62 = vor.u32 %v3420_v48, %v2788_v1  ;;  %v1173_v3 = vrot.slane %v1171_v50, 5 }
  0x47   :  { %v1156_v27 = vrot.slane %v1154_v9, 4  ;;  %v1159_v29 = vrot.slane %v1157_v0, 5  ;;  %v1341_v34 = vpack.c.b16 %v1327_v24, %v1326_v23  ;;  %v2949_v63 = vor.u32 %v3452_v54, %v2948_v53  ;;  %v4201_v49 = vld [vmem:[%s4947_s0 + $0x5c] sm:$0x1]  ;;  %v4206_v50 = vld [vmem:[%s4947_s0 + $0x64] sm:$0x1] }
  0x48   :  { %2292 = vmatpush.bf16.msra.mxu3 %v3504_v32  ;;  %2566 = vmatpush.bf16.msra.mxu0 %v3512_v33  ;;  %v657_v31 = vsel %vm3928_vm5, %v2848_v18, %v656_v14  ;;  %v661_v32 = vsel %vm3928_vm5, %v2849_v20, %v660_v22  ;;  %v4100_v33 = vld [vmem:[%s4947_s0 + $0x2c] sm:$0x1]  ;;  %v1146_v36 = vor.u32 %v1145_v26, %v1142_v25  ;;  %v3493_v20 = vld [vmem:[%s4946_s1 + $0x198] sm:$0xff] }
  0x49   :  { %v717_v41 = vunpack.c.l.b16 %v657_v31  ;;  %v718_v5 = vunpack.c.l.b16 %v661_v32  ;;  %v1149_v37 = vshll.u32 %v4100_v33, 16  ;;  %v1160_v38 = vor.u32 %v1159_v29, %v1156_v27  ;;  %v3477_v26 = vld [vmem:[%s4946_s1 + $0x158] sm:$0xff]  ;;  %v3020_v31 = vld [vmem:[%s4947_s0 + $0x60] sm:$0xf]  ;;  %v2792_v32 = vld [vmem:[%s4947_s0 + $0x30] sm:$0xf] }
  0x4a   :  { %1875 = vmatpush.bf16.msra.mxu2 %v3495_v39  ;;  %1680 = vmatpush.bf16.msra.mxu1 %v3479_v52  ;;  %v1163_v39 = vshll.u32 %v4105_v28, 16  ;;  %v1147_v45 = vrot.slane %v1146_v36, 4  ;;  %v3509_v27 = vld [vmem:[%s4946_s1 + $0x218] sm:$0xff]  ;;  %v1213_v40 = vshll.u32 %v3020_v31, 16 }
  0x4b   :  { %v4107_v59 = vpack.c.b16 %v718_v5, %v717_v41  ;;  %v1151_v46 = vrot.slane %v1149_v37, 5  ;;  %v3018_v29 = vld [vmem:[%s4947_s0 + $0x58] sm:$0xf] }
  0x4c   :  { %2293 = vmatpush.bf16.msra.mxu3 %v3503_v47  ;;  %2567 = vmatpush.bf16.msra.mxu0 %v3511_v56  ;;  %v1161_v47 = vrot.slane %v1160_v38, 4  ;;  %v1165_v52 = vrot.slane %v1163_v39, 5  ;;  %v3016_v56 = vld [vmem:[%s4947_s0 + $0x40] sm:$0xf]  ;;  %v3421_v41 = vld [vmem:[%s4947_s0 + $0x34] sm:$0xf0] }
  0x4d   :  { %v1182_v55 = vshrl.u32 %v3016_v56, 16  ;;  %v1185_v57 = vshll.u32 %v3016_v56, 16  ;;  %v1152_v58 = vsel %vm3661_vm2, %v1147_v45, %v1151_v46  ;;  %v1199_v36 = vshll.u32 %v3018_v29, 16  ;;  %v2952_v37 = vld [vmem:[%s4947_s0 + $0x38] sm:$0xf] }
  0x4e   :  { %1876 = vmatpush.bf16.msra.mxu2 %v3494_v35  ;;  %1681 = vmatpush.bf16.msra.mxu1 %v3478_v43  ;;  %v1166_v60 = vsel %vm3661_vm2, %v1161_v47, %v1165_v52  ;;  %v1328_v6 = vunpack.c.l.b16 %v1152_v58  ;;  %v1196_v35 = vshrl.u32 %v3018_v29, 16  ;;  %v3453_v38 = vld [vmem:[%s4947_s0 + $0x3c] sm:$0xf0]  ;;  %v1210_v39 = vshrl.u32 %v3020_v31, 16  ;;  %v587_v52 = vld [vmem:[%s4947_s0 + $0x50] sm:$0xe] }
  0x4f   :  { %v1329_v8 = vunpack.c.l.b16 %v1166_v60  ;;  %v1184_v9 = vrot.slane %v1182_v55, 4  ;;  %v1187_v0 = vrot.slane %v1185_v57, 5  ;;  %v2953_v45 = vor.u32 %v3453_v38, %v2952_v37  ;;  %v588_v56 = vld [vmem:[%s4947_s0 + $0x58] sm:$0xe]  ;;  %v3585_v55 = vld [vmem:[%s4947_s0 + $0x54] sm:$0x1] }
  0x50   :  { %2294 = vmatpush.bf16.msra.mxu3 %v3502_v42  ;;  %2568 = vmatpush.bf16.msra.mxu0 %v3510_v44  ;;  %v2793_v42 = vor.u32 %v3421_v41, %v2792_v32  ;;  %v1198_v46 = vrot.slane %v1196_v35, 4  ;;  %v1201_v47 = vrot.slane %v1199_v36, 5  ;;  %v1212_v1 = vrot.slane %v1210_v39, 4  ;;  %v3586_v60 = vld [vmem:[%s4947_s0 + $0x5c] sm:$0x1] }
  0x51   :  { %543 = vmatmul.bf16.gmra.mxu1 %v2785_v10  ;;  %804 = vmatmul.bf16.gmra.mxu2 %v728_v12  ;;  %v4148_v10 = vld [vmem:[%s4947_s0 + $0x3c] sm:$0x1]  ;;  %v4153_v12 = vld [vmem:[%s4947_s0 + $0x44] sm:$0x1]  ;;  %v1342_v15 = vpack.c.b16 %v1329_v8, %v1328_v6  ;;  %v1188_v18 = vor.u32 %v1187_v0, %v1184_v9  ;;  %v1215_v48 = vrot.slane %v1213_v40, 5  ;;  %v2850_v54 = vrot.slane %v587_v52, 9 }
  0x52   :  { %v1177_v17 = vshll.u32 %v4148_v10, 16  ;;  %v1191_v14 = vshll.u32 %v4153_v12, 16  ;;  %1877 = vmatpush.bf16.msra.mxu2 %v3493_v20  ;;  %1682 = vmatpush.bf16.msra.mxu1 %v3477_v26  ;;  %v664_v57 = vrot.slane %v3585_v55, 5  ;;  %v2851_v58 = vrot.slane %v588_v56, 9  ;;  %v3022_v8 = vld [vmem:[%s4947_s0 + $0x68] sm:$0xf] }
  0x53   :  { %999 = vmatmul.bf16.gmra.mxu3 %v2945_v13  ;;  %v1174_v13 = vor.u32 %v1173_v3, %v1170_v2  ;;  %v1189_v24 = vrot.slane %v1188_v18, 4  ;;  %v1202_v2 = vor.u32 %v1201_v47, %v1198_v46  ;;  %v1216_v3 = vor.u32 %v1215_v48, %v1212_v1  ;;  %v3024_v9 = vld [vmem:[%s4947_s0 + $0x70] sm:$0xf]  ;;  %v3422_v32 = vld [vmem:[%s4947_s0 + $0x54] sm:$0xf0] }
  0x54   :  { %v1179_v23 = vrot.slane %v1177_v17, 5  ;;  %v1193_v25 = vrot.slane %v1191_v14, 5  ;;  %2569 = vmatpush.bf16.msra.mxu0 %v3509_v27  ;;  %v1219_v6 = vshll.u32 %v4206_v50, 16  ;;  %v665_v0 = vsel %vm3928_vm5, %v2850_v54, %v664_v57  ;;  %v3476_v17 = vld [vmem:[%s4946_s1 + $0x150] sm:$0xff]  ;;  %v2956_v41 = vld [vmem:[%s4947_s0 + $0x58] sm:$0xf] }
  0x55   :  { %1417 = vmatmul.bf16.gmra.mxu0 %v1341_v34  ;;  %v1175_v22 = vrot.slane %v1174_v13, 4  ;;  %v3508_v18 = vld [vmem:[%s4946_s1 + $0x210] sm:$0xff]  ;;  %v1203_v14 = vrot.slane %v1202_v2, 4  ;;  %v1238_v27 = vshrl.u32 %v3024_v9, 16  ;;  %v1241_v29 = vshll.u32 %v3024_v9, 16  ;;  %v3499_v9 = vld [vmem:[%s4946_s1 + $0x1c8] sm:$0xff] }
  0x56   :  { %v1194_v34 = vsel %vm3661_vm2, %v1189_v24, %v1193_v25  ;;  %v1224_v24 = vshrl.u32 %v3022_v8, 16  ;;  %v1227_v25 = vshll.u32 %v3022_v8, 16  ;;  %1683 = vmatpush.bf16.msra.mxu1 %v3476_v17  ;;  %v2796_v31 = vld [vmem:[%s4947_s0 + $0x50] sm:$0xf]  ;;  %v589_v40 = vld [vmem:[%s4947_s0 + $0x60] sm:$0xe] }
  0x57   :  { %v1180_v5 = vsel %vm3661_vm2, %v1175_v22, %v1179_v23  ;;  %v1331_v44 = vunpack.c.l.b16 %v1194_v34  ;;  %v1217_v22 = vrot.slane %v1216_v3, 4  ;;  %v1221_v23 = vrot.slane %v1219_v6, 5  ;;  %v3023_v52 = vld [vmem:[%s4947_s0 + $0x6c] sm:$0x1]  ;;  %v3025_v56 = vld [vmem:[%s4947_s0 + $0x74] sm:$0x1] }
  0x58   :  { %v1330_v43 = vunpack.c.l.b16 %v1180_v5  ;;  %2570 = vmatpush.bf16.msra.mxu0 %v3508_v18  ;;  %v3454_v5 = vld [vmem:[%s4947_s0 + $0x5c] sm:$0xf0]  ;;  %v1226_v36 = vrot.slane %v1224_v24, 4  ;;  %v1229_v37 = vrot.slane %v1227_v25, 5  ;;  %v2797_v38 = vor.u32 %v3422_v32, %v2796_v31  ;;  %v3026_v8 = vld [vmem:[%s4947_s0 + $0x78] sm:$0xf] }
  0x59   :  { %v1222_v35 = vsel %vm3661_vm2, %v1217_v22, %v1221_v23  ;;  %v2852_v1 = vrot.slane %v589_v40, 9  ;;  %v672_v48 = vrot.slane %v3766_v61, 5  ;;  %v676_v54 = vrot.slane %v3781_v11, 5  ;;  %v2800_v24 = vld [vmem:[%s4947_s0 + $0x60] sm:$0xf] }
  0x5a   :  { %v1343_v53 = vpack.c.b16 %v1331_v44, %v1330_v43  ;;  %v1240_v43 = vrot.slane %v1238_v27, 4  ;;  %v1243_v44 = vrot.slane %v1241_v29, 5  ;;  %v1333_v47 = vunpack.c.l.b16 %v1222_v35  ;;  %v3423_v25 = vld [vmem:[%s4947_s0 + $0x64] sm:$0xf0]  ;;  %v3455_v29 = vld [vmem:[%s4947_s0 + $0x6c] sm:$0xf0] }
  0x5b   :  { %v1230_v55 = vor.u32 %v1229_v37, %v1226_v36  ;;  %v1233_v57 = vshll.u32 %v3023_v52, 16  ;;  %v673_v2 = vsel %vm3928_vm5, %v2852_v1, %v672_v48  ;;  %v1252_v22 = vshrl.u32 %v3026_v8, 16  ;;  %v2960_v27 = vld [vmem:[%s4947_s0 + $0x68] sm:$0xf]  ;;  %v591_v37 = vld [vmem:[%s4947_s0 + $0x70] sm:$0xe] }
  0x5c   :  { %v721_v17 = vunpack.c.l.b16 %v673_v2  ;;  %v1255_v23 = vshll.u32 %v3026_v8, 16  ;;  %v2961_v36 = vor.u32 %v3455_v29, %v2960_v27  ;;  %v3082_v29 = vld [vmem:[%s4947_s0 + $0x8] sm:$0xe] }
  0x5d   :  { %v1231_v11 = vrot.slane %v1230_v55, 4 }
  0x5e   :  { %v1257_v35 = vrot.slane %v1255_v23, 5  ;;  %v3456_v23 = vld [vmem:[%s4947_s0 + $0x7c] sm:$0xf0] }
  0x61   :  { %548 = vmatmul.bf16.gmra.mxu1 %v2789_v62  ;;  %809 = vmatmul.bf16.gmra.mxu2 %v4048_v21  ;;  %v3501_v21 = vld [vmem:[%s4946_s1 + $0x1d8] sm:$0xff]  ;;  %v668_v62 = vrot.slane %v3586_v60, 5  ;;  %v1247_v60 = vshll.u32 %v3025_v56, 16 }
  0x62   :  { %2295 = vmatpush.bf16.msra.mxu3 %v3501_v21  ;;  %v719_v21 = vunpack.c.l.b16 %v665_v0  ;;  %v3475_v0 = vld [vmem:[%s4946_s1 + $0x148] sm:$0xff]  ;;  %v3588_v56 = vld [vmem:[%s4947_s0 + $0x7c] sm:$0x1] }
  0x63   :  { %1004 = vmatmul.bf16.gmra.mxu3 %v2949_v63  ;;  %v3492_v63 = vld [vmem:[%s4946_s1 + $0x190] sm:$0xff]  ;;  %v669_v13 = vsel %vm3928_vm5, %v2851_v58, %v668_v62  ;;  %v1244_v58 = vor.u32 %v1243_v44, %v1240_v43  ;;  %v1249_v6 = vrot.slane %v1247_v60, 5  ;;  %1684 = vmatpush.bf16.msra.mxu1 %v3475_v0  ;;  %v3029_v43 = vld [vmem:[%s4947_s0 + $0x84] sm:$0x1]  ;;  %v684_v1 = vrot.slane %v3588_v56, 5 }
  0x64   :  { %1878 = vmatpush.bf16.msra.mxu2 %v3492_v63  ;;  %v720_v26 = vunpack.c.l.b16 %v669_v13  ;;  %v3491_v63 = vld [vmem:[%s4946_s1 + $0x188] sm:$0xff]  ;;  %v3028_v13 = vld [vmem:[%s4947_s0 + $0x80] sm:$0xf]  ;;  %v1275_v55 = vshll.u32 %v3029_v43, 16  ;;  %v1519_v0 = vrot.slane %v3899_v51, 5 }
  0x65   :  { %1422 = vmatmul.bf16.gmra.mxu0 %v1342_v15  ;;  %v3500_v15 = vld [vmem:[%s4946_s1 + $0x1d0] sm:$0xff]  ;;  %v1245_v3 = vrot.slane %v1244_v58, 4 }
  0x66   :  { %2296 = vmatpush.bf16.msra.mxu3 %v3500_v15  ;;  %v731_v39 = vpack.c.b16 %v720_v26, %v719_v21  ;;  %v3507_v15 = vld [vmem:[%s4946_s1 + $0x208] sm:$0xff]  ;;  %v1266_v21 = vshrl.u32 %v3028_v13, 16  ;;  %v1269_v26 = vshll.u32 %v3028_v13, 16  ;;  %v2804_v13 = vld [vmem:[%s4947_s0 + $0x70] sm:$0xf] }
  0x67   :  { %2571 = vmatpush.bf16.msra.mxu0 %v3507_v15  ;;  %v3424_v15 = vld [vmem:[%s4947_s0 + $0x74] sm:$0xf0] }
  0x68   :  { %1879 = vmatpush.bf16.msra.mxu2 %v3491_v63  ;;  %v1271_v40 = vrot.slane %v1269_v26, 5  ;;  %v2805_v26 = vor.u32 %v3424_v15, %v2804_v13 }
  0x6a   :  { %2297 = vmatpush.bf16.msra.mxu3 %v3499_v9  ;;  %v3032_v9 = vld [vmem:[%s4947_s0 + $0x90] sm:$0xf] }
  0x71   :  { %553 = vmatmul.bf16.gmra.mxu1 %v2793_v42  ;;  %814 = vmatmul.bf16.gmra.mxu2 %v4107_v59  ;;  %v1205_v59 = vshll.u32 %v4201_v49, 16  ;;  %v590_v42 = vld [vmem:[%s4947_s0 + $0x68] sm:$0xe] }
  0x73   :  { %1009 = vmatmul.bf16.gmra.mxu3 %v2953_v45  ;;  %v1207_v20 = vrot.slane %v1205_v59, 5  ;;  %v2957_v45 = vor.u32 %v3454_v5, %v2956_v41  ;;  %v1235_v59 = vrot.slane %v1233_v57, 5  ;;  %v2801_v41 = vor.u32 %v3423_v25, %v2800_v24  ;;  %v3490_v57 = vld [vmem:[%s4946_s1 + $0x180] sm:$0xff] }
  0x74   :  { %1880 = vmatpush.bf16.msra.mxu2 %v3490_v57  ;;  %v1294_v24 = vshrl.u32 %v3032_v9, 16  ;;  %v1297_v25 = vshll.u32 %v3032_v9, 16 }
  0x75   :  { %1427 = vmatmul.bf16.gmra.mxu0 %v1343_v53  ;;  %v1208_v34 = vsel %vm3661_vm2, %v1203_v14, %v1207_v20  ;;  %v2853_v53 = vrot.slane %v590_v42, 9  ;;  %v1236_v14 = vsel %vm3661_vm2, %v1231_v11, %v1235_v59  ;;  %v1250_v20 = vsel %vm3661_vm2, %v1245_v3, %v1249_v6  ;;  %v3027_v42 = vld [vmem:[%s4947_s0 + $0x7c] sm:$0x1]  ;;  %v3498_v11 = vld [vmem:[%s4946_s1 + $0x1c0] sm:$0xff]  ;;  %v3030_v3 = vld [vmem:[%s4947_s0 + $0x88] sm:$0xf] }
  0x76   :  { %v1332_v46 = vunpack.c.l.b16 %v1208_v34  ;;  %v1334_v31 = vunpack.c.l.b16 %v1236_v14  ;;  %v1335_v32 = vunpack.c.l.b16 %v1250_v20  ;;  %v1254_v34 = vrot.slane %v1252_v22, 4  ;;  %v3474_v59 = vld [vmem:[%s4946_s1 + $0x140] sm:$0xff]  ;;  %2298 = vmatpush.bf16.msra.mxu3 %v3498_v11 }
  0x77   :  { %v677_v61 = vsel %vm3928_vm5, %v2853_v53, %v676_v54  ;;  %v1261_v53 = vshll.u32 %v3027_v42, 16  ;;  %1685 = vmatpush.bf16.msra.mxu1 %v3474_v59  ;;  %v1280_v20 = vshrl.u32 %v3030_v3, 16  ;;  %v1283_v51 = vshll.u32 %v3030_v3, 16 }
  0x78   :  { %v1344_v62 = vpack.c.b16 %v1333_v47, %v1332_v46  ;;  %v722_v18 = vunpack.c.l.b16 %v677_v61  ;;  %v1345_v44 = vpack.c.b16 %v1335_v32, %v1334_v31  ;;  %v3587_v46 = vld [vmem:[%s4947_s0 + $0x74] sm:$0x1]  ;;  %v1258_v48 = vor.u32 %v1257_v35, %v1254_v34 }
  0x79   :  { %v680_v47 = vrot.slane %v3587_v46, 5  ;;  %v1263_v63 = vrot.slane %v1261_v53, 5  ;;  %v1277_v61 = vrot.slane %v1275_v55, 5  ;;  %v1523_v22 = vrot.slane %v3920_v7, 5  ;;  %v3083_v7 = vld [vmem:[%s4947_s0 + $0x10] sm:$0xe] }
  0x7a   :  { %v732_v5 = vpack.c.b16 %v722_v18, %v721_v17  ;;  %v2964_v17 = vld [vmem:[%s4947_s0 + $0x78] sm:$0xf]  ;;  %v1296_v42 = vrot.slane %v1294_v24, 4  ;;  %v1299_v43 = vrot.slane %v1297_v25, 5  ;;  %v3031_v46 = vld [vmem:[%s4947_s0 + $0x8c] sm:$0x1] }
  0x7b   :  { %v2965_v35 = vor.u32 %v3456_v23, %v2964_v17  ;;  %v3258_v53 = vld [vmem:[%s4947_s0 + $0x10] sm:$0xf] }
  0x7c   :  { %v1300_v11 = vor.u32 %v1299_v43, %v1296_v42 }
  0x81   :  { %558 = vmatmul.bf16.gmra.mxu1 %v2797_v38  ;;  %819 = vmatmul.bf16.gmra.mxu2 %v731_v39  ;;  %v592_v38 = vld [vmem:[%s4947_s0 + $0x78] sm:$0xe]  ;;  %v1268_v39 = vrot.slane %v1266_v21, 4  ;;  %v3506_v21 = vld [vmem:[%s4946_s1 + $0x200] sm:$0xff] }
  0x82   :  { %v2855_v52 = vrot.slane %v592_v38, 9  ;;  %2572 = vmatpush.bf16.msra.mxu0 %v3506_v21  ;;  %v1285_v38 = vrot.slane %v1283_v51, 5  ;;  %v1301_v51 = vrot.slane %v1300_v11, 4  ;;  %v3264_v11 = vld [vmem:[%s4947_s0 + $0x28] sm:$0xf] }
  0x83   :  { %1014 = vmatmul.bf16.gmra.mxu3 %v2957_v45  ;;  %v2854_v45 = vrot.slane %v591_v37, 9  ;;  %v1272_v54 = vor.u32 %v1271_v40, %v1268_v39  ;;  %v1282_v37 = vrot.slane %v1280_v20, 4  ;;  %v594_v40 = vld [vmem:[%s4947_s0 + $0x88] sm:$0xe] }
  0x84   :  { %v685_v60 = vsel %vm3928_vm5, %v2855_v52, %v684_v1  ;;  %v2857_v57 = vrot.slane %v594_v40, 9 }
  0x85   :  { %1432 = vmatmul.bf16.gmra.mxu0 %v1344_v62  ;;  %v681_v58 = vsel %vm3928_vm5, %v2854_v45, %v680_v47  ;;  %v1259_v62 = vrot.slane %v1258_v48, 4  ;;  %v1273_v2 = vrot.slane %v1272_v54, 4  ;;  %v724_v8 = vunpack.c.l.b16 %v685_v60  ;;  %v3033_v47 = vld [vmem:[%s4947_s0 + $0x94] sm:$0x1]  ;;  %v3589_v54 = vld [vmem:[%s4947_s0 + $0x84] sm:$0x1] }
  0x86   :  { %v723_v6 = vunpack.c.l.b16 %v681_v58  ;;  %v688_v55 = vrot.slane %v3589_v54, 5  ;;  %v3590_v58 = vld [vmem:[%s4947_s0 + $0x8c] sm:$0x1]  ;;  %v1303_v59 = vshll.u32 %v3033_v47, 16 }
  0x87   :  { %v1264_v18 = vsel %vm3661_vm2, %v1259_v62, %v1263_v63  ;;  %v1278_v14 = vsel %vm3661_vm2, %v1273_v2, %v1277_v61  ;;  %v692_v60 = vrot.slane %v3590_v58, 5  ;;  %v3260_v63 = vld [vmem:[%s4947_s0 + $0x18] sm:$0xf]  ;;  %v1286_v2 = vor.u32 %v1285_v38, %v1282_v37  ;;  %v3338_v58 = vld [vmem:[%s4947_s0 + $0x10] sm:$0xe] }
  0x88   :  { %v733_v27 = vpack.c.b16 %v724_v8, %v723_v6  ;;  %v1336_v31 = vunpack.c.l.b16 %v1264_v18  ;;  %v1337_v32 = vunpack.c.l.b16 %v1278_v14  ;;  %v1289_v61 = vshll.u32 %v3031_v46, 16 }
  0x89   :  { %v1971_v6 = vshrl.u32 %v3258_v53, 16  ;;  %v1974_v8 = vshll.u32 %v3258_v53, 16  ;;  %v1988_v13 = vshll.u32 %v3260_v63, 16  ;;  %v693_v18 = vsel %vm3928_vm5, %v2857_v57, %v692_v60 }
  0x8a   :  { %v1346_v1 = vpack.c.b16 %v1337_v32, %v1336_v31  ;;  %v1287_v14 = vrot.slane %v1286_v2, 4  ;;  %v1291_v20 = vrot.slane %v1289_v61, 5  ;;  %v2808_v31 = vld [vmem:[%s4947_s0 + $0x80] sm:$0xf]  ;;  %v3425_v32 = vld [vmem:[%s4947_s0 + $0x84] sm:$0xf0] }
  0x8b   :  { %v1973_v23 = vrot.slane %v1971_v6, 4  ;;  %v1976_v24 = vrot.slane %v1974_v8, 5  ;;  %v3262_v61 = vld [vmem:[%s4947_s0 + $0x20] sm:$0xf]  ;;  %v3354_v8 = vrot.slane %v3338_v58, 9 }
  0x8d   :  { %v1977_v40 = vor.u32 %v1976_v24, %v1973_v23  ;;  %v2013_v23 = vshrl.u32 %v3264_v11, 16  ;;  %v2016_v24 = vshll.u32 %v3264_v11, 16 }
  0x8f   :  { %v1978_v53 = vrot.slane %v1977_v40, 4  ;;  %v4489_v40 = vld [vmem:[%s4947_s0 + $0x2c] sm:$0x1] }
  0x90   :  { %v2022_v58 = vshll.u32 %v4489_v40, 16 }
  0x91   :  { %563 = vmatmul.bf16.gmra.mxu1 %v2801_v41  ;;  %824 = vmatmul.bf16.gmra.mxu2 %v732_v5  ;;  %v3098_v41 = vrot.slane %v3082_v29, 9  ;;  %v3099_v5 = vrot.slane %v3083_v7, 9  ;;  %v1990_v7 = vrot.slane %v1988_v13, 5 }
  0x93   :  { %1019 = vmatmul.bf16.gmra.mxu3 %v2961_v36  ;;  %v593_v36 = vld [vmem:[%s4947_s0 + $0x80] sm:$0xe]  ;;  %v1524_v45 = vsel %vm3928_vm5, %v3099_v5, %v1523_v22  ;;  %v1305_v22 = vrot.slane %v1303_v59, 5  ;;  %v2968_v5 = vld [vmem:[%s4947_s0 + $0x88] sm:$0xf] }
  0x94   :  { %v1599_v56 = vunpack.c.l.b16 %v1524_v45  ;;  %v2856_v48 = vrot.slane %v593_v36, 9  ;;  %v1292_v36 = vsel %vm3661_vm2, %v1287_v14, %v1291_v20 }
  0x95   :  { %1437 = vmatmul.bf16.gmra.mxu0 %v1345_v44  ;;  %v1520_v44 = vsel %vm3928_vm5, %v3098_v41, %v1519_v0  ;;  %v1985_v0 = vshrl.u32 %v3260_v63, 16  ;;  %v3261_v41 = vld [vmem:[%s4947_s0 + $0x1c] sm:$0x1]  ;;  %v1306_v37 = vsel %vm3661_vm2, %v1301_v51, %v1305_v22  ;;  %v3339_v63 = vld [vmem:[%s4947_s0 + $0x18] sm:$0xe]  ;;  %v1999_v51 = vshrl.u32 %v3262_v61, 16 }
  0x96   :  { %v1598_v52 = vunpack.c.l.b16 %v1520_v44  ;;  %v689_v17 = vsel %vm3928_vm5, %v2856_v48, %v688_v55  ;;  %v2809_v44 = vor.u32 %v3425_v32, %v2808_v31  ;;  %v1994_v47 = vshll.u32 %v3261_v41, 16  ;;  %v3482_v31 = vld [vmem:[%s4947_s0 + $0x14] sm:$0xf0] }
  0x97   :  { %v725_v21 = vunpack.c.l.b16 %v689_v17  ;;  %v1987_v29 = vrot.slane %v1985_v0, 4  ;;  %v1339_v48 = vunpack.c.l.b16 %v1306_v37  ;;  %v2410_v14 = vrot.slane %v3261_v41, 5  ;;  %v4484_v37 = vld [vmem:[%s4947_s0 + $0x24] sm:$0x1] }
  0x98   :  { %v4400_v62 = vpack.c.b16 %v1599_v56, %v1598_v52  ;;  %v1996_v57 = vrot.slane %v1994_v47, 5  ;;  %v2002_v22 = vshll.u32 %v3262_v61, 16  ;;  %v2001_v32 = vrot.slane %v1999_v51, 4 }
  0x99   :  { %v1991_v46 = vor.u32 %v1990_v7, %v1987_v29  ;;  %v1527_v61 = vrot.slane %v4019_v19, 5  ;;  %v2024_v19 = vrot.slane %v2022_v58, 5 }
  0x9a   :  { %v2004_v41 = vrot.slane %v2002_v22, 5 }
  0x9b   :  { %v1992_v55 = vrot.slane %v1991_v46, 4 }
  0x9d   :  { %v1997_v13 = vsel %vm3661_vm2, %v1992_v55, %v1996_v57  ;;  %v2008_v55 = vshll.u32 %v4484_v37, 16 }
  0x9e   :  { %v4371_v34 = vpop.f32.mrf.mxu1  ;;  %v2212_v29 = vunpack.c.l.b16 %v1997_v13  ;;  %v3266_v13 = vld [vmem:[%s4947_s0 + $0x30] sm:$0xf] }
  0xa0   :  { %v4376_v39 = vpop.f32.mrf.mxu0 }
  0xa1   :  { %568 = vmatmul.bf16.gmra.mxu1 %v2805_v26  ;;  %829 = vmatmul.bf16.gmra.mxu2 %v733_v27  ;;  %v726_v26 = vunpack.c.l.b16 %v693_v18  ;;  %v3259_v27 = vld [vmem:[%s4947_s0 + $0x14] sm:$0x1]  ;;  %v3355_v18 = vrot.slane %v3339_v63, 9 }
  0xa2   :  { %v1980_v42 = vshll.u32 %v3259_v27, 16  ;;  %v2406_v17 = vrot.slane %v3259_v27, 5 }
  0xa3   :  { %1024 = vmatmul.bf16.gmra.mxu3 %v2965_v35  ;;  %v3457_v35 = vld [vmem:[%s4947_s0 + $0x8c] sm:$0xf0]  ;;  %v734_v45 = vpack.c.b16 %v726_v26, %v725_v21  ;;  %v2411_v27 = vsel %vm3928_vm5, %v3355_v18, %v2410_v14  ;;  %v2010_v18 = vrot.slane %v2008_v55, 5 }
  0xa4   :  { %v4405_v3 = vpop.f32.mrf.mxu2  ;;  %v2969_v56 = vor.u32 %v3457_v35, %v2968_v5  ;;  %v1982_v54 = vrot.slane %v1980_v42, 5  ;;  %v3196_v21 = vld [vmem:[%s4947_s0 + $0x10] sm:$0xf]  ;;  %v2407_v7 = vsel %vm3928_vm5, %v3354_v8, %v2406_v17  ;;  %v2015_v5 = vrot.slane %v2013_v23, 4  ;;  %v3268_v17 = vld [vmem:[%s4947_s0 + $0x38] sm:$0xf] }
  0xa5   :  { %1442 = vmatmul.bf16.gmra.mxu0 %v1346_v1  ;;  %v1338_v1 = vunpack.c.l.b16 %v1292_v36  ;;  %v2018_v35 = vrot.slane %v2016_v24, 5  ;;  %v2485_v47 = vunpack.c.l.b16 %v2407_v7  ;;  %v1531_v8 = vrot.slane %v4030_v4, 5  ;;  %v3341_v4 = vld [vmem:[%s4947_s0 + $0x28] sm:$0xe] }
  0xa6   :  { %v4407_v9 = vpop.f32.mrf.mxu3  ;;  %v4409_v15 = vpop.f32.mrf.mxu1  ;;  %v1983_v6 = vsel %vm3661_vm2, %v1978_v53, %v1982_v54  ;;  %v3085_v53 = vld [vmem:[%s4947_s0 + $0x20] sm:$0xe]  ;;  %v2005_v54 = vor.u32 %v2004_v41, %v2001_v32  ;;  %v2027_v23 = vshrl.u32 %v3266_v13, 16  ;;  %v2030_v24 = vshll.u32 %v3266_v13, 16 }
  0xa7   :  { %v1347_v60 = vpack.c.b16 %v1339_v48, %v1338_v1  ;;  %v2211_v26 = vunpack.c.l.b16 %v1983_v6  ;;  %v3084_v1 = vld [vmem:[%s4947_s0 + $0x18] sm:$0xe]  ;;  %v2019_v57 = vor.u32 %v2018_v35, %v2015_v5  ;;  %v3101_v6 = vrot.slane %v3085_v53, 9 }
  0xa8   :  { %v4415_v25 = vpop.f32.mrf.mxu0  ;;  %v3100_v63 = vrot.slane %v3084_v1, 9  ;;  %v2418_v1 = vrot.slane %v4489_v40, 5  ;;  %v2032_v53 = vrot.slane %v2030_v24, 5  ;;  %v3200_v40 = vld [vmem:[%s4947_s0 + $0x20] sm:$0xf] }
  0xa9   :  { %v2227_v46 = vpack.c.b16 %v2212_v29, %v2211_v26  ;;  %v2020_v14 = vrot.slane %v2019_v57, 4  ;;  %v2044_v26 = vshll.u32 %v3268_v17, 16 }
  0xab   :  { %v2025_v5 = vsel %vm3661_vm2, %v2020_v14, %v2024_v19  ;;  %v2046_v55 = vrot.slane %v2044_v26, 5 }
  0xac   :  { %v4439_v38 = vpop.f32.mrf.mxu2 }
  0xae   :  { %v4441_v43 = vpop.f32.mrf.mxu3  ;;  %v4443_v52 = vpop.f32.mrf.mxu1 }
  0xb1   :  { %573 = vmatmul.bf16.gmra.mxu1 %v2809_v44  ;;  %834 = vmatmul.bf16.gmra.mxu2 %v734_v45  ;;  %v3197_v45 = vor.u32 %v3482_v31, %v3196_v21  ;;  %v2041_v21 = vshrl.u32 %v3268_v17, 16  ;;  %v1532_v31 = vsel %vm3928_vm5, %v3101_v6, %v1531_v8  ;;  %v3086_v17 = vld [vmem:[%s4947_s0 + $0x28] sm:$0xe] }
  0xb2   :  { %v4451_v2 = vpop.f32.mrf.mxu0  ;;  %v1601_v58 = vunpack.c.l.b16 %v1532_v31  ;;  %v1535_v31 = vrot.slane %v4100_v33, 5  ;;  %v3343_v33 = vld [vmem:[%s4947_s0 + $0x38] sm:$0xe] }
  0xb3   :  { %1029 = vmatmul.bf16.gmra.mxu3 %v2969_v56  ;;  %v2486_v56 = vunpack.c.l.b16 %v2411_v27  ;;  %v1528_v27 = vsel %vm3928_vm5, %v3100_v63, %v1527_v61  ;;  %v3483_v63 = vld [vmem:[%s4947_s0 + $0x24] sm:$0xf0] }
  0xb4   :  { %v4459_v59 = vpop.f32.mrf.mxu2  ;;  %v1600_v57 = vunpack.c.l.b16 %v1528_v27  ;;  %v3201_v24 = vor.u32 %v3483_v63, %v3200_v40  ;;  %v3102_v27 = vrot.slane %v3086_v17, 9  ;;  %v3359_v17 = vrot.slane %v3343_v33, 9 }
  0xb5   :  { %1447 = vmatmul.bf16.gmra.mxu0 %v1347_v60  ;;  %v2501_v11 = vpack.c.b16 %v2486_v56, %v2485_v47  ;;  %v3357_v56 = vrot.slane %v3341_v4, 9 }
  0xb6   :  { %v4463_v0 = vpop.f32.mrf.mxu3  ;;  %v4467_v20 = vpop.f32.mrf.mxu1 }
  0xb7   :  { %v2419_v13 = vsel %vm3928_vm5, %v3357_v56, %v2418_v1  ;;  %v3342_v1 = vld [vmem:[%s4947_s0 + $0x30] sm:$0xe] }
  0xba   :  { %v4479_v36 = vpop.f32.mrf.mxu0 }
  0xbc   :  { %v4491_v42 = vpop.f32.mrf.mxu2 }
  0xbe   :  { %v4493_v44 = vpop.f32.mrf.mxu3  ;;  %v539_v48 = vpop.f32.mrf.mxu1 }
  0xbf   :  { %v540_v60 = vadd.f32 %v539_v48, %v4376_v39  ;;  %v2006_v39 = vrot.slane %v2005_v54, 4  ;;  %v2029_v48 = vrot.slane %v2027_v23, 4  ;;  %v2043_v54 = vrot.slane %v2041_v21, 4 }
  0xc0   :  { %v1615_v23 = vpack.c.b16 %v1601_v58, %v1600_v57 }
  0xc1   :  { %1686 = vmatmul.bf16.vlgmr.msra.gmra.mxu1 %v4400_v62  ;;  %1881 = vmatmul.bf16.vlgmr.msra.gmra.mxu2 %v3197_v45  ;;  %v3340_v62 = vld [vmem:[%s4947_s0 + $0x20] sm:$0xe]  ;;  %v2011_v41 = vsel %vm3661_vm2, %v2006_v39, %v2010_v18  ;;  %v2414_v45 = vrot.slane %v4484_v37, 5  ;;  %v4538_v37 = vld [vmem:[%s4947_s0 + $0x3c] sm:$0x1]  ;;  %v2033_v14 = vor.u32 %v2032_v53, %v2029_v48 }
  0xc2   :  { %v1413_v51 = vpop.f32.mrf.mxu0  ;;  %v3356_v35 = vrot.slane %v3340_v62, 9  ;;  %v2213_v61 = vunpack.c.l.b16 %v2011_v41  ;;  %v3087_v18 = vld [vmem:[%s4947_s0 + $0x30] sm:$0xe]  ;;  %v2050_v62 = vshll.u32 %v4538_v37, 16  ;;  %v3270_v53 = vld [vmem:[%s4947_s0 + $0x40] sm:$0xf] }
  0xc3   :  { %2299 = vmatmul.bf16.vlgmr.msra.gmra.mxu3 %v2227_v46 }
  0xc4   :  { %v800_v22 = vpop.f32.mrf.mxu2  ;;  %v2415_v6 = vsel %vm3928_vm5, %v3356_v35, %v2414_v45  ;;  %v1539_v35 = vrot.slane %v4105_v28, 5  ;;  %v2034_v45 = vrot.slane %v2033_v14, 4  ;;  %v1536_v28 = vsel %vm3928_vm5, %v3102_v27, %v1535_v31 }
  0xc5   :  { %v840_v29 = vadd.f32 %v800_v22, %v540_v60  ;;  %2573 = vmatmul.bf16.vlgmr.msra.gmra.mxu0 %v2501_v11  ;;  %v4533_v60 = vld [vmem:[%s4947_s0 + $0x34] sm:$0x1]  ;;  %v2214_v11 = vunpack.c.l.b16 %v2025_v5  ;;  %v2487_v21 = vunpack.c.l.b16 %v2415_v6  ;;  %v3103_v5 = vrot.slane %v3087_v18, 9 }
  0xc6   :  { %v995_v7 = vpop.f32.mrf.mxu3  ;;  %v541_v32 = vpop.f32.mrf.mxu1  ;;  %v2036_v19 = vshll.u32 %v4533_v60, 16  ;;  %v2055_v18 = vshrl.u32 %v3270_v53, 16  ;;  %v2058_v14 = vshll.u32 %v3270_v53, 16 }
  0xc7   :  { %v1035_v46 = vadd.f32 %v995_v7, %v840_v29  ;;  %v542_v47 = vadd.f32 %v541_v32, %v4415_v25  ;;  %v2228_v29 = vpack.c.b16 %v2214_v11, %v2213_v61  ;;  %v2488_v7 = vunpack.c.l.b16 %v2419_v13 }
  0xc8   :  { %v1540_v58 = vsel %vm3928_vm5, %v3103_v5, %v1539_v35  ;;  %v3358_v61 = vrot.slane %v3342_v1, 9  ;;  %v2422_v13 = vrot.slane %v4533_v60, 5  ;;  %v3484_v60 = vld [vmem:[%s4947_s0 + $0x34] sm:$0xf0]  ;;  %v2060_v27 = vrot.slane %v2058_v14, 5 }
  0xc9   :  { %v4540_v25 = vadd.f32 %v1413_v51, %v1035_v46  ;;  %v2047_v51 = vor.u32 %v2046_v55, %v2043_v54  ;;  %v2038_v46 = vrot.slane %v2036_v19, 5  ;;  %v2502_v48 = vpack.c.b16 %v2488_v7, %v2487_v21  ;;  %v3272_v54 = vld [vmem:[%s4947_s0 + $0x48] sm:$0xf]  ;;  %v3204_v21 = vld [vmem:[%s4947_s0 + $0x30] sm:$0xf] }
  0xca   :  { %v1415_v8 = vpop.f32.mrf.mxu0  ;;  %v2069_v19 = vshrl.u32 %v3272_v54, 16  ;;  %v4603_v5 = vld [vmem:[%s4947_s0 + $0x44] sm:$0x1]  ;;  %v4608_v35 = vld [vmem:[%s4947_s0 + $0x4c] sm:$0x1] }
  0xcb   :  { %v2048_v56 = vrot.slane %v2047_v51, 4  ;;  %v2039_v40 = vsel %vm3661_vm2, %v2034_v45, %v2038_v46  ;;  %v2072_v51 = vshll.u32 %v3272_v54, 16  ;;  %v3089_v54 = vld [vmem:[%s4947_s0 + $0x40] sm:$0xe] }
  0xcc   :  { %v802_v39 = vpop.f32.mrf.mxu2  ;;  %v2071_v31 = vrot.slane %v2069_v19, 4 }
  0xcd   :  { %v841_v22 = vadd.f32 %v802_v39, %v542_v47  ;;  %v2052_v47 = vrot.slane %v2050_v62, 5  ;;  %v2426_v39 = vrot.slane %v4538_v37, 5 }
  0xce   :  { %v997_v4 = vpop.f32.mrf.mxu3  ;;  %v544_v26 = vpop.f32.mrf.mxu1 }
  0xcf   :  { %v1036_v32 = vadd.f32 %v997_v4, %v841_v22  ;;  %v545_v41 = vadd.f32 %v544_v26, %v4451_v2  ;;  %v2053_v63 = vsel %vm3661_vm2, %v2048_v56, %v2052_v47  ;;  %v1602_v4 = vunpack.c.l.b16 %v1536_v28  ;;  %v3088_v28 = vld [vmem:[%s4947_s0 + $0x38] sm:$0xe] }
  0xd0   :  { %v2216_v37 = vunpack.c.l.b16 %v2053_v63  ;;  %v2423_v26 = vsel %vm3928_vm5, %v3358_v61, %v2422_v13  ;;  %v3205_v56 = vor.u32 %v3484_v60, %v3204_v21  ;;  %v2078_v63 = vshll.u32 %v4608_v35, 16 }
  0xd1   :  { %1691 = vmatmul.bf16.gmra.mxu1 %v1615_v23  ;;  %1886 = vmatmul.bf16.gmra.mxu2 %v3201_v24  ;;  %v4577_v55 = vadd.f32 %v1415_v8, %v1036_v32  ;;  %v1603_v23 = vunpack.c.l.b16 %v1540_v58  ;;  %v2215_v24 = vunpack.c.l.b16 %v2039_v40  ;;  %v2074_v32 = vrot.slane %v2072_v51, 5 }
  0xd2   :  { %v1418_v2 = vpop.f32.mrf.mxu0  ;;  %v2489_v33 = vunpack.c.l.b16 %v2423_v26  ;;  %v2064_v58 = vshll.u32 %v4603_v5, 16  ;;  %v1543_v13 = vrot.slane %v4148_v10, 5 }
  0xd3   :  { %2304 = vmatmul.bf16.gmra.mxu3 %v2228_v29  ;;  %v2427_v29 = vsel %vm3928_vm5, %v3359_v17, %v2426_v39  ;;  %v1616_v46 = vpack.c.b16 %v1603_v23, %v1602_v4  ;;  %v2075_v40 = vor.u32 %v2074_v32, %v2071_v31  ;;  %v3105_v39 = vrot.slane %v3089_v54, 9 }
  0xd4   :  { %v805_v57 = vpop.f32.mrf.mxu2  ;;  %v2066_v19 = vrot.slane %v2064_v58, 5 }
  0xd5   :  { %v842_v11 = vadd.f32 %v805_v57, %v545_v41  ;;  %2578 = vmatmul.bf16.gmra.mxu0 %v2502_v48  ;;  %v2229_v48 = vpack.c.b16 %v2216_v37, %v2215_v24  ;;  %v2076_v51 = vrot.slane %v2075_v40, 4  ;;  %v3345_v24 = vld [vmem:[%s4947_s0 + $0x48] sm:$0xe] }
  0xd6   :  { %v1000_v6 = vpop.f32.mrf.mxu3  ;;  %v546_v8 = vpop.f32.mrf.mxu1 }
  0xd7   :  { %v1037_v62 = vadd.f32 %v1000_v6, %v842_v11  ;;  %v547_v22 = vadd.f32 %v546_v8, %v4479_v36  ;;  %v2057_v36 = vrot.slane %v2055_v18, 4  ;;  %v3104_v6 = vrot.slane %v3088_v28, 9  ;;  %v3274_v18 = vld [vmem:[%s4947_s0 + $0x60] sm:$0xf] }
  0xd8   :  { %v1547_v8 = vrot.slane %v4153_v12, 5  ;;  %v2083_v21 = vshrl.u32 %v3274_v18, 16  ;;  %v2086_v60 = vshll.u32 %v3274_v18, 16 }
  0xd9   :  { %v4598_v7 = vadd.f32 %v1418_v2, %v1037_v62  ;;  %v2490_v2 = vunpack.c.l.b16 %v2427_v29  ;;  %v2061_v57 = vor.u32 %v2060_v27, %v2057_v36  ;;  %v2080_v62 = vrot.slane %v2078_v63, 5 }
  0xda   :  { %v1420_v41 = vpop.f32.mrf.mxu0  ;;  %v1544_v23 = vsel %vm3928_vm5, %v3104_v6, %v1543_v13  ;;  %v1548_v29 = vsel %vm3928_vm5, %v3105_v39, %v1547_v8  ;;  %v2085_v28 = vrot.slane %v2083_v21, 4  ;;  %v3090_v8 = vld [vmem:[%s4947_s0 + $0x58] sm:$0xe] }
  0xdb   :  { %v2503_v17 = vpack.c.b16 %v2490_v2, %v2489_v33  ;;  %v2062_v14 = vrot.slane %v2061_v57, 4  ;;  %v1604_v33 = vunpack.c.l.b16 %v1544_v23  ;;  %v3208_v2 = vld [vmem:[%s4947_s0 + $0x40] sm:$0xf]  ;;  %v1605_v54 = vunpack.c.l.b16 %v1548_v29  ;;  %v3485_v57 = vld [vmem:[%s4947_s0 + $0x44] sm:$0xf0] }
  0xdc   :  { %v807_v45 = vpop.f32.mrf.mxu2  ;;  %v3209_v39 = vor.u32 %v3485_v57, %v3208_v2  ;;  %v1551_v29 = vrot.slane %v4201_v49, 5  ;;  %v3347_v49 = vld [vmem:[%s4947_s0 + $0x68] sm:$0xe] }
  0xdd   :  { %v843_v47 = vadd.f32 %v807_v45, %v547_v22  ;;  %v3344_v22 = vld [vmem:[%s4947_s0 + $0x40] sm:$0xe]  ;;  %v2067_v32 = vsel %vm3661_vm2, %v2062_v14, %v2066_v19 }
  0xde   :  { %v1002_v1 = vpop.f32.mrf.mxu3  ;;  %v549_v53 = vpop.f32.mrf.mxu1  ;;  %v3360_v45 = vrot.slane %v3344_v22, 9  ;;  %v2217_v40 = vunpack.c.l.b16 %v2067_v32 }
  0xdf   :  { %v1038_v61 = vadd.f32 %v1002_v1, %v843_v47  ;;  %v550_v11 = vadd.f32 %v549_v53, %v4371_v34  ;;  %v3276_v34 = vld [vmem:[%s4947_s0 + $0x68] sm:$0xf]  ;;  %v3361_v1 = vrot.slane %v3345_v24, 9  ;;  %v2088_v53 = vrot.slane %v2086_v60, 5 }
  0xe0   :  { %v2097_v36 = vshrl.u32 %v3276_v34, 16  ;;  %v2100_v27 = vshll.u32 %v3276_v34, 16  ;;  %v3091_v34 = vld [vmem:[%s4947_s0 + $0x60] sm:$0xe] }
  0xe1   :  { %1696 = vmatmul.bf16.gmra.mxu1 %v1616_v46  ;;  %1891 = vmatmul.bf16.gmra.mxu2 %v3205_v56  ;;  %v4630_v4 = vadd.f32 %v1420_v41, %v1038_v61  ;;  %v2081_v41 = vsel %vm3661_vm2, %v2076_v51, %v2080_v62  ;;  %v2430_v46 = vrot.slane %v4603_v5, 5  ;;  %v4655_v5 = vld [vmem:[%s4947_s0 + $0x64] sm:$0x1]  ;;  %v4662_v61 = vld [vmem:[%s4947_s0 + $0x6c] sm:$0x1]  ;;  %v2089_v18 = vor.u32 %v2088_v53, %v2085_v28 }
  0xe2   :  { %v1423_v10 = vpop.f32.mrf.mxu0  ;;  %v2102_v58 = vrot.slane %v2100_v27, 5  ;;  %v2218_v63 = vunpack.c.l.b16 %v2081_v41  ;;  %v2092_v14 = vshll.u32 %v4655_v5, 16  ;;  %v1617_v62 = vpack.c.b16 %v1605_v54, %v1604_v33  ;;  %v3280_v28 = vld [vmem:[%s4947_s0 + $0x78] sm:$0xf] }
  0xe3   :  { %2309 = vmatmul.bf16.gmra.mxu3 %v2229_v48  ;;  %v2434_v48 = vrot.slane %v4608_v35, 5  ;;  %v2431_v6 = vsel %vm3928_vm5, %v3360_v45, %v2430_v46  ;;  %v2106_v22 = vshll.u32 %v4662_v61, 16  ;;  %v1555_v27 = vrot.slane %v4206_v50, 5  ;;  %v3278_v50 = vld [vmem:[%s4947_s0 + $0x70] sm:$0xf] }
  0xe4   :  { %v810_v12 = vpop.f32.mrf.mxu2  ;;  %v2230_v23 = vpack.c.b16 %v2218_v63, %v2217_v40  ;;  %v2491_v24 = vunpack.c.l.b16 %v2431_v6  ;;  %v2094_v32 = vrot.slane %v2092_v14, 5  ;;  %v3363_v63 = vrot.slane %v3347_v49, 9 }
  0xe5   :  { %v844_v37 = vadd.f32 %v810_v12, %v550_v11  ;;  %2583 = vmatmul.bf16.gmra.mxu0 %v2503_v17  ;;  %v2435_v13 = vsel %vm3928_vm5, %v3361_v1, %v2434_v48  ;;  %v2108_v45 = vrot.slane %v2106_v22, 5  ;;  %v2111_v6 = vshrl.u32 %v3278_v50, 16 }
  0xe6   :  { %v1005_v26 = vpop.f32.mrf.mxu3  ;;  %v551_v31 = vpop.f32.mrf.mxu1  ;;  %v2492_v21 = vunpack.c.l.b16 %v2435_v13  ;;  %v2114_v13 = vshll.u32 %v3278_v50, 16 }
  0xe7   :  { %v1039_v56 = vadd.f32 %v1005_v26, %v844_v37  ;;  %v552_v47 = vadd.f32 %v551_v31, %v4409_v15  ;;  %v2099_v15 = vrot.slane %v2097_v36, 4  ;;  %v3106_v26 = vrot.slane %v3090_v8, 9 }
  0xe8   :  { %v3107_v36 = vrot.slane %v3091_v34, 9  ;;  %v2090_v31 = vrot.slane %v2089_v18, 4  ;;  %v2504_v46 = vpack.c.b16 %v2492_v21, %v2491_v24  ;;  %v2125_v8 = vshrl.u32 %v3280_v28, 16  ;;  %v4719_v24 = vld [vmem:[%s4947_s0 + $0x74] sm:$0x1] }
  0xe9   :  { %v4657_v35 = vadd.f32 %v1423_v10, %v1039_v56  ;;  %v2103_v10 = vor.u32 %v2102_v58, %v2099_v15  ;;  %v3346_v56 = vld [vmem:[%s4947_s0 + $0x60] sm:$0xe]  ;;  %v1552_v48 = vsel %vm3928_vm5, %v3106_v26, %v1551_v29  ;;  %v2438_v58 = vrot.slane %v4655_v5, 5  ;;  %v3486_v5 = vld [vmem:[%s4947_s0 + $0x64] sm:$0xf0] }
  0xea   :  { %v1425_v11 = vpop.f32.mrf.mxu0  ;;  %v1556_v33 = vsel %vm3928_vm5, %v3107_v36, %v1555_v27  ;;  %v2095_v2 = vsel %vm3661_vm2, %v2090_v31, %v2094_v32  ;;  %v3362_v15 = vrot.slane %v3346_v56, 9  ;;  %v2128_v18 = vshll.u32 %v3280_v28, 16  ;;  %v4724_v29 = vld [vmem:[%s4947_s0 + $0x7c] sm:$0x1]  ;;  %v3092_v56 = vld [vmem:[%s4947_s0 + $0x68] sm:$0xe] }
  0xeb   :  { %v2104_v41 = vrot.slane %v2103_v10, 4  ;;  %v1606_v14 = vunpack.c.l.b16 %v1552_v48  ;;  %v2113_v22 = vrot.slane %v2111_v6, 4  ;;  %v2127_v21 = vrot.slane %v2125_v8, 4  ;;  %v3284_v6 = vld [vmem:[%s4947_s0 + $0x88] sm:$0xf] }
  0xec   :  { %v812_v17 = vpop.f32.mrf.mxu2  ;;  %v2439_v10 = vsel %vm3928_vm5, %v3362_v15, %v2438_v58  ;;  %v2120_v49 = vshll.u32 %v4719_v24, 16  ;;  %v3108_v28 = vrot.slane %v3092_v56, 9  ;;  %v3592_v58 = vld [vmem:[%s4947_s0 + $0x74] sm:$0x1] }
  0xed   :  { %v845_v19 = vadd.f32 %v812_v17, %v552_v47  ;;  %v2109_v57 = vsel %vm3661_vm2, %v2104_v41, %v2108_v45  ;;  %v2493_v32 = vunpack.c.l.b16 %v2439_v10 }
  0xee   :  { %v1007_v51 = vpop.f32.mrf.mxu3  ;;  %v554_v12 = vpop.f32.mrf.mxu1  ;;  %v2220_v34 = vunpack.c.l.b16 %v2109_v57  ;;  %v3282_v57 = vld [vmem:[%s4947_s0 + $0x80] sm:$0xf] }
  0xef   :  { %v1040_v60 = vadd.f32 %v1007_v51, %v845_v19  ;;  %v555_v37 = vadd.f32 %v554_v12, %v4443_v52  ;;  %v1607_v19 = vunpack.c.l.b16 %v1556_v33  ;;  %v3212_v51 = vld [vmem:[%s4947_s0 + $0x60] sm:$0xf]  ;;  %v2116_v12 = vrot.slane %v2114_v13, 5 }
  0xf0   :  { %v3213_v26 = vor.u32 %v3486_v5, %v3212_v51  ;;  %v2134_v33 = vshll.u32 %v4724_v29, 16  ;;  %v3349_v51 = vld [vmem:[%s4947_s0 + $0x78] sm:$0xe]  ;;  %v2139_v5 = vshrl.u32 %v3282_v57, 16 }
  0xf1   :  { %1701 = vmatmul.bf16.gmra.mxu1 %v1617_v62  ;;  %1896 = vmatmul.bf16.gmra.mxu2 %v3209_v39  ;;  %v4688_v52 = vadd.f32 %v1425_v11, %v1040_v60  ;;  %v2442_v11 = vrot.slane %v4662_v61, 5  ;;  %v2219_v62 = vunpack.c.l.b16 %v2095_v2  ;;  %v2130_v60 = vrot.slane %v2128_v18, 5  ;;  %v3348_v18 = vld [vmem:[%s4947_s0 + $0x70] sm:$0xe] }
  0xf2   :  { %v1428_v47 = vpop.f32.mrf.mxu0  ;;  %v1618_v31 = vpack.c.b16 %v1607_v19, %v1606_v14  ;;  %v2136_v8 = vrot.slane %v2134_v33, 5  ;;  %v4781_v33 = vld [vmem:[%s4947_s0 + $0x8c] sm:$0x1] }
  0xf3   :  { %2314 = vmatmul.bf16.gmra.mxu3 %v2230_v23  ;;  %v2131_v48 = vor.u32 %v2130_v60, %v2127_v21  ;;  %v3364_v60 = vrot.slane %v3348_v18, 9 }
  0xf4   :  { %v815_v1 = vpop.f32.mrf.mxu2 }
  0xf5   :  { %v846_v53 = vadd.f32 %v815_v1, %v555_v37  ;;  %2588 = vmatmul.bf16.gmra.mxu0 %v2504_v46  ;;  %v2231_v46 = vpack.c.b16 %v2220_v34, %v2219_v62  ;;  %v3093_v1 = vld [vmem:[%s4947_s0 + $0x70] sm:$0xe]  ;;  %v2142_v62 = vshll.u32 %v3282_v57, 16 }
  0xf6   :  { %v1010_v54 = vpop.f32.mrf.mxu3  ;;  %v556_v40 = vpop.f32.mrf.mxu1  ;;  %v3109_v15 = vrot.slane %v3093_v1, 9 }
  0xf7   :  { %v1041_v17 = vadd.f32 %v1010_v54, %v846_v53  ;;  %v557_v39 = vadd.f32 %v556_v40, %v4467_v20  ;;  %v2443_v20 = vsel %vm3928_vm5, %v3363_v63, %v2442_v11  ;;  %v3591_v53 = vld [vmem:[%s4947_s0 + $0x6c] sm:$0x1]  ;;  %v1563_v40 = vrot.slane %v3592_v58, 5  ;;  %v3094_v58 = vld [vmem:[%s4947_s0 + $0x78] sm:$0xe] }
  0xf8   :  { %v2494_v41 = vunpack.c.l.b16 %v2443_v20  ;;  %v1559_v54 = vrot.slane %v3591_v53, 5  ;;  %v2122_v11 = vrot.slane %v2120_v49, 5  ;;  %v2153_v20 = vshrl.u32 %v3284_v6, 16 }
  0xf9   :  { %v4710_v61 = vadd.f32 %v1428_v47, %v1041_v17  ;;  %v2117_v47 = vor.u32 %v2116_v12, %v2113_v22  ;;  %v2156_v22 = vshll.u32 %v3284_v6, 16 }
  0xfa   :  { %v1430_v23 = vpop.f32.mrf.mxu0  ;;  %v2505_v2 = vpack.c.b16 %v2494_v41, %v2493_v32  ;;  %v3216_v41 = vld [vmem:[%s4947_s0 + $0x70] sm:$0xf]  ;;  %v2155_v49 = vrot.slane %v2153_v20, 4  ;;  %v3594_v20 = vld [vmem:[%s4947_s0 + $0x84] sm:$0x1] }
  0xfb   :  { %v2118_v63 = vrot.slane %v2117_v47, 4  ;;  %v3487_v47 = vld [vmem:[%s4947_s0 + $0x74] sm:$0xf0] }
  0xfc   :  { %v817_v37 = vpop.f32.mrf.mxu2 }
  0xfd   :  { %v847_v36 = vadd.f32 %v817_v37, %v557_v39  ;;  %v2132_v39 = vrot.slane %v2131_v48, 4  ;;  %v2123_v21 = vsel %vm3661_vm2, %v2118_v63, %v2122_v11  ;;  %v2446_v37 = vrot.slane %v4719_v24, 5  ;;  %v4774_v24 = vld [vmem:[%s4947_s0 + $0x84] sm:$0x1] }
  0xfe   :  { %v1012_v27 = vpop.f32.mrf.mxu3  ;;  %v559_v45 = vpop.f32.mrf.mxu1  ;;  %v2221_v1 = vunpack.c.l.b16 %v2123_v21  ;;  %v2148_v63 = vshll.u32 %v4774_v24, 16 }
  0xff   :  { %v1042_v50 = vadd.f32 %v1012_v27, %v847_v36  ;;  %v560_v13 = vadd.f32 %v559_v45, %v4405_v3  ;;  %v1560_v3 = vsel %vm3928_vm5, %v3108_v28, %v1559_v54  ;;  %v2137_v36 = vsel %vm3661_vm2, %v2132_v39, %v2136_v8 }
 0x100   :  { %v3365_v27 = vrot.slane %v3349_v51, 9  ;;  %v1608_v32 = vunpack.c.l.b16 %v1560_v3  ;;  %v2141_v45 = vrot.slane %v2139_v5, 4  ;;  %v2222_v48 = vunpack.c.l.b16 %v2137_v36 }
 0x101   :  { %1706 = vmatmul.bf16.gmra.mxu1 %v1618_v31  ;;  %1901 = vmatmul.bf16.gmra.mxu2 %v3213_v26  ;;  %v4750_v14 = vadd.f32 %v1430_v23, %v1042_v50  ;;  %v1564_v23 = vsel %vm3928_vm5, %v3109_v15, %v1563_v40  ;;  %v2450_v31 = vrot.slane %v4724_v29, 5  ;;  %v2158_v50 = vrot.slane %v2156_v22, 5 }
 0x102   :  { %v1433_v17 = vpop.f32.mrf.mxu0  ;;  %v1609_v56 = vunpack.c.l.b16 %v1564_v23  ;;  %v2447_v53 = vsel %vm3928_vm5, %v3364_v60, %v2446_v37  ;;  %v3217_v15 = vor.u32 %v3487_v47, %v3216_v41  ;;  %v2162_v39 = vshll.u32 %v4781_v33, 16  ;;  %v3288_v47 = vld [vmem:[%s4947_s0 + $0x98] sm:$0xf] }
 0x103   :  { %2319 = vmatmul.bf16.gmra.mxu3 %v2231_v46  ;;  %v2144_v46 = vrot.slane %v2142_v62, 5  ;;  %v2451_v54 = vsel %vm3928_vm5, %v3365_v27, %v2450_v31  ;;  %v2232_v18 = vpack.c.b16 %v2222_v48, %v2221_v1  ;;  %v3110_v62 = vrot.slane %v3094_v58, 9  ;;  %v3351_v31 = vld [vmem:[%s4947_s0 + $0x88] sm:$0xe] }
 0x104   :  { %v820_v19 = vpop.f32.mrf.mxu2  ;;  %v2496_v51 = vunpack.c.l.b16 %v2451_v54  ;;  %v1571_v22 = vrot.slane %v3594_v20, 5  ;;  %v2150_v23 = vrot.slane %v2148_v63, 5  ;;  %v2164_v60 = vrot.slane %v2162_v39, 5 }
 0x105   :  { %v848_v34 = vadd.f32 %v820_v19, %v560_v13  ;;  %2593 = vmatmul.bf16.gmra.mxu0 %v2505_v2  ;;  %v2145_v40 = vor.u32 %v2144_v46, %v2141_v45  ;;  %v1619_v13 = vpack.c.b16 %v1609_v56, %v1608_v32  ;;  %v2495_v19 = vunpack.c.l.b16 %v2447_v53  ;;  %v3286_v32 = vld [vmem:[%s4947_s0 + $0x90] sm:$0xf] }
 0x106   :  { %v1015_v10 = vpop.f32.mrf.mxu3  ;;  %v561_v12 = vpop.f32.mrf.mxu1  ;;  %v3367_v53 = vrot.slane %v3351_v31, 9  ;;  %v2458_v54 = vrot.slane %v4781_v33, 5  ;;  %v2184_v63 = vshll.u32 %v3288_v47, 16 }
 0x107   :  { %v1043_v26 = vadd.f32 %v1015_v10, %v848_v34  ;;  %v562_v2 = vadd.f32 %v561_v12, %v4439_v38  ;;  %v3095_v38 = vld [vmem:[%s4947_s0 + $0x80] sm:$0xe]  ;;  %v3593_v34 = vld [vmem:[%s4947_s0 + $0x7c] sm:$0x1]  ;;  %v2146_v12 = vrot.slane %v2145_v40, 4  ;;  %v2506_v37 = vpack.c.b16 %v2496_v51, %v2495_v19 }
 0x108   :  { %v1567_v10 = vrot.slane %v3593_v34, 5  ;;  %v3111_v3 = vrot.slane %v3095_v38, 9  ;;  %v2181_v40 = vshrl.u32 %v3288_v47, 16 }
 0x109   :  { %v4776_v29 = vadd.f32 %v1433_v17, %v1043_v26  ;;  %v2159_v17 = vor.u32 %v2158_v50, %v2155_v49  ;;  %v3350_v26 = vld [vmem:[%s4947_s0 + $0x80] sm:$0xe] }
 0x10a   :  { %v1435_v28 = vpop.f32.mrf.mxu0  ;;  %v1568_v46 = vsel %vm3928_vm5, %v3110_v62, %v1567_v10  ;;  %v1572_v56 = vsel %vm3928_vm5, %v3111_v3, %v1571_v22  ;;  %v3366_v48 = vrot.slane %v3350_v26, 9  ;;  %v4843_v62 = vld [vmem:[%s4947_s0 + $0x94] sm:$0x1]  ;;  %v2183_v34 = vrot.slane %v2181_v40, 4  ;;  %v3289_v22 = vld [vmem:[%s4947_s0 + $0x9c] sm:$0x1] }
 0x10b   :  { %v2160_v21 = vrot.slane %v2159_v17, 4  ;;  %v2186_v10 = vrot.slane %v2184_v63, 5  ;;  %v2176_v31 = vshll.u32 %v4843_v62, 16  ;;  %v3352_v63 = vld [vmem:[%s4947_s0 + $0x90] sm:$0xe] }
 0x10c   :  { %v822_v57 = vpop.f32.mrf.mxu2 }
 0x10d   :  { %v849_v11 = vadd.f32 %v822_v57, %v562_v2  ;;  %v2165_v1 = vsel %vm3661_vm2, %v2160_v21, %v2164_v60  ;;  %v2454_v2 = vrot.slane %v4774_v24, 5  ;;  %v2167_v57 = vshrl.u32 %v3286_v32, 16  ;;  %v3488_v24 = vld [vmem:[%s4947_s0 + $0x84] sm:$0xf0] }
 0x10e   :  { %v1017_v6 = vpop.f32.mrf.mxu3  ;;  %v564_v8 = vpop.f32.mrf.mxu1  ;;  %v2224_v17 = vunpack.c.l.b16 %v2165_v1 }
 0x10f   :  { %v1044_v5 = vadd.f32 %v1017_v6, %v849_v11  ;;  %v565_v36 = vadd.f32 %v564_v8, %v4459_v59  ;;  %v2151_v59 = vsel %vm3661_vm2, %v2146_v12, %v2150_v23  ;;  %v1610_v11 = vunpack.c.l.b16 %v1568_v46 }
 0x110   :  { %v1611_v6 = vunpack.c.l.b16 %v1572_v56  ;;  %v2223_v38 = vunpack.c.l.b16 %v2151_v59  ;;  %v2455_v33 = vsel %vm3928_vm5, %v3366_v48, %v2454_v2  ;;  %v2459_v8 = vsel %vm3928_vm5, %v3367_v53, %v2458_v54  ;;  %v3596_v2 = vld [vmem:[%s4947_s0 + $0x94] sm:$0x1] }
 0x111   :  { %1711 = vmatmul.bf16.gmra.mxu1 %v1619_v13  ;;  %1906 = vmatmul.bf16.gmra.mxu2 %v3217_v15  ;;  %v4812_v41 = vadd.f32 %v1435_v28, %v1044_v5  ;;  %v2170_v15 = vshll.u32 %v3286_v32, 16  ;;  %v3220_v13 = vld [vmem:[%s4947_s0 + $0x80] sm:$0xf]  ;;  %v2497_v60 = vunpack.c.l.b16 %v2455_v33  ;;  %v2187_v46 = vor.u32 %v2186_v10, %v2183_v34 }
 0x112   :  { %v1438_v27 = vpop.f32.mrf.mxu0  ;;  %v3221_v20 = vor.u32 %v3488_v24, %v3220_v13  ;;  %v1620_v21 = vpack.c.b16 %v1611_v6, %v1610_v11  ;;  %v2233_v26 = vpack.c.b16 %v2224_v17, %v2223_v38  ;;  %v2190_v56 = vshll.u32 %v3289_v22, 16  ;;  %v3353_v6 = vld [vmem:[%s4947_s0 + $0x98] sm:$0xe] }
 0x113   :  { %2324 = vmatmul.bf16.gmra.mxu3 %v2232_v18  ;;  %v2169_v18 = vrot.slane %v2167_v57, 4  ;;  %v2172_v19 = vrot.slane %v2170_v15, 5  ;;  %v2178_v54 = vrot.slane %v2176_v31, 5  ;;  %v2466_v34 = vrot.slane %v3289_v22, 5 }
 0x114   :  { %v825_v45 = vpop.f32.mrf.mxu2  ;;  %v2192_v40 = vrot.slane %v2190_v56, 5 }
 0x115   :  { %v850_v49 = vadd.f32 %v825_v45, %v565_v36  ;;  %2598 = vmatmul.bf16.gmra.mxu0 %v2506_v37  ;;  %v2498_v37 = vunpack.c.l.b16 %v2459_v8  ;;  %v3096_v36 = vld [vmem:[%s4947_s0 + $0x88] sm:$0xe]  ;;  %v3097_v45 = vld [vmem:[%s4947_s0 + $0x90] sm:$0xe]  ;;  %v3368_v8 = vrot.slane %v3352_v63, 9 }
 0x116   :  { %v1020_v50 = vpop.f32.mrf.mxu3  ;;  %v566_v28 = vpop.f32.mrf.mxu1  ;;  %v3112_v47 = vrot.slane %v3096_v36, 9  ;;  %v3113_v48 = vrot.slane %v3097_v45, 9 }
 0x117   :  { %v1045_v58 = vadd.f32 %v1020_v50, %v850_v49  ;;  %v567_v51 = vadd.f32 %v566_v28, %v4491_v42  ;;  %v2507_v59 = vpack.c.b16 %v2498_v37, %v2497_v60  ;;  %v3595_v49 = vld [vmem:[%s4947_s0 + $0x8c] sm:$0x1]  ;;  %v1579_v28 = vrot.slane %v3596_v2, 5 }
 0x118   :  { %v1575_v50 = vrot.slane %v3595_v49, 5 }
 0x119   :  { %v4833_v39 = vadd.f32 %v1438_v27, %v1045_v58  ;;  %v2173_v27 = vor.u32 %v2172_v19, %v2169_v18  ;;  %v2188_v58 = vrot.slane %v2187_v46, 4  ;;  %v2462_v18 = vrot.slane %v4843_v62, 5 }
 0x11a   :  { %v1440_v5 = vpop.f32.mrf.mxu0  ;;  %v1576_v38 = vsel %vm3928_vm5, %v3112_v47, %v1575_v50 }
 0x11b   :  { %v2174_v53 = vrot.slane %v2173_v27, 4  ;;  %v1612_v10 = vunpack.c.l.b16 %v1576_v38  ;;  %v2463_v22 = vsel %vm3928_vm5, %v3368_v8, %v2462_v18 }
 0x11c   :  { %v827_v3 = vpop.f32.mrf.mxu2  ;;  %v2499_v46 = vunpack.c.l.b16 %v2463_v22 }
 0x11d   :  { %v851_v12 = vadd.f32 %v827_v3, %v567_v51  ;;  %v2179_v33 = vsel %vm3661_vm2, %v2174_v53, %v2178_v54  ;;  %v2193_v51 = vsel %vm3661_vm2, %v2188_v58, %v2192_v40 }
 0x11e   :  { %v1022_v23 = vpop.f32.mrf.mxu3  ;;  %v569_v42 = vpop.f32.mrf.mxu1  ;;  %v2226_v62 = vunpack.c.l.b16 %v2193_v51 }
 0x11f   :  { %v1046_v32 = vadd.f32 %v1022_v23, %v851_v12  ;;  %v570_v57 = vadd.f32 %v569_v42, %v4407_v9  ;;  %v1580_v9 = vsel %vm3928_vm5, %v3113_v48, %v1579_v28  ;;  %v3224_v12 = vld [vmem:[%s4947_s0 + $0x90] sm:$0xf]  ;;  %v3489_v23 = vld [vmem:[%s4947_s0 + $0x94] sm:$0xf0] }
 0x120   :  { %v1613_v3 = vunpack.c.l.b16 %v1580_v9  ;;  %v3225_v31 = vor.u32 %v3489_v23, %v3224_v12 }
 0x121   :  { %1716 = vmatmul.bf16.gmra.mxu1 %v1620_v21  ;;  %1911 = vmatmul.bf16.gmra.mxu2 %v3221_v20  ;;  %v4858_v1 = vadd.f32 %v1440_v5, %v1046_v32  ;;  %v3369_v5 = vrot.slane %v3353_v6, 9  ;;  %v2225_v21 = vunpack.c.l.b16 %v2179_v33 }
 0x122   :  { %v1443_v15 = vpop.f32.mrf.mxu0  ;;  %v1621_v27 = vpack.c.b16 %v1613_v3, %v1612_v10 }
 0x123   :  { %2329 = vmatmul.bf16.gmra.mxu3 %v2233_v26  ;;  %v2467_v37 = vsel %vm3928_vm5, %v3369_v5, %v2466_v34  ;;  %v2234_v45 = vpack.c.b16 %v2226_v62, %v2225_v21 }
 0x124   :  { %v830_v11 = vpop.f32.mrf.mxu2  ;;  %v2500_v56 = vunpack.c.l.b16 %v2467_v37 }
 0x125   :  { %v852_v13 = vadd.f32 %v830_v11, %v570_v57  ;;  %2603 = vmatmul.bf16.gmra.mxu0 %v2507_v59 }
 0x126   :  { %v1025_v24 = vpop.f32.mrf.mxu3  ;;  %v571_v17 = vpop.f32.mrf.mxu1  ;;  %v2508_v47 = vpack.c.b16 %v2500_v56, %v2499_v46 }
 0x127   :  { %v1047_v19 = vadd.f32 %v1025_v24, %v852_v13  ;;  %v572_v60 = vadd.f32 %v571_v17, %v4441_v43 }
 0x129   :  { %v4879_v20 = vadd.f32 %v1443_v15, %v1047_v19 }
 0x12a   :  { %v1445_v30 = vpop.f32.mrf.mxu0 }
 0x12c   :  { %v832_v42 = vpop.f32.mrf.mxu2 }
 0x12d   :  { %v853_v26 = vadd.f32 %v832_v42, %v572_v60 }
 0x12e   :  { %v1027_v36 = vpop.f32.mrf.mxu3  ;;  %v574_v32 = vpop.f32.mrf.mxu1 }
 0x12f   :  { %v1048_v59 = vadd.f32 %v1027_v36, %v853_v26  ;;  %v575_v49 = vadd.f32 %v574_v32, %v4463_v0 }
 0x131   :  { %1721 = vmatmul.bf16.gmra.mxu1 %v1621_v27  ;;  %1916 = vmatmul.bf16.gmra.mxu2 %v3225_v31  ;;  %v4892_v43 = vadd.f32 %v1445_v30, %v1048_v59 }
 0x132   :  { %v1448_v16 = vpop.f32.mrf.mxu0 }
 0x133   :  { %2334 = vmatmul.bf16.gmra.mxu3 %v2234_v45 }
 0x134   :  { %v835_v50 = vpop.f32.mrf.mxu2 }
 0x135   :  { %v854_v48 = vadd.f32 %v835_v50, %v575_v49  ;;  %2608 = vmatmul.bf16.gmra.mxu0 %v2508_v47 }
 0x136   :  { %v1030_v2 = vpop.f32.mrf.mxu3  ;;  %v576_v28 = vpop.f32.mrf.mxu1 }
 0x137   :  { %v1049_v53 = vadd.f32 %v1030_v2, %v854_v48  ;;  %v577_v57 = vadd.f32 %v576_v28, %v4493_v44 }
 0x139   :  { %v4895_v54 = vadd.f32 %v1448_v16, %v1049_v53 }
 0x13a   :  { %v1450_v15 = vpop.f32.mrf.mxu0 }
 0x13c   :  { %v837_v58 = vpop.f32.mrf.mxu2 }
 0x13d   :  { %v855_v40 = vadd.f32 %v837_v58, %v577_v57 }
 0x13e   :  { %v1032_v63 = vpop.f32.mrf.mxu3  ;;  %v1687_v11 = vpop.f32.mrf.mxu1 }
 0x13f   :  { %v1050_v6 = vadd.f32 %v1032_v63, %v855_v40  ;;  %v1727_v24 = vadd.f32 %v1687_v11, %v4540_v25 }
 0x141   :  { %v4898_v13 = vadd.f32 %v1450_v15, %v1050_v6 }
 0x142   :  { %v2574_v0 = vpop.f32.mrf.mxu0 }
 0x144   :  { %v1882_v38 = vpop.f32.mrf.mxu2 }
 0x145   :  { %v1922_v9 = vadd.f32 %v1882_v38, %v1727_v24 }
 0x146   :  { %v2300_v17 = vpop.f32.mrf.mxu3  ;;  %v1689_v33 = vpop.f32.mrf.mxu1 }
 0x147   :  { %v2340_v8 = vadd.f32 %v2300_v17, %v1922_v9  ;;  %v1728_v18 = vadd.f32 %v1689_v33, %v4577_v55 }
 0x149   :  { %v2614_v34 = vadd.f32 %v2574_v0, %v2340_v8 }
 0x14a   :  { %v2576_v19 = vpop.f32.mrf.mxu0 }
 0x14b   :  { %v2684_v23 = vmul.f32 %v2614_v34, %v2614_v34 }
 0x14c   :  { %v1884_v44 = vpop.f32.mrf.mxu2 }
 0x14d   :  { %v1923_v51 = vadd.f32 %v1884_v44, %v1728_v18 }
 0x14e   :  { %v2302_v5 = vpop.f32.mrf.mxu3  ;;  %v1692_v10 = vpop.f32.mrf.mxu1 }
 0x14f   :  { %v2341_v3 = vadd.f32 %v2302_v5, %v1923_v51  ;;  %v1729_v25 = vadd.f32 %v1692_v10, %v4598_v7 }
 0x151   :  { %v2615_v12 = vadd.f32 %v2576_v19, %v2341_v3 }
 0x152   :  { %v2579_v30 = vpop.f32.mrf.mxu0 }
 0x153   :  { %v3517_v21 = vpack.c.bf16 %v2615_v12, %v2614_v34  ;;  %v2662_v62 = vadd.f32 %v2615_v12, %v2614_v34  ;;  %v2685_v60 = vmul.f32 %v2615_v12, %v2615_v12 }
 0x154   :  { %v1887_v22 = vpop.f32.mrf.mxu2 }
 0x155   :  { %3518 = vst [vmem:[%s4948_s2] sm:$0xff] %v3517_v21   ;;  %v2700_v55 = vadd.f32 %v2685_v60, %v2684_v23  ;;  %v1924_v37 = vadd.f32 %v1887_v22, %v1729_v25 }
 0x156   :  { %v2305_v42 = vpop.f32.mrf.mxu3  ;;  %v1694_v26 = vpop.f32.mrf.mxu1 }
 0x157   :  { %v2342_v36 = vadd.f32 %v2305_v42, %v1924_v37  ;;  %v1730_v45 = vadd.f32 %v1694_v26, %v4630_v4 }
 0x159   :  { %v2616_v27 = vadd.f32 %v2579_v30, %v2342_v36 }
 0x15a   :  { %v2581_v46 = vpop.f32.mrf.mxu0 }
 0x15b   :  { %v2663_v31 = vadd.f32 %v2662_v62, %v2616_v27  ;;  %v2686_v32 = vmul.f32 %v2616_v27, %v2616_v27 }
 0x15c   :  { %v1889_v56 = vpop.f32.mrf.mxu2 }
 0x15d   :  { %v2701_v59 = vadd.f32 %v2700_v55, %v2686_v32  ;;  %v1925_v7 = vadd.f32 %v1889_v56, %v1730_v45 }
 0x15e   :  { %v2307_v47 = vpop.f32.mrf.mxu3  ;;  %v1697_v49 = vpop.f32.mrf.mxu1 }
 0x15f   :  { %v2343_v16 = vadd.f32 %v2307_v47, %v1925_v7  ;;  %v1731_v53 = vadd.f32 %v1697_v49, %v4657_v35 }
 0x161   :  { %v2617_v50 = vadd.f32 %v2581_v46, %v2343_v16 }
 0x162   :  { %v2584_v57 = vpop.f32.mrf.mxu0 }
 0x163   :  { %v3522_v48 = vpack.c.bf16 %v2617_v50, %v2616_v27  ;;  %v2664_v2 = vadd.f32 %v2663_v31, %v2617_v50  ;;  %v2687_v28 = vmul.f32 %v2617_v50, %v2617_v50 }
 0x164   :  { %v1892_v15 = vpop.f32.mrf.mxu2 }
 0x165   :  { %3554 = vst [vmem:[%s4948_s2 + $0x8] sm:$0xff] %v3522_v48   ;;  %v2702_v4 = vadd.f32 %v2701_v59, %v2687_v28  ;;  %v1926_v58 = vadd.f32 %v1892_v15, %v1731_v53 }
 0x166   :  { %v2310_v40 = vpop.f32.mrf.mxu3  ;;  %v1699_v63 = vpop.f32.mrf.mxu1 }
 0x167   :  { %v2344_v11 = vadd.f32 %v2310_v40, %v1926_v58  ;;  %v1732_v38 = vadd.f32 %v1699_v63, %v4688_v52 }
 0x169   :  { %v2618_v6 = vadd.f32 %v2584_v57, %v2344_v11 }
 0x16a   :  { %v2586_v17 = vpop.f32.mrf.mxu0 }
 0x16b   :  { %v2665_v0 = vadd.f32 %v2664_v2, %v2618_v6  ;;  %v2688_v24 = vmul.f32 %v2618_v6, %v2618_v6 }
 0x16c   :  { %v1894_v9 = vpop.f32.mrf.mxu2 }
 0x16d   :  { %v2703_v33 = vadd.f32 %v2702_v4, %v2688_v24  ;;  %v1927_v35 = vadd.f32 %v1894_v9, %v1732_v38 }
 0x16e   :  { %v2312_v8 = vpop.f32.mrf.mxu3  ;;  %v1702_v18 = vpop.f32.mrf.mxu1 }
 0x16f   :  { %v2345_v19 = vadd.f32 %v2312_v8, %v1927_v35  ;;  %v1733_v10 = vadd.f32 %v1702_v18, %v4710_v61 }
 0x171   :  { %v2619_v44 = vadd.f32 %v2586_v17, %v2345_v19 }
 0x172   :  { %v2589_v3 = vpop.f32.mrf.mxu0 }
 0x173   :  { %v3527_v51 = vpack.c.bf16 %v2619_v44, %v2618_v6  ;;  %v2666_v5 = vadd.f32 %v2665_v0, %v2619_v44  ;;  %v2689_v34 = vmul.f32 %v2619_v44, %v2619_v44 }
 0x174   :  { %v1897_v12 = vpop.f32.mrf.mxu2 }
 0x175   :  { %3555 = vst [vmem:[%s4948_s2 + $0x10] sm:$0xff] %v3527_v51   ;;  %v2704_v52 = vadd.f32 %v2703_v33, %v2689_v34  ;;  %v1928_v23 = vadd.f32 %v1897_v12, %v1733_v10 }
 0x176   :  { %v2315_v21 = vpop.f32.mrf.mxu3  ;;  %v1704_v62 = vpop.f32.mrf.mxu1 }
 0x177   :  { %v2346_v60 = vadd.f32 %v2315_v21, %v1928_v23  ;;  %v1734_v55 = vadd.f32 %v1704_v62, %v4750_v14 }
 0x179   :  { %v2620_v25 = vadd.f32 %v2589_v3, %v2346_v60 }
 0x17a   :  { %v2591_v37 = vpop.f32.mrf.mxu0 }
 0x17b   :  { %v2667_v30 = vadd.f32 %v2666_v5, %v2620_v25  ;;  %v2690_v22 = vmul.f32 %v2620_v25, %v2620_v25 }
 0x17c   :  { %v1899_v42 = vpop.f32.mrf.mxu2 }
 0x17d   :  { %v2705_v26 = vadd.f32 %v2704_v52, %v2690_v22  ;;  %v1929_v61 = vadd.f32 %v1899_v42, %v1734_v55 }
 0x17e   :  { %v2317_v36 = vpop.f32.mrf.mxu3  ;;  %v1707_v27 = vpop.f32.mrf.mxu1 }
 0x17f   :  { %v2347_v31 = vadd.f32 %v2317_v36, %v1929_v61  ;;  %v1735_v59 = vadd.f32 %v1707_v27, %v4776_v29 }
 0x181   :  { %v2621_v32 = vadd.f32 %v2591_v37, %v2347_v31 }
 0x182   :  { %v2594_v7 = vpop.f32.mrf.mxu0 }
 0x183   :  { %v3532_v45 = vpack.c.bf16 %v2621_v32, %v2620_v25  ;;  %v2668_v46 = vadd.f32 %v2667_v30, %v2621_v32  ;;  %v2691_v56 = vmul.f32 %v2621_v32, %v2621_v32 }
 0x184   :  { %v1902_v47 = vpop.f32.mrf.mxu2 }
 0x185   :  { %3556 = vst [vmem:[%s4948_s2 + $0x18] sm:$0xff] %v3532_v45   ;;  %v2706_v14 = vadd.f32 %v2705_v26, %v2691_v56  ;;  %v1930_v49 = vadd.f32 %v1902_v47, %v1735_v59 }
 0x186   :  { %v2320_v16 = vpop.f32.mrf.mxu3  ;;  %v1709_v50 = vpop.f32.mrf.mxu1 }
 0x187   :  { %v2348_v48 = vadd.f32 %v2320_v16, %v1930_v49  ;;  %v1736_v57 = vadd.f32 %v1709_v50, %v4812_v41 }
 0x189   :  { %v2622_v2 = vadd.f32 %v2594_v7, %v2348_v48 }
 0x18a   :  { %v2596_v15 = vpop.f32.mrf.mxu0 }
 0x18b   :  { %v2669_v28 = vadd.f32 %v2668_v46, %v2622_v2  ;;  %v2692_v53 = vmul.f32 %v2622_v2, %v2622_v2 }
 0x18c   :  { %v1904_v4 = vpop.f32.mrf.mxu2 }
 0x18d   :  { %v2707_v58 = vadd.f32 %v2706_v14, %v2692_v53  ;;  %v1931_v29 = vadd.f32 %v1904_v4, %v1736_v57 }
 0x18e   :  { %v2322_v40 = vpop.f32.mrf.mxu3  ;;  %v1712_v63 = vpop.f32.mrf.mxu1 }
 0x18f   :  { %v2349_v11 = vadd.f32 %v2322_v40, %v1931_v29  ;;  %v1737_v17 = vadd.f32 %v1712_v63, %v4833_v39 }
 0x191   :  { %v2623_v6 = vadd.f32 %v2596_v15, %v2349_v11 }
 0x192   :  { %v2599_v9 = vpop.f32.mrf.mxu0 }
 0x193   :  { %v3537_v0 = vpack.c.bf16 %v2623_v6, %v2622_v2  ;;  %v2670_v24 = vadd.f32 %v2669_v28, %v2623_v6  ;;  %v2693_v38 = vmul.f32 %v2623_v6, %v2623_v6 }
 0x194   :  { %v1907_v33 = vpop.f32.mrf.mxu2 }
 0x195   :  { %3557 = vst [vmem:[%s4948_s2 + $0x20] sm:$0xff] %v3537_v0   ;;  %v2708_v41 = vadd.f32 %v2707_v58, %v2693_v38  ;;  %v1932_v35 = vadd.f32 %v1907_v33, %v1737_v17 }
 0x196   :  { %v2325_v8 = vpop.f32.mrf.mxu3  ;;  %v1714_v18 = vpop.f32.mrf.mxu1 }
 0x197   :  { %v2350_v19 = vadd.f32 %v2325_v8, %v1932_v35  ;;  %v1738_v34 = vadd.f32 %v1714_v18, %v4858_v1 }
 0x199   :  { %v2624_v44 = vadd.f32 %v2599_v9, %v2350_v19 }
 0x19a   :  { %v2601_v10 = vpop.f32.mrf.mxu0 }
 0x19b   :  { %v2671_v51 = vadd.f32 %v2670_v24, %v2624_v44  ;;  %v2694_v5 = vmul.f32 %v2624_v44, %v2624_v44 }
 0x19c   :  { %v1909_v3 = vpop.f32.mrf.mxu2 }
 0x19d   :  { %v2709_v12 = vadd.f32 %v2708_v41, %v2694_v5  ;;  %v1933_v39 = vadd.f32 %v1909_v3, %v1738_v34 }
 0x19e   :  { %v2327_v52 = vpop.f32.mrf.mxu3  ;;  %v1717_v23 = vpop.f32.mrf.mxu1 }
 0x19f   :  { %v2351_v21 = vadd.f32 %v2327_v52, %v1933_v39  ;;  %v1739_v22 = vadd.f32 %v1717_v23, %v4879_v20 }
 0x1a1   :  { %v2625_v62 = vadd.f32 %v2601_v10, %v2351_v21 }
 0x1a2   :  { %v2604_v55 = vpop.f32.mrf.mxu0 }
 0x1a3   :  { %v3542_v60 = vpack.c.bf16 %v2625_v62, %v2624_v44  ;;  %v2672_v25 = vadd.f32 %v2671_v51, %v2625_v62  ;;  %v2695_v30 = vmul.f32 %v2625_v62, %v2625_v62 }
 0x1a4   :  { %v1912_v37 = vpop.f32.mrf.mxu2 }
 0x1a5   :  { %3558 = vst [vmem:[%s4948_s2 + $0x28] sm:$0xff] %v3542_v60   ;;  %v2710_v1 = vadd.f32 %v2709_v12, %v2695_v30  ;;  %v1934_v42 = vadd.f32 %v1912_v37, %v1739_v22 }
 0x1a6   :  { %v2330_v26 = vpop.f32.mrf.mxu3  ;;  %v1719_v61 = vpop.f32.mrf.mxu1 }
 0x1a7   :  { %v2352_v36 = vadd.f32 %v2330_v26, %v1934_v42  ;;  %v1740_v45 = vadd.f32 %v1719_v61, %v4892_v43 }
 0x1a9   :  { %v2626_v27 = vadd.f32 %v2604_v55, %v2352_v36 }
 0x1aa   :  { %v2606_v46 = vpop.f32.mrf.mxu0 }
 0x1ab   :  { %v2673_v31 = vadd.f32 %v2672_v25, %v2626_v27  ;;  %v2696_v32 = vmul.f32 %v2626_v27, %v2626_v27 }
 0x1ac   :  { %v1914_v56 = vpop.f32.mrf.mxu2 }
 0x1ad   :  { %v2711_v59 = vadd.f32 %v2710_v1, %v2696_v32  ;;  %v1935_v20 = vadd.f32 %v1914_v56, %v1740_v45 }
 0x1ae   :  { %v2332_v7 = vpop.f32.mrf.mxu3  ;;  %v1722_v47 = vpop.f32.mrf.mxu1 }
 0x1af   :  { %v2353_v14 = vadd.f32 %v2332_v7, %v1935_v20  ;;  %v1741_v2 = vadd.f32 %v1722_v47, %v4895_v54 }
 0x1b1   :  { %v2627_v49 = vadd.f32 %v2606_v46, %v2353_v14 }
 0x1b2   :  { %v2609_v15 = vpop.f32.mrf.mxu0 }
 0x1b3   :  { %v3547_v16 = vpack.c.bf16 %v2627_v49, %v2626_v27  ;;  %v2674_v50 = vadd.f32 %v2673_v31, %v2627_v49  ;;  %v2697_v48 = vmul.f32 %v2627_v49, %v2627_v49 }
 0x1b4   :  { %v1917_v28 = vpop.f32.mrf.mxu2 }
 0x1b5   :  { %3559 = vst [vmem:[%s4948_s2 + $0x30] sm:$0xff] %v3547_v16   ;;  %v2712_v53 = vadd.f32 %v2711_v59, %v2697_v48  ;;  %v1936_v43 = vadd.f32 %v1917_v28, %v1741_v2 }
 0x1b6   :  { %v2335_v57 = vpop.f32.mrf.mxu3  ;;  %v1724_v58 = vpop.f32.mrf.mxu1 }
 0x1b7   :  { %v2354_v4 = vadd.f32 %v2335_v57, %v1936_v43  ;;  %v1742_v11 = vadd.f32 %v1724_v58, %v4898_v13 }
 0x1b9   :  { %v2628_v29 = vadd.f32 %v2609_v15, %v2354_v4 }
 0x1ba   :  { %v2611_v17 = vpop.f32.mrf.mxu0 }
 0x1bb   :  { %v2675_v40 = vadd.f32 %v2674_v50, %v2628_v29  ;;  %v2698_v63 = vmul.f32 %v2628_v29, %v2628_v29 }
 0x1bc   :  { %v1919_v6 = vpop.f32.mrf.mxu2 }
 0x1bd   :  { %v2713_v0 = vadd.f32 %v2712_v53, %v2698_v63  ;;  %v1937_v24 = vadd.f32 %v1919_v6, %v1742_v11 }
 0x1be   :  { %v2337_v54 = vpop.f32.mrf.mxu3 }
 0x1bf   :  { %v2355_v38 = vadd.f32 %v2337_v54, %v1937_v24 }
 0x1c1   :  { %v2629_v9 = vadd.f32 %v2611_v17, %v2355_v38 }
 0x1c3   :  { %v3552_v33 = vpack.c.bf16 %v2629_v9, %v2628_v29  ;;  %v2676_v41 = vadd.f32 %v2675_v40, %v2629_v9  ;;  %v2699_v35 = vmul.f32 %v2629_v9, %v2629_v9 }
 0x1c5   :  { %3560 = vst [vmem:[%s4948_s2 + $0x38] sm:$0xff] %v3552_v33   ;;  %v2677_v8 = vrot.slane %v2676_v41, 4  ;;  %v2714_v18 = vadd.f32 %v2713_v0, %v2699_v35 }
 0x1c7   :  { %v2678_v19 = vadd.f32 %v2677_v8, %v2676_v41  ;;  %v2715_v44 = vrot.slane %v2714_v18, 4 }
 0x1c9   :  { %v2679_v51 = vrot.slane %v2678_v19, 2  ;;  %v2716_v13 = vadd.f32 %v2715_v44, %v2714_v18 }
 0x1cb   :  { %v2680_v5 = vadd.f32 %v2679_v51, %v2678_v19  ;;  %v2717_v34 = vrot.slane %v2716_v13, 2 }
 0x1cd   :  { %v2681_v10 = vrot.slane %v2680_v5, 1  ;;  %v2718_v3 = vadd.f32 %v2717_v34, %v2716_v13 }
 0x1cf   :  { %v2682_v12 = vadd.f32 %v2681_v10, %v2680_v5  ;;  %v2719_v39 = vrot.slane %v2718_v3, 1 }
 0x1d1   :  { %2683 = vst [vmem:[%s4949_s3] sm:$0x1] %v2682_v12  ;;  %v2720_v52 = vadd.f32 %v2719_v39, %v2718_v3 }
 0x1d3   :  { %2721 = vst [vmem:[%s4949_s3 + $0x1] sm:$0x1] %v2720_v52 }

</bundles_post_ra>
